<compile_context>
chip_gen: v7x
topology: tpu7x:2x2x1
jax: 0.10.0
libtpu: 0.0.40
codegen_flags: <defaults>
</compile_context>

<pallas_src>
import jax
import jax.numpy as jnp
import numpy as np
from jax.experimental import pallas as pl
from jax.experimental.pallas import tpu as pltpu

LN_EPS = 1e-6
GN_EPS = 1e-6
NUM_GROUPS = 16

# packed per-channel parameter columns (all f32, one (C, NPACK) array)
(_LN_W, _LN_B, _FC_W, _FC_B, _GFC_W, _GFC_B,
 _GN_G, _GN_B, _PSI_B, _CONV_B, _B2) = range(11)
_PSI_W0 = 11            # 3 columns  (psi conv taps)
_CONV_W0 = 14           # 7 columns  (fused convw + convkw taps)
_ONEHOT0 = 21           # NUM_GROUPS columns (group one-hot)
_NPACK = _ONEHOT0 + NUM_GROUPS   # 37


def _pick_hidden_chunk(H):
    if H <= 512:
        return H
    for c in (512, 384, 256, 128):
        if H % c == 0:
            return c
    return H


# ---------------------------------------------------------------------------
# kernel factory: one grid step == one batch element, block = (C, T_pad)
# ---------------------------------------------------------------------------
def _make_kernel(C, T_orig, T_pad, k_psi, k_big, H, tH):
    pad = k_big // 2
    half_psi = k_psi // 2
    slack = T_pad - T_orig          # zero columns available past the valid region
    gs = C // NUM_GROUPS
    inv_T = 1.0 / float(T_orig)
    inv_cnt = 1.0 / float(gs * T_orig)
    n_chunks = H // tH

    def kernel(x_ref, mask_ref, cpk_ref, w1_ref, b1_ref, w2_ref, out_ref):
        x = x_ref[...].astype(jnp.float32)          # (C, T_pad)
        mask = mask_ref[...].astype(jnp.float32)    # (1, T_pad)
        cp = cpk_ref[...]                           # (C, NPACK) f32 packed params

        t_idx = jax.lax.broadcasted_iota(jnp.int32, (1, T_pad), 1)
        valid = (t_idx < T_orig).astype(jnp.float32)          # (1, T_pad)

        # ---- LayerNorm over channels (per time column) ----
        mu = jnp.mean(x, axis=0, keepdims=True)
        var = jnp.mean((x - mu) ** 2, axis=0, keepdims=True)
        ln = ((x - mu) * jax.lax.rsqrt(var + LN_EPS)
              * cp[:, _LN_W:_LN_W + 1] + cp[:, _LN_B:_LN_B + 1])
        ln = ln * valid                # zero padded time columns

        # ---- depthwise convs over time via XLU lane rotations of ln ----
        conv = ln * cp[:, _CONV_W0 + pad:_CONV_W0 + pad + 1]          # center taps
        psi = ln * cp[:, _PSI_W0 + half_psi:_PSI_W0 + half_psi + 1]
        for off in range(-pad, pad + 1):
            if off == 0:
                continue
            # sh[:, t] = ln[:, t + off]  (zero outside the valid region)
            sh = pltpu.roll(ln, (-off) % T_pad, axis=1)
            if off > 0 and slack < off:            # wrap touches valid columns
                sh = jnp.where(t_idx < (T_pad - off), sh, 0.0)
            elif off < 0 and slack < -off:
                sh = jnp.where(t_idx >= (-off), sh, 0.0)
            tap = _CONV_W0 + off + pad
            conv = conv + sh * cp[:, tap:tap + 1]
            if abs(off) <= half_psi:
                ptap = _PSI_W0 + off + half_psi
                psi = psi + sh * cp[:, ptap:ptap + 1]
        conv = conv + cp[:, _CONV_B:_CONV_B + 1]
        psi = psi + cp[:, _PSI_B:_PSI_B + 1]

        # ---- per-channel fc and global branch phi ----
        fc = ln * cp[:, _FC_W:_FC_W + 1] + cp[:, _FC_B:_FC_B + 1]
        gmean = jnp.sum(ln, axis=1, keepdims=True) * inv_T             # (C, 1)
        phi = jnp.maximum(gmean * cp[:, _GFC_W:_GFC_W + 1]
                          + cp[:, _GFC_B:_GFC_B + 1], 0.0)

        out = fc * phi + jnp.maximum(conv, 0.0) * psi + ln
        out = (x * mask + out) * valid             # masked residual, padded cols -> 0

        # ---- GroupNorm(16, C): one-hot segment sums (no per-group loops) ----
        onehot = cp[:, _ONEHOT0:_ONEHOT0 + NUM_GROUPS]                 # (C, 16)
        colsum = jnp.sum(out, axis=1, keepdims=True)                   # (C, 1)
        gsum = jnp.sum(onehot * colsum, axis=0, keepdims=True)         # (1, 16)
        gmu = jnp.sum(onehot * gsum, axis=1, keepdims=True) * inv_cnt  # (C, 1)
        dev = (out - gmu) * valid
        colsq = jnp.sum(dev * dev, axis=1, keepdims=True)
        gss = jnp.sum(onehot * colsq, axis=0, keepdims=True)
        gvar = jnp.sum(onehot * gss, axis=1, keepdims=True) * inv_cnt
        gn = (dev * jax.lax.rsqrt(gvar + GN_EPS)
              * cp[:, _GN_G:_GN_G + 1] + cp[:, _GN_B:_GN_B + 1])

        # ---- MLP, K-blocked over the hidden dim; bf16 MXU + bf16 tanh-GELU ----
        gnb = gn.astype(jnp.bfloat16)
        mlp = jnp.zeros((C, T_pad), jnp.float32)
        for ci in range(n_chunks):
            lo, hi = ci * tH, (ci + 1) * tH
            h = jnp.dot(w1_ref[lo:hi, :], gnb,
                        preferred_element_type=jnp.float32) + b1_ref[lo:hi, :]
            hb = jax.nn.gelu(h.astype(jnp.bfloat16),
                             approximate=True).astype(jnp.bfloat16)
            mlp = mlp + jnp.dot(w2_ref[:, lo:hi], hb,
                                preferred_element_type=jnp.float32)
        mlp = mlp + cp[:, _B2:_B2 + 1]

        out_ref[...] = (out + mlp).astype(out_ref.dtype)

    return kernel


# ---------------------------------------------------------------------------
# wrapper
# ---------------------------------------------------------------------------
def dyne_layer_forward(x_bct, mask_bt, p, *, single_buffer_weights=True):
    """x_bct: (B, C, T) float32, mask_bt: (B, T) bool -> ((B, C, T) f32, (B, T) bool)."""
    B, C, T = x_bct.shape
    assert C % NUM_GROUPS == 0, "GroupNorm(16, C) requires C % 16 == 0"

    k_small = p["psi_w"].shape[1]        # 3
    k_big = p["convkw_w"].shape[1]       # 7
    pad = k_big // 2

    # lane-dense time: pad T to a multiple of 128 (stats use the original T)
    T_pad = ((T + 127) // 128) * 128
    x = jnp.pad(x_bct.astype(jnp.float32), ((0, 0), (0, 0), (0, T_pad - T)))
    mask_f = jnp.pad(mask_bt.astype(jnp.float32), ((0, 0), (0, T_pad - T)))[:, None, :]

    # Fuse convw (K=3) into convkw (K=7): one depthwise conv, summed biases.
    dpad = (k_big - k_small) // 2
    conv_w = p["convkw_w"] + jnp.pad(p["convw_w"], ((0, 0), (dpad, dpad)))
    conv_b = p["convkw_b"] + p["convw_b"]

    gs = C // NUM_GROUPS
    onehot = jnp.asarray(np.eye(NUM_GROUPS, dtype=np.float32)[np.arange(C) // gs])

    # one packed (C, 37) per-channel parameter array -> single DMA / VMEM tile
    cpk = jnp.concatenate(
        [p["ln_w"], p["ln_b"], p["fc_w"], p["fc_b"],
         p["gfc_w"], p["gfc_b"], p["gn_g"], p["gn_b"],
         p["psi_b"], conv_b, p["b2"],
         p["psi_w"], conv_w, onehot], axis=1).astype(jnp.float32)
    assert cpk.shape == (C, _NPACK)

    w1 = p["w1"].astype(jnp.bfloat16)           # (H, C)
    w2 = p["w2"].astype(jnp.bfloat16)           # (C, H)
    b1 = p["b1"].astype(jnp.float32)            # (H, 1)
    H = w1.shape[0]
    tH = _pick_hidden_chunk(H)

    kernel = _make_kernel(C, T, T_pad, k_small, k_big, H, tH)

    def weight_spec(a):
        nd = a.ndim
        idx = lambda b, _nd=nd: (0,) * _nd
        if single_buffer_weights:
            # block index constant across the grid -> one VMEM buffer suffices
            return pl.BlockSpec(a.shape, idx, pipeline_mode=pl.Buffered(1))
        return pl.BlockSpec(a.shape, idx)

    in_specs = [
        pl.BlockSpec((None, C, T_pad), lambda b: (b, 0, 0)),   # x, one batch/step
        pl.BlockSpec((None, 1, T_pad), lambda b: (b, 0, 0)),   # mask (lane-dense)
        weight_spec(cpk), weight_spec(w1), weight_spec(b1), weight_spec(w2),
    ]

    # VMEM budget from the actual buffers (kept well under v7x's 64 MiB):
    #  double-buffered x/out blocks, mask blocks, packed params (lane-padded),
    #  bf16 MLP weights, b1, in-kernel temporaries, and the bounded h chunk.
    wbuf = 1 if single_buffer_weights else 2
    est = (4 * C * T_pad * 4                 # x + out, double-buffered
           + 2 * 2 * T_pad * 4               # mask blocks
           + wbuf * (C * 128 * 4             # packed channel params (lane-padded)
                     + 2 * H * C * 2         # w1, w2 (bf16)
                     + H * 128 * 4)          # b1 (lane-padded)
           + 10 * C * T_pad * 4              # ln/conv/psi/out/dev/mlp/... temporaries
           + tH * T_pad * 6)                 # h chunk (f32 acc + bf16 copy)
    vmem_limit = int(min(max(est, 32 * 1024 * 1024), 56 * 1024 * 1024))

    out = pl.pallas_call(
        kernel,
        out_shape=jax.ShapeDtypeStruct((B, C, T_pad), jnp.float32),
        grid=(B,),
        in_specs=in_specs,
        out_specs=pl.BlockSpec((None, C, T_pad), lambda b: (b, 0, 0)),
        compiler_params=pltpu.CompilerParams(
            dimension_semantics=("parallel",),
            vmem_limit_bytes=vmem_limit,
        ),
    )(x, mask_f, cpk, w1, b1, w2)

    out_mask = mask_bt.astype(bool)    # downsample is Identity (n_ds_stride=1)
    return out[:, :, :T], out_mask


# ---------------------------------------------------------------------------
# deterministic parameter init (mirrors reset_params: conv weights ~ N(0, 0.1),
# conv biases 0).  All per-channel params are stored channel-major: (C, ...)
# ---------------------------------------------------------------------------
def init_params(key, C, kernel_size=3, k=1.5, init_conv_vars=0.1):
    up = round((kernel_size + 1) * k)
    up = up + 1 if up % 2 == 0 else up           # -> 7
    H = 4 * C
    ks = jax.random.split(key, 12)
    p = {}
    p["ln_w"] = 1.0 + 0.1 * jax.random.normal(ks[0], (C, 1), jnp.float32)
    p["ln_b"] = 0.1 * jax.random.normal(ks[1], (C, 1), jnp.float32)
    p["psi_w"] = init_conv_vars * jax.random.normal(ks[2], (C, kernel_size), jnp.float32)
    p["psi_b"] = jnp.zeros((C, 1), jnp.float32)
    p["convw_w"] = init_conv_vars * jax.random.normal(ks[3], (C, kernel_size), jnp.float32)
    p["convw_b"] = jnp.zeros((C, 1), jnp.float32)
    p["convkw_w"] = init_conv_vars * jax.random.normal(ks[4], (C, up), jnp.float32)
    p["convkw_b"] = jnp.zeros((C, 1), jnp.float32)
    p["fc_w"] = init_conv_vars * jax.random.normal(ks[5], (C, 1), jnp.float32)
    p["fc_b"] = jnp.zeros((C, 1), jnp.float32)
    p["gfc_w"] = init_conv_vars * jax.random.normal(ks[6], (C, 1), jnp.float32)
    p["gfc_b"] = jnp.zeros((C, 1), jnp.float32)
    p["gn_g"] = 1.0 + 0.1 * jax.random.normal(ks[7], (C, 1), jnp.float32)
    p["gn_b"] = 0.1 * jax.random.normal(ks[8], (C, 1), jnp.float32)
    p["w1"] = 0.05 * jax.random.normal(ks[9], (4 * C, C), jnp.float32)
    p["b1"] = 0.05 * jax.random.normal(ks[10], (4 * C, 1), jnp.float32)
    p["w2"] = 0.05 * jax.random.normal(ks[11], (C, 4 * C), jnp.float32)
    p["b2"] = jnp.zeros((C, 1), jnp.float32)
    return p


# ---------------------------------------------------------------------------
# plain-JAX f32 reference (PyTorch semantics; for correctness check only)
# ---------------------------------------------------------------------------
def reference(x_bct, mask_bt, p):
    x = x_bct.astype(jnp.float32)                    # (B, C, T)
    B, C, T = x.shape
    m = mask_bt.astype(jnp.float32)[:, None, :]      # (B, 1, T)

    mu = x.mean(axis=1, keepdims=True)
    var = ((x - mu) ** 2).mean(axis=1, keepdims=True)
    ln = (x - mu) * jax.lax.rsqrt(var + LN_EPS) * p["ln_w"] + p["ln_b"]

    def dw(z, w, b):              # z (B,C,T), w (C,K), b (C,1)
        K = w.shape[1]
        pad = K // 2
        zp = jnp.pad(z, ((0, 0), (0, 0), (pad, pad)))
        acc = jnp.zeros_like(z)
        for kk in range(K):
            acc = acc + zp[:, :, kk:kk + T] * w[:, kk][None, :, None]
        return acc + b

    psi = dw(ln, p["psi_w"], p["psi_b"])
    convw = dw(ln, p["convw_w"], p["convw_b"])
    convkw = dw(ln, p["convkw_w"], p["convkw_b"])
    fc = ln * p["fc_w"] + p["fc_b"]
    phi = jnp.maximum(ln.mean(axis=2, keepdims=True) * p["gfc_w"] + p["gfc_b"], 0.0)
    out = fc * phi + jnp.maximum(convw + convkw, 0.0) * psi + ln
    out = x * m + out

    gs = C // NUM_GROUPS
    o4 = out.reshape(B, NUM_GROUPS, gs, T)
    gmu = o4.mean(axis=(2, 3), keepdims=True)
    gvar = ((o4 - gmu) ** 2).mean(axis=(2, 3), keepdims=True)
    gn = ((o4 - gmu) * jax.lax.rsqrt(gvar + GN_EPS)).reshape(B, C, T)
    gn = gn * p["gn_g"] + p["gn_b"]

    h = jnp.einsum("hc,bct->bht", p["w1"], gn) + p["b1"][None]
    h = jax.nn.gelu(h, approximate=False)
    mlp = jnp.einsum("ch,bht->bct", p["w2"], h) + p["b2"][None]
    return out + mlp, mask_bt.astype(bool)


if __name__ == "__main__":
    B, C, T = 2, 32, 16            # C must be divisible by 16 (GroupNorm(16, C))
    key = jax.random.PRNGKey(0)
    kx, km, kp = jax.random.split(key, 3)
    x = jax.random.normal(kx, (B, C, T), jnp.float32)
    mask = jax.random.uniform(km, (B, T)) > 0.3
    params = init_params(kp, C)

    try:
        out, out_mask = dyne_layer_forward(x, mask, params, single_buffer_weights=True)
        out = jax.block_until_ready(out)
    except Exception:
        # pl.Buffered(1) pipeline_mode unsupported on this jax build -> default buffering
        out, out_mask = dyne_layer_forward(x, mask, params, single_buffer_weights=False)
        out = jax.block_until_ready(out)

    ref_out, ref_mask = reference(x, mask, params)
    # bf16 MXU matmuls + bf16 tanh-GELU in the kernel vs f32 exact-GELU reference
    np.testing.assert_allclose(np.asarray(out), np.asarray(ref_out),
                               rtol=2e-2, atol=3e-2)
    assert bool(jnp.all(out_mask == ref_mask))
    print("KERNEL_OK")
</pallas_src>

<mosaic_0001>
module attributes {stable_mosaic.version = 11 : i64} {
  func.func @kernel(%arg0: i32, %arg1: memref<1x32x128xf32, #tpu.memory_space<vmem>>, %arg2: memref<1x1x128xf32, #tpu.memory_space<vmem>>, %arg3: memref<32x37xf32, #tpu.memory_space<vmem>>, %arg4: memref<128x32xbf16, #tpu.memory_space<vmem>>, %arg5: memref<128x1xf32, #tpu.memory_space<vmem>>, %arg6: memref<32x128xbf16, #tpu.memory_space<vmem>>, %arg7: memref<1x32x128xf32, #tpu.memory_space<vmem>>) attributes {dimension_semantics = [#tpu.dimension_semantics<parallel>], iteration_bounds = array<i64: 2>, scalar_prefetch = 0 : i64, scratch_operands = 0 : i64, tpu.core_type = #tpu.core_type<tc>, window_params = [{transform_indices = @transform_0, window_bounds = array<i64: 1, 32, 128>}, {transform_indices = @transform_1, window_bounds = array<i64: 1, 1, 128>}, {pipeline_mode = #tpu.pipeline_mode<synchronous>, transform_indices = @transform_2, window_bounds = array<i64: 32, 37>}, {pipeline_mode = #tpu.pipeline_mode<synchronous>, transform_indices = @transform_3, window_bounds = array<i64: 128, 32>}, {pipeline_mode = #tpu.pipeline_mode<synchronous>, transform_indices = @transform_4, window_bounds = array<i64: 128, 1>}, {pipeline_mode = #tpu.pipeline_mode<synchronous>, transform_indices = @transform_5, window_bounds = array<i64: 32, 128>}, {transform_indices = @transform_6, window_bounds = array<i64: 1, 32, 128>}]} {
    %c0 = arith.constant 0 : index
    %c0_0 = arith.constant 0 : index
    %c0_1 = arith.constant 0 : index
    %0 = vector.load %arg1[%c0, %c0_0, %c0_1] : memref<1x32x128xf32, #tpu.memory_space<vmem>>, vector<1x32x128xf32>
    %1 = vector.shape_cast %0 : vector<1x32x128xf32> to vector<32x128xf32>
    %c0_2 = arith.constant 0 : index
    %c0_3 = arith.constant 0 : index
    %c0_4 = arith.constant 0 : index
    %2 = vector.load %arg2[%c0_2, %c0_3, %c0_4] : memref<1x1x128xf32, #tpu.memory_space<vmem>>, vector<1x1x128xf32>
    %3 = vector.shape_cast %2 : vector<1x1x128xf32> to vector<1x128xf32>
    %c0_5 = arith.constant 0 : index
    %c0_6 = arith.constant 0 : index
    %4 = vector.load %arg3[%c0_5, %c0_6] : memref<32x37xf32, #tpu.memory_space<vmem>>, vector<32x37xf32>
    %5 = tpu.iota {dimensions = array<i32: 1>} : vector<1x128xi32>
    %c16_i32 = arith.constant 16 : i32
    %6 = vector.broadcast %c16_i32 : i32 to vector<1x128xi32>
    %7 = arith.cmpi slt, %5, %6 : vector<1x128xi32>
    %8 = arith.extui %7 : vector<1x128xi1> to vector<1x128xi32>
    %9 = arith.sitofp %8 : vector<1x128xi32> to vector<1x128xf32>
    %cst = arith.constant dense<0.000000e+00> : vector<128xf32>
    %10 = vector.multi_reduction <add>, %1, %cst [0] : vector<32x128xf32> to vector<128xf32>
    %11 = vector.shape_cast %10 : vector<128xf32> to vector<1x128xf32>
    %cst_7 = arith.constant 3.200000e+01 : f32
    %12 = vector.broadcast %cst_7 : f32 to vector<1x128xf32>
    %13 = arith.divf %11, %12 : vector<1x128xf32>
    %14 = vector.broadcast %13 : vector<1x128xf32> to vector<32x128xf32>
    %15 = arith.subf %1, %14 : vector<32x128xf32>
    %16 = arith.mulf %15, %15 : vector<32x128xf32>
    %cst_8 = arith.constant dense<0.000000e+00> : vector<128xf32>
    %17 = vector.multi_reduction <add>, %16, %cst_8 [0] : vector<32x128xf32> to vector<128xf32>
    %18 = vector.shape_cast %17 : vector<128xf32> to vector<1x128xf32>
    %cst_9 = arith.constant 3.200000e+01 : f32
    %19 = vector.broadcast %cst_9 : f32 to vector<1x128xf32>
    %20 = arith.divf %18, %19 : vector<1x128xf32>
    %21 = vector.broadcast %13 : vector<1x128xf32> to vector<32x128xf32>
    %22 = arith.subf %1, %21 : vector<32x128xf32>
    %cst_10 = arith.constant 9.99999997E-7 : f32
    %23 = vector.broadcast %cst_10 : f32 to vector<1x128xf32>
    %24 = arith.addf %20, %23 : vector<1x128xf32>
    %25 = math.rsqrt %24 : vector<1x128xf32>
    %26 = vector.broadcast %25 : vector<1x128xf32> to vector<32x128xf32>
    %27 = arith.mulf %22, %26 : vector<32x128xf32>
    %28 = vector.extract_strided_slice %4 {offsets = [0, 0], sizes = [32, 1], strides = [1, 1]} : vector<32x37xf32> to vector<32x1xf32>
    %29 = vector.broadcast %28 : vector<32x1xf32> to vector<32x128xf32>
    %30 = arith.mulf %27, %29 : vector<32x128xf32>
    %31 = vector.extract_strided_slice %4 {offsets = [0, 1], sizes = [32, 1], strides = [1, 1]} : vector<32x37xf32> to vector<32x1xf32>
    %32 = vector.broadcast %31 : vector<32x1xf32> to vector<32x128xf32>
    %33 = arith.addf %30, %32 : vector<32x128xf32>
    %34 = vector.broadcast %9 : vector<1x128xf32> to vector<32x128xf32>
    %35 = arith.mulf %33, %34 : vector<32x128xf32>
    %36 = vector.extract_strided_slice %4 {offsets = [0, 17], sizes = [32, 1], strides = [1, 1]} : vector<32x37xf32> to vector<32x1xf32>
    %37 = vector.broadcast %36 : vector<32x1xf32> to vector<32x128xf32>
    %38 = arith.mulf %35, %37 : vector<32x128xf32>
    %39 = vector.extract_strided_slice %4 {offsets = [0, 12], sizes = [32, 1], strides = [1, 1]} : vector<32x37xf32> to vector<32x1xf32>
    %40 = vector.broadcast %39 : vector<32x1xf32> to vector<32x128xf32>
    %41 = arith.mulf %35, %40 : vector<32x128xf32>
    %c3_i32 = arith.constant 3 : i32
    %42 = tpu.dynamic_rotate %35 by %c3_i32 dim 1 : vector<32x128xf32>, i32 -> vector<32x128xf32>
    %43 = vector.extract_strided_slice %4 {offsets = [0, 14], sizes = [32, 1], strides = [1, 1]} : vector<32x37xf32> to vector<32x1xf32>
    %44 = vector.broadcast %43 : vector<32x1xf32> to vector<32x128xf32>
    %45 = arith.mulf %42, %44 : vector<32x128xf32>
    %46 = arith.addf %38, %45 : vector<32x128xf32>
    %c2_i32 = arith.constant 2 : i32
    %47 = tpu.dynamic_rotate %35 by %c2_i32 dim 1 : vector<32x128xf32>, i32 -> vector<32x128xf32>
    %48 = vector.extract_strided_slice %4 {offsets = [0, 15], sizes = [32, 1], strides = [1, 1]} : vector<32x37xf32> to vector<32x1xf32>
    %49 = vector.broadcast %48 : vector<32x1xf32> to vector<32x128xf32>
    %50 = arith.mulf %47, %49 : vector<32x128xf32>
    %51 = arith.addf %46, %50 : vector<32x128xf32>
    %c1_i32 = arith.constant 1 : i32
    %52 = tpu.dynamic_rotate %35 by %c1_i32 dim 1 : vector<32x128xf32>, i32 -> vector<32x128xf32>
    %53 = vector.extract_strided_slice %4 {offsets = [0, 16], sizes = [32, 1], strides = [1, 1]} : vector<32x37xf32> to vector<32x1xf32>
    %54 = vector.broadcast %53 : vector<32x1xf32> to vector<32x128xf32>
    %55 = arith.mulf %52, %54 : vector<32x128xf32>
    %56 = arith.addf %51, %55 : vector<32x128xf32>
    %57 = vector.extract_strided_slice %4 {offsets = [0, 11], sizes = [32, 1], strides = [1, 1]} : vector<32x37xf32> to vector<32x1xf32>
    %58 = vector.broadcast %57 : vector<32x1xf32> to vector<32x128xf32>
    %59 = arith.mulf %52, %58 : vector<32x128xf32>
    %60 = arith.addf %41, %59 : vector<32x128xf32>
    %c127_i32 = arith.constant 127 : i32
    %61 = tpu.dynamic_rotate %35 by %c127_i32 dim 1 : vector<32x128xf32>, i32 -> vector<32x128xf32>
    %62 = vector.extract_strided_slice %4 {offsets = [0, 18], sizes = [32, 1], strides = [1, 1]} : vector<32x37xf32> to vector<32x1xf32>
    %63 = vector.broadcast %62 : vector<32x1xf32> to vector<32x128xf32>
    %64 = arith.mulf %61, %63 : vector<32x128xf32>
    %65 = arith.addf %56, %64 : vector<32x128xf32>
    %66 = vector.extract_strided_slice %4 {offsets = [0, 13], sizes = [32, 1], strides = [1, 1]} : vector<32x37xf32> to vector<32x1xf32>
    %67 = vector.broadcast %66 : vector<32x1xf32> to vector<32x128xf32>
    %68 = arith.mulf %61, %67 : vector<32x128xf32>
    %69 = arith.addf %60, %68 : vector<32x128xf32>
    %c126_i32 = arith.constant 126 : i32
    %70 = tpu.dynamic_rotate %35 by %c126_i32 dim 1 : vector<32x128xf32>, i32 -> vector<32x128xf32>
    %71 = vector.extract_strided_slice %4 {offsets = [0, 19], sizes = [32, 1], strides = [1, 1]} : vector<32x37xf32> to vector<32x1xf32>
    %72 = vector.broadcast %71 : vector<32x1xf32> to vector<32x128xf32>
    %73 = arith.mulf %70, %72 : vector<32x128xf32>
    %74 = arith.addf %65, %73 : vector<32x128xf32>
    %c125_i32 = arith.constant 125 : i32
    %75 = tpu.dynamic_rotate %35 by %c125_i32 dim 1 : vector<32x128xf32>, i32 -> vector<32x128xf32>
    %76 = vector.extract_strided_slice %4 {offsets = [0, 20], sizes = [32, 1], strides = [1, 1]} : vector<32x37xf32> to vector<32x1xf32>
    %77 = vector.broadcast %76 : vector<32x1xf32> to vector<32x128xf32>
    %78 = arith.mulf %75, %77 : vector<32x128xf32>
    %79 = arith.addf %74, %78 : vector<32x128xf32>
    %80 = vector.extract_strided_slice %4 {offsets = [0, 9], sizes = [32, 1], strides = [1, 1]} : vector<32x37xf32> to vector<32x1xf32>
    %81 = vector.broadcast %80 : vector<32x1xf32> to vector<32x128xf32>
    %82 = arith.addf %79, %81 : vector<32x128xf32>
    %83 = vector.extract_strided_slice %4 {offsets = [0, 8], sizes = [32, 1], strides = [1, 1]} : vector<32x37xf32> to vector<32x1xf32>
    %84 = vector.broadcast %83 : vector<32x1xf32> to vector<32x128xf32>
    %85 = arith.addf %69, %84 : vector<32x128xf32>
    %86 = vector.extract_strided_slice %4 {offsets = [0, 2], sizes = [32, 1], strides = [1, 1]} : vector<32x37xf32> to vector<32x1xf32>
    %87 = vector.broadcast %86 : vector<32x1xf32> to vector<32x128xf32>
    %88 = arith.mulf %35, %87 : vector<32x128xf32>
    %89 = vector.extract_strided_slice %4 {offsets = [0, 3], sizes = [32, 1], strides = [1, 1]} : vector<32x37xf32> to vector<32x1xf32>
    %90 = vector.broadcast %89 : vector<32x1xf32> to vector<32x128xf32>
    %91 = arith.addf %88, %90 : vector<32x128xf32>
    %cst_11 = arith.constant dense<0.000000e+00> : vector<32xf32>
    %92 = vector.multi_reduction <add>, %35, %cst_11 [1] : vector<32x128xf32> to vector<32xf32>
    %93 = vector.shape_cast %92 : vector<32xf32> to vector<32x1xf32>
    %cst_12 = arith.constant 6.250000e-02 : f32
    %94 = vector.broadcast %cst_12 : f32 to vector<32x1xf32>
    %95 = arith.mulf %93, %94 : vector<32x1xf32>
    %96 = vector.extract_strided_slice %4 {offsets = [0, 4], sizes = [32, 1], strides = [1, 1]} : vector<32x37xf32> to vector<32x1xf32>
    %97 = arith.mulf %95, %96 : vector<32x1xf32>
    %98 = vector.extract_strided_slice %4 {offsets = [0, 5], sizes = [32, 1], strides = [1, 1]} : vector<32x37xf32> to vector<32x1xf32>
    %99 = arith.addf %97, %98 : vector<32x1xf32>
    %cst_13 = arith.constant 0.000000e+00 : f32
    %100 = vector.broadcast %cst_13 : f32 to vector<32x1xf32>
    %101 = arith.maximumf %99, %100 : vector<32x1xf32>
    %102 = vector.broadcast %101 : vector<32x1xf32> to vector<32x128xf32>
    %103 = arith.mulf %91, %102 : vector<32x128xf32>
    %cst_14 = arith.constant 0.000000e+00 : f32
    %104 = vector.broadcast %cst_14 : f32 to vector<32x128xf32>
    %105 = arith.maximumf %82, %104 : vector<32x128xf32>
    %106 = arith.mulf %105, %85 : vector<32x128xf32>
    %107 = arith.addf %103, %106 : vector<32x128xf32>
    %108 = arith.addf %107, %35 : vector<32x128xf32>
    %109 = vector.broadcast %3 : vector<1x128xf32> to vector<32x128xf32>
    %110 = arith.mulf %1, %109 : vector<32x128xf32>
    %111 = arith.addf %110, %108 : vector<32x128xf32>
    %112 = vector.broadcast %9 : vector<1x128xf32> to vector<32x128xf32>
    %113 = arith.mulf %111, %112 : vector<32x128xf32>
    %114 = vector.extract_strided_slice %4 {offsets = [0, 21], sizes = [32, 16], strides = [1, 1]} : vector<32x37xf32> to vector<32x16xf32>
    %cst_15 = arith.constant dense<0.000000e+00> : vector<32xf32>
    %115 = vector.multi_reduction <add>, %113, %cst_15 [1] : vector<32x128xf32> to vector<32xf32>
    %116 = vector.shape_cast %115 : vector<32xf32> to vector<32x1xf32>
    %117 = vector.broadcast %116 : vector<32x1xf32> to vector<32x16xf32>
    %118 = arith.mulf %114, %117 : vector<32x16xf32>
    %cst_16 = arith.constant dense<0.000000e+00> : vector<16xf32>
    %119 = vector.multi_reduction <add>, %118, %cst_16 [0] : vector<32x16xf32> to vector<16xf32>
    %120 = vector.shape_cast %119 : vector<16xf32> to vector<1x16xf32>
    %121 = vector.broadcast %120 : vector<1x16xf32> to vector<32x16xf32>
    %122 = arith.mulf %114, %121 : vector<32x16xf32>
    %cst_17 = arith.constant dense<0.000000e+00> : vector<32xf32>
    %123 = vector.multi_reduction <add>, %122, %cst_17 [1] : vector<32x16xf32> to vector<32xf32>
    %124 = vector.shape_cast %123 : vector<32xf32> to vector<32x1xf32>
    %cst_18 = arith.constant 3.125000e-02 : f32
    %125 = vector.broadcast %cst_18 : f32 to vector<32x1xf32>
    %126 = arith.mulf %124, %125 : vector<32x1xf32>
    %127 = vector.broadcast %126 : vector<32x1xf32> to vector<32x128xf32>
    %128 = arith.subf %113, %127 : vector<32x128xf32>
    %129 = vector.broadcast %9 : vector<1x128xf32> to vector<32x128xf32>
    %130 = arith.mulf %128, %129 : vector<32x128xf32>
    %131 = arith.mulf %130, %130 : vector<32x128xf32>
    %cst_19 = arith.constant dense<0.000000e+00> : vector<32xf32>
    %132 = vector.multi_reduction <add>, %131, %cst_19 [1] : vector<32x128xf32> to vector<32xf32>
    %133 = vector.shape_cast %132 : vector<32xf32> to vector<32x1xf32>
    %134 = vector.broadcast %133 : vector<32x1xf32> to vector<32x16xf32>
    %135 = arith.mulf %114, %134 : vector<32x16xf32>
    %cst_20 = arith.constant dense<0.000000e+00> : vector<16xf32>
    %136 = vector.multi_reduction <add>, %135, %cst_20 [0] : vector<32x16xf32> to vector<16xf32>
    %137 = vector.shape_cast %136 : vector<16xf32> to vector<1x16xf32>
    %138 = vector.broadcast %137 : vector<1x16xf32> to vector<32x16xf32>
    %139 = arith.mulf %114, %138 : vector<32x16xf32>
    %cst_21 = arith.constant dense<0.000000e+00> : vector<32xf32>
    %140 = vector.multi_reduction <add>, %139, %cst_21 [1] : vector<32x16xf32> to vector<32xf32>
    %141 = vector.shape_cast %140 : vector<32xf32> to vector<32x1xf32>
    %cst_22 = arith.constant 3.125000e-02 : f32
    %142 = vector.broadcast %cst_22 : f32 to vector<32x1xf32>
    %143 = arith.mulf %141, %142 : vector<32x1xf32>
    %cst_23 = arith.constant 9.99999997E-7 : f32
    %144 = vector.broadcast %cst_23 : f32 to vector<32x1xf32>
    %145 = arith.addf %143, %144 : vector<32x1xf32>
    %146 = math.rsqrt %145 : vector<32x1xf32>
    %147 = vector.broadcast %146 : vector<32x1xf32> to vector<32x128xf32>
    %148 = arith.mulf %130, %147 : vector<32x128xf32>
    %149 = vector.extract_strided_slice %4 {offsets = [0, 6], sizes = [32, 1], strides = [1, 1]} : vector<32x37xf32> to vector<32x1xf32>
    %150 = vector.broadcast %149 : vector<32x1xf32> to vector<32x128xf32>
    %151 = arith.mulf %148, %150 : vector<32x128xf32>
    %152 = vector.extract_strided_slice %4 {offsets = [0, 7], sizes = [32, 1], strides = [1, 1]} : vector<32x37xf32> to vector<32x1xf32>
    %153 = vector.broadcast %152 : vector<32x1xf32> to vector<32x128xf32>
    %154 = arith.addf %151, %153 : vector<32x128xf32>
    %155 = arith.truncf %154 : vector<32x128xf32> to vector<32x128xbf16>
    %cst_24 = arith.constant 0.000000e+00 : f32
    %156 = vector.broadcast %cst_24 : f32 to vector<32x128xf32>
    %c0_25 = arith.constant 0 : index
    %c0_26 = arith.constant 0 : index
    %157 = vector.load %arg4[%c0_25, %c0_26] : memref<128x32xbf16, #tpu.memory_space<vmem>>, vector<128x32xbf16>
    %cst_27 = arith.constant dense<0.000000e+00> : vector<128x128xf32>
    %158 = tpu.matmul %157, %155, %cst_27 {dimension_numbers = #tpu.dot_dimension_numbers<[1], [0], [0], [1], [0, 0, 1, 1], [], []>} : vector<128x32xbf16>, vector<32x128xbf16>, vector<128x128xf32> -> vector<128x128xf32>
    %c0_28 = arith.constant 0 : index
    %c0_29 = arith.constant 0 : index
    %159 = vector.load %arg5[%c0_28, %c0_29] : memref<128x1xf32, #tpu.memory_space<vmem>>, vector<128x1xf32>
    %160 = vector.broadcast %159 : vector<128x1xf32> to vector<128x128xf32>
    %161 = arith.addf %158, %160 : vector<128x128xf32>
    %162 = arith.truncf %161 : vector<128x128xf32> to vector<128x128xbf16>
    %163 = arith.mulf %162, %162 : vector<128x128xbf16>
    %164 = arith.mulf %162, %163 : vector<128x128xbf16>
    %cst_30 = arith.constant 4.467770e-02 : bf16
    %165 = vector.broadcast %cst_30 : bf16 to vector<128x128xbf16>
    %166 = arith.mulf %165, %164 : vector<128x128xbf16>
    %167 = arith.addf %162, %166 : vector<128x128xbf16>
    %cst_31 = arith.constant 7.968750e-01 : bf16
    %168 = vector.broadcast %cst_31 : bf16 to vector<128x128xbf16>
    %169 = arith.mulf %168, %167 : vector<128x128xbf16>
    %170 = math.tanh %169 : vector<128x128xbf16>
    %cst_32 = arith.constant 1.000000e+00 : bf16
    %171 = vector.broadcast %cst_32 : bf16 to vector<128x128xbf16>
    %172 = arith.addf %171, %170 : vector<128x128xbf16>
    %cst_33 = arith.constant 5.000000e-01 : bf16
    %173 = vector.broadcast %cst_33 : bf16 to vector<128x128xbf16>
    %174 = arith.mulf %173, %172 : vector<128x128xbf16>
    %175 = arith.mulf %162, %174 : vector<128x128xbf16>
    %c0_34 = arith.constant 0 : index
    %c0_35 = arith.constant 0 : index
    %176 = vector.load %arg6[%c0_34, %c0_35] : memref<32x128xbf16, #tpu.memory_space<vmem>>, vector<32x128xbf16>
    %cst_36 = arith.constant dense<0.000000e+00> : vector<32x128xf32>
    %177 = tpu.matmul %176, %175, %cst_36 {dimension_numbers = #tpu.dot_dimension_numbers<[1], [0], [0], [1], [0, 0, 1, 1], [], []>} : vector<32x128xbf16>, vector<128x128xbf16>, vector<32x128xf32> -> vector<32x128xf32>
    %178 = arith.addf %156, %177 : vector<32x128xf32>
    %179 = vector.extract_strided_slice %4 {offsets = [0, 10], sizes = [32, 1], strides = [1, 1]} : vector<32x37xf32> to vector<32x1xf32>
    %180 = vector.broadcast %179 : vector<32x1xf32> to vector<32x128xf32>
    %181 = arith.addf %178, %180 : vector<32x128xf32>
    %182 = arith.addf %113, %181 : vector<32x128xf32>
    %c0_37 = arith.constant 0 : index
    %c0_38 = arith.constant 0 : index
    %c0_39 = arith.constant 0 : index
    %183 = vector.load %arg7[%c0_37, %c0_38, %c0_39] : memref<1x32x128xf32, #tpu.memory_space<vmem>>, vector<1x32x128xf32>
    %184 = vector.shape_cast %183 : vector<1x32x128xf32> to vector<32x128xf32>
    %185 = vector.shape_cast %182 : vector<32x128xf32> to vector<1x32x128xf32>
    tpu.vector_store %arg7[%c0_37, %c0_38, %c0_39], %185 {strides = array<i32>} : memref<1x32x128xf32, #tpu.memory_space<vmem>>, vector<1x32x128xf32>,
    return
  }
  func.func @transform_0(%arg0: i32) -> (i32, i32, i32) {
    %c0_i32 = arith.constant 0 : i32
    %c0_i32_0 = arith.constant 0 : i32
    %c0_i32_1 = arith.constant 0 : i32
    return %arg0, %c0_i32, %c0_i32_0 : i32, i32, i32
  }
  func.func @transform_1(%arg0: i32) -> (i32, i32, i32) {
    %c0_i32 = arith.constant 0 : i32
    %c0_i32_0 = arith.constant 0 : i32
    %c0_i32_1 = arith.constant 0 : i32
    return %arg0, %c0_i32, %c0_i32_0 : i32, i32, i32
  }
  func.func @transform_2(%arg0: i32) -> (i32, i32) {
    %c0_i32 = arith.constant 0 : i32
    %c0_i32_0 = arith.constant 0 : i32
    %c0_i32_1 = arith.constant 0 : i32
    return %c0_i32, %c0_i32_0 : i32, i32
  }
  func.func @transform_3(%arg0: i32) -> (i32, i32) {
    %c0_i32 = arith.constant 0 : i32
    %c0_i32_0 = arith.constant 0 : i32
    %c0_i32_1 = arith.constant 0 : i32
    return %c0_i32, %c0_i32_0 : i32, i32
  }
  func.func @transform_4(%arg0: i32) -> (i32, i32) {
    %c0_i32 = arith.constant 0 : i32
    %c0_i32_0 = arith.constant 0 : i32
    %c0_i32_1 = arith.constant 0 : i32
    return %c0_i32, %c0_i32_0 : i32, i32
  }
  func.func @transform_5(%arg0: i32) -> (i32, i32) {
    %c0_i32 = arith.constant 0 : i32
    %c0_i32_0 = arith.constant 0 : i32
    %c0_i32_1 = arith.constant 0 : i32
    return %c0_i32, %c0_i32_0 : i32, i32
  }
  func.func @transform_6(%arg0: i32) -> (i32, i32, i32) {
    %c0_i32 = arith.constant 0 : i32
    %c0_i32_0 = arith.constant 0 : i32
    %c0_i32_1 = arith.constant 0 : i32
    return %arg0, %c0_i32, %c0_i32_0 : i32, i32, i32
  }
}

module attributes {stable_mosaic.version = 11 : i64} {
  func.func @kernel(%arg0: i32, %arg1: memref<1x32x128xf32, #tpu.memory_space<vmem>>, %arg2: memref<1x1x128xf32, #tpu.memory_space<vmem>>, %arg3: memref<32x37xf32, #tpu.memory_space<vmem>>, %arg4: memref<128x32xbf16, #tpu.memory_space<vmem>>, %arg5: memref<128x1xf32, #tpu.memory_space<vmem>>, %arg6: memref<32x128xbf16, #tpu.memory_space<vmem>>, %arg7: memref<1x32x128xf32, #tpu.memory_space<vmem>>) attributes {dimension_semantics = [#tpu.dimension_semantics<parallel>], iteration_bounds = array<i64: 2>, scalar_prefetch = 0 : i64, scratch_operands = 0 : i64, tpu.core_type = #tpu.core_type<tc>, window_params = [{transform_indices = @transform_0, window_bounds = array<i64: 1, 32, 128>}, {transform_indices = @transform_1, window_bounds = array<i64: 1, 1, 128>}, {pipeline_mode = #tpu.pipeline_mode<synchronous>, transform_indices = @transform_2, window_bounds = array<i64: 32, 37>}, {pipeline_mode = #tpu.pipeline_mode<synchronous>, transform_indices = @transform_3, window_bounds = array<i64: 128, 32>}, {pipeline_mode = #tpu.pipeline_mode<synchronous>, transform_indices = @transform_4, window_bounds = array<i64: 128, 1>}, {pipeline_mode = #tpu.pipeline_mode<synchronous>, transform_indices = @transform_5, window_bounds = array<i64: 32, 128>}, {transform_indices = @transform_6, window_bounds = array<i64: 1, 32, 128>}]} {
    %c0 = arith.constant 0 : index
    %c0_0 = arith.constant 0 : index
    %c0_1 = arith.constant 0 : index
    %0 = vector.load %arg1[%c0, %c0_0, %c0_1] : memref<1x32x128xf32, #tpu.memory_space<vmem>>, vector<1x32x128xf32>
    %1 = vector.shape_cast %0 : vector<1x32x128xf32> to vector<32x128xf32>
    %c0_2 = arith.constant 0 : index
    %c0_3 = arith.constant 0 : index
    %c0_4 = arith.constant 0 : index
    %2 = vector.load %arg2[%c0_2, %c0_3, %c0_4] : memref<1x1x128xf32, #tpu.memory_space<vmem>>, vector<1x1x128xf32>
    %3 = vector.shape_cast %2 : vector<1x1x128xf32> to vector<1x128xf32>
    %c0_5 = arith.constant 0 : index
    %c0_6 = arith.constant 0 : index
    %4 = vector.load %arg3[%c0_5, %c0_6] : memref<32x37xf32, #tpu.memory_space<vmem>>, vector<32x37xf32>
    %5 = tpu.iota {dimensions = array<i32: 1>} : vector<1x128xi32>
    %c16_i32 = arith.constant 16 : i32
    %6 = vector.broadcast %c16_i32 : i32 to vector<1x128xi32>
    %7 = arith.cmpi slt, %5, %6 : vector<1x128xi32>
    %8 = arith.extui %7 : vector<1x128xi1> to vector<1x128xi32>
    %9 = arith.sitofp %8 : vector<1x128xi32> to vector<1x128xf32>
    %cst = arith.constant dense<0.000000e+00> : vector<128xf32>
    %10 = vector.multi_reduction <add>, %1, %cst [0] : vector<32x128xf32> to vector<128xf32>
    %11 = vector.shape_cast %10 : vector<128xf32> to vector<1x128xf32>
    %cst_7 = arith.constant 3.200000e+01 : f32
    %12 = vector.broadcast %cst_7 : f32 to vector<1x128xf32>
    %13 = arith.divf %11, %12 : vector<1x128xf32>
    %14 = vector.broadcast %13 : vector<1x128xf32> to vector<32x128xf32>
    %15 = arith.subf %1, %14 : vector<32x128xf32>
    %16 = arith.mulf %15, %15 : vector<32x128xf32>
    %cst_8 = arith.constant dense<0.000000e+00> : vector<128xf32>
    %17 = vector.multi_reduction <add>, %16, %cst_8 [0] : vector<32x128xf32> to vector<128xf32>
    %18 = vector.shape_cast %17 : vector<128xf32> to vector<1x128xf32>
    %cst_9 = arith.constant 3.200000e+01 : f32
    %19 = vector.broadcast %cst_9 : f32 to vector<1x128xf32>
    %20 = arith.divf %18, %19 : vector<1x128xf32>
    %21 = vector.broadcast %13 : vector<1x128xf32> to vector<32x128xf32>
    %22 = arith.subf %1, %21 : vector<32x128xf32>
    %cst_10 = arith.constant 9.99999997E-7 : f32
    %23 = vector.broadcast %cst_10 : f32 to vector<1x128xf32>
    %24 = arith.addf %20, %23 : vector<1x128xf32>
    %25 = math.rsqrt %24 : vector<1x128xf32>
    %26 = vector.broadcast %25 : vector<1x128xf32> to vector<32x128xf32>
    %27 = arith.mulf %22, %26 : vector<32x128xf32>
    %28 = vector.extract_strided_slice %4 {offsets = [0, 0], sizes = [32, 1], strides = [1, 1]} : vector<32x37xf32> to vector<32x1xf32>
    %29 = vector.broadcast %28 : vector<32x1xf32> to vector<32x128xf32>
    %30 = arith.mulf %27, %29 : vector<32x128xf32>
    %31 = vector.extract_strided_slice %4 {offsets = [0, 1], sizes = [32, 1], strides = [1, 1]} : vector<32x37xf32> to vector<32x1xf32>
    %32 = vector.broadcast %31 : vector<32x1xf32> to vector<32x128xf32>
    %33 = arith.addf %30, %32 : vector<32x128xf32>
    %34 = vector.broadcast %9 : vector<1x128xf32> to vector<32x128xf32>
    %35 = arith.mulf %33, %34 : vector<32x128xf32>
    %36 = vector.extract_strided_slice %4 {offsets = [0, 17], sizes = [32, 1], strides = [1, 1]} : vector<32x37xf32> to vector<32x1xf32>
    %37 = vector.broadcast %36 : vector<32x1xf32> to vector<32x128xf32>
    %38 = arith.mulf %35, %37 : vector<32x128xf32>
    %39 = vector.extract_strided_slice %4 {offsets = [0, 12], sizes = [32, 1], strides = [1, 1]} : vector<32x37xf32> to vector<32x1xf32>
    %40 = vector.broadcast %39 : vector<32x1xf32> to vector<32x128xf32>
    %41 = arith.mulf %35, %40 : vector<32x128xf32>
    %c3_i32 = arith.constant 3 : i32
    %42 = tpu.dynamic_rotate %35 by %c3_i32 dim 1 : vector<32x128xf32>, i32 -> vector<32x128xf32>
    %43 = vector.extract_strided_slice %4 {offsets = [0, 14], sizes = [32, 1], strides = [1, 1]} : vector<32x37xf32> to vector<32x1xf32>
    %44 = vector.broadcast %43 : vector<32x1xf32> to vector<32x128xf32>
    %45 = arith.mulf %42, %44 : vector<32x128xf32>
    %46 = arith.addf %38, %45 : vector<32x128xf32>
    %c2_i32 = arith.constant 2 : i32
    %47 = tpu.dynamic_rotate %35 by %c2_i32 dim 1 : vector<32x128xf32>, i32 -> vector<32x128xf32>
    %48 = vector.extract_strided_slice %4 {offsets = [0, 15], sizes = [32, 1], strides = [1, 1]} : vector<32x37xf32> to vector<32x1xf32>
    %49 = vector.broadcast %48 : vector<32x1xf32> to vector<32x128xf32>
    %50 = arith.mulf %47, %49 : vector<32x128xf32>
    %51 = arith.addf %46, %50 : vector<32x128xf32>
    %c1_i32 = arith.constant 1 : i32
    %52 = tpu.dynamic_rotate %35 by %c1_i32 dim 1 : vector<32x128xf32>, i32 -> vector<32x128xf32>
    %53 = vector.extract_strided_slice %4 {offsets = [0, 16], sizes = [32, 1], strides = [1, 1]} : vector<32x37xf32> to vector<32x1xf32>
    %54 = vector.broadcast %53 : vector<32x1xf32> to vector<32x128xf32>
    %55 = arith.mulf %52, %54 : vector<32x128xf32>
    %56 = arith.addf %51, %55 : vector<32x128xf32>
    %57 = vector.extract_strided_slice %4 {offsets = [0, 11], sizes = [32, 1], strides = [1, 1]} : vector<32x37xf32> to vector<32x1xf32>
    %58 = vector.broadcast %57 : vector<32x1xf32> to vector<32x128xf32>
    %59 = arith.mulf %52, %58 : vector<32x128xf32>
    %60 = arith.addf %41, %59 : vector<32x128xf32>
    %c127_i32 = arith.constant 127 : i32
    %61 = tpu.dynamic_rotate %35 by %c127_i32 dim 1 : vector<32x128xf32>, i32 -> vector<32x128xf32>
    %62 = vector.extract_strided_slice %4 {offsets = [0, 18], sizes = [32, 1], strides = [1, 1]} : vector<32x37xf32> to vector<32x1xf32>
    %63 = vector.broadcast %62 : vector<32x1xf32> to vector<32x128xf32>
    %64 = arith.mulf %61, %63 : vector<32x128xf32>
    %65 = arith.addf %56, %64 : vector<32x128xf32>
    %66 = vector.extract_strided_slice %4 {offsets = [0, 13], sizes = [32, 1], strides = [1, 1]} : vector<32x37xf32> to vector<32x1xf32>
    %67 = vector.broadcast %66 : vector<32x1xf32> to vector<32x128xf32>
    %68 = arith.mulf %61, %67 : vector<32x128xf32>
    %69 = arith.addf %60, %68 : vector<32x128xf32>
    %c126_i32 = arith.constant 126 : i32
    %70 = tpu.dynamic_rotate %35 by %c126_i32 dim 1 : vector<32x128xf32>, i32 -> vector<32x128xf32>
    %71 = vector.extract_strided_slice %4 {offsets = [0, 19], sizes = [32, 1], strides = [1, 1]} : vector<32x37xf32> to vector<32x1xf32>
    %72 = vector.broadcast %71 : vector<32x1xf32> to vector<32x128xf32>
    %73 = arith.mulf %70, %72 : vector<32x128xf32>
    %74 = arith.addf %65, %73 : vector<32x128xf32>
    %c125_i32 = arith.constant 125 : i32
    %75 = tpu.dynamic_rotate %35 by %c125_i32 dim 1 : vector<32x128xf32>, i32 -> vector<32x128xf32>
    %76 = vector.extract_strided_slice %4 {offsets = [0, 20], sizes = [32, 1], strides = [1, 1]} : vector<32x37xf32> to vector<32x1xf32>
    %77 = vector.broadcast %76 : vector<32x1xf32> to vector<32x128xf32>
    %78 = arith.mulf %75, %77 : vector<32x128xf32>
    %79 = arith.addf %74, %78 : vector<32x128xf32>
    %80 = vector.extract_strided_slice %4 {offsets = [0, 9], sizes = [32, 1], strides = [1, 1]} : vector<32x37xf32> to vector<32x1xf32>
    %81 = vector.broadcast %80 : vector<32x1xf32> to vector<32x128xf32>
    %82 = arith.addf %79, %81 : vector<32x128xf32>
    %83 = vector.extract_strided_slice %4 {offsets = [0, 8], sizes = [32, 1], strides = [1, 1]} : vector<32x37xf32> to vector<32x1xf32>
    %84 = vector.broadcast %83 : vector<32x1xf32> to vector<32x128xf32>
    %85 = arith.addf %69, %84 : vector<32x128xf32>
    %86 = vector.extract_strided_slice %4 {offsets = [0, 2], sizes = [32, 1], strides = [1, 1]} : vector<32x37xf32> to vector<32x1xf32>
    %87 = vector.broadcast %86 : vector<32x1xf32> to vector<32x128xf32>
    %88 = arith.mulf %35, %87 : vector<32x128xf32>
    %89 = vector.extract_strided_slice %4 {offsets = [0, 3], sizes = [32, 1], strides = [1, 1]} : vector<32x37xf32> to vector<32x1xf32>
    %90 = vector.broadcast %89 : vector<32x1xf32> to vector<32x128xf32>
    %91 = arith.addf %88, %90 : vector<32x128xf32>
    %cst_11 = arith.constant dense<0.000000e+00> : vector<32xf32>
    %92 = vector.multi_reduction <add>, %35, %cst_11 [1] : vector<32x128xf32> to vector<32xf32>
    %93 = vector.shape_cast %92 : vector<32xf32> to vector<32x1xf32>
    %cst_12 = arith.constant 6.250000e-02 : f32
    %94 = vector.broadcast %cst_12 : f32 to vector<32x1xf32>
    %95 = arith.mulf %93, %94 : vector<32x1xf32>
    %96 = vector.extract_strided_slice %4 {offsets = [0, 4], sizes = [32, 1], strides = [1, 1]} : vector<32x37xf32> to vector<32x1xf32>
    %97 = arith.mulf %95, %96 : vector<32x1xf32>
    %98 = vector.extract_strided_slice %4 {offsets = [0, 5], sizes = [32, 1], strides = [1, 1]} : vector<32x37xf32> to vector<32x1xf32>
    %99 = arith.addf %97, %98 : vector<32x1xf32>
    %cst_13 = arith.constant 0.000000e+00 : f32
    %100 = vector.broadcast %cst_13 : f32 to vector<32x1xf32>
    %101 = arith.maximumf %99, %100 : vector<32x1xf32>
    %102 = vector.broadcast %101 : vector<32x1xf32> to vector<32x128xf32>
    %103 = arith.mulf %91, %102 : vector<32x128xf32>
    %cst_14 = arith.constant 0.000000e+00 : f32
    %104 = vector.broadcast %cst_14 : f32 to vector<32x128xf32>
    %105 = arith.maximumf %82, %104 : vector<32x128xf32>
    %106 = arith.mulf %105, %85 : vector<32x128xf32>
    %107 = arith.addf %103, %106 : vector<32x128xf32>
    %108 = arith.addf %107, %35 : vector<32x128xf32>
    %109 = vector.broadcast %3 : vector<1x128xf32> to vector<32x128xf32>
    %110 = arith.mulf %1, %109 : vector<32x128xf32>
    %111 = arith.addf %110, %108 : vector<32x128xf32>
    %112 = vector.broadcast %9 : vector<1x128xf32> to vector<32x128xf32>
    %113 = arith.mulf %111, %112 : vector<32x128xf32>
    %114 = vector.extract_strided_slice %4 {offsets = [0, 21], sizes = [32, 16], strides = [1, 1]} : vector<32x37xf32> to vector<32x16xf32>
    %cst_15 = arith.constant dense<0.000000e+00> : vector<32xf32>
    %115 = vector.multi_reduction <add>, %113, %cst_15 [1] : vector<32x128xf32> to vector<32xf32>
    %116 = vector.shape_cast %115 : vector<32xf32> to vector<32x1xf32>
    %117 = vector.broadcast %116 : vector<32x1xf32> to vector<32x16xf32>
    %118 = arith.mulf %114, %117 : vector<32x16xf32>
    %cst_16 = arith.constant dense<0.000000e+00> : vector<16xf32>
    %119 = vector.multi_reduction <add>, %118, %cst_16 [0] : vector<32x16xf32> to vector<16xf32>
    %120 = vector.shape_cast %119 : vector<16xf32> to vector<1x16xf32>
    %121 = vector.broadcast %120 : vector<1x16xf32> to vector<32x16xf32>
    %122 = arith.mulf %114, %121 : vector<32x16xf32>
    %cst_17 = arith.constant dense<0.000000e+00> : vector<32xf32>
    %123 = vector.multi_reduction <add>, %122, %cst_17 [1] : vector<32x16xf32> to vector<32xf32>
    %124 = vector.shape_cast %123 : vector<32xf32> to vector<32x1xf32>
    %cst_18 = arith.constant 3.125000e-02 : f32
    %125 = vector.broadcast %cst_18 : f32 to vector<32x1xf32>
    %126 = arith.mulf %124, %125 : vector<32x1xf32>
    %127 = vector.broadcast %126 : vector<32x1xf32> to vector<32x128xf32>
    %128 = arith.subf %113, %127 : vector<32x128xf32>
    %129 = vector.broadcast %9 : vector<1x128xf32> to vector<32x128xf32>
    %130 = arith.mulf %128, %129 : vector<32x128xf32>
    %131 = arith.mulf %130, %130 : vector<32x128xf32>
    %cst_19 = arith.constant dense<0.000000e+00> : vector<32xf32>
    %132 = vector.multi_reduction <add>, %131, %cst_19 [1] : vector<32x128xf32> to vector<32xf32>
    %133 = vector.shape_cast %132 : vector<32xf32> to vector<32x1xf32>
    %134 = vector.broadcast %133 : vector<32x1xf32> to vector<32x16xf32>
    %135 = arith.mulf %114, %134 : vector<32x16xf32>
    %cst_20 = arith.constant dense<0.000000e+00> : vector<16xf32>
    %136 = vector.multi_reduction <add>, %135, %cst_20 [0] : vector<32x16xf32> to vector<16xf32>
    %137 = vector.shape_cast %136 : vector<16xf32> to vector<1x16xf32>
    %138 = vector.broadcast %137 : vector<1x16xf32> to vector<32x16xf32>
    %139 = arith.mulf %114, %138 : vector<32x16xf32>
    %cst_21 = arith.constant dense<0.000000e+00> : vector<32xf32>
    %140 = vector.multi_reduction <add>, %139, %cst_21 [1] : vector<32x16xf32> to vector<32xf32>
    %141 = vector.shape_cast %140 : vector<32xf32> to vector<32x1xf32>
    %cst_22 = arith.constant 3.125000e-02 : f32
    %142 = vector.broadcast %cst_22 : f32 to vector<32x1xf32>
    %143 = arith.mulf %141, %142 : vector<32x1xf32>
    %cst_23 = arith.constant 9.99999997E-7 : f32
    %144 = vector.broadcast %cst_23 : f32 to vector<32x1xf32>
    %145 = arith.addf %143, %144 : vector<32x1xf32>
    %146 = math.rsqrt %145 : vector<32x1xf32>
    %147 = vector.broadcast %146 : vector<32x1xf32> to vector<32x128xf32>
    %148 = arith.mulf %130, %147 : vector<32x128xf32>
    %149 = vector.extract_strided_slice %4 {offsets = [0, 6], sizes = [32, 1], strides = [1, 1]} : vector<32x37xf32> to vector<32x1xf32>
    %150 = vector.broadcast %149 : vector<32x1xf32> to vector<32x128xf32>
    %151 = arith.mulf %148, %150 : vector<32x128xf32>
    %152 = vector.extract_strided_slice %4 {offsets = [0, 7], sizes = [32, 1], strides = [1, 1]} : vector<32x37xf32> to vector<32x1xf32>
    %153 = vector.broadcast %152 : vector<32x1xf32> to vector<32x128xf32>
    %154 = arith.addf %151, %153 : vector<32x128xf32>
    %155 = arith.truncf %154 : vector<32x128xf32> to vector<32x128xbf16>
    %cst_24 = arith.constant 0.000000e+00 : f32
    %156 = vector.broadcast %cst_24 : f32 to vector<32x128xf32>
    %c0_25 = arith.constant 0 : index
    %c0_26 = arith.constant 0 : index
    %157 = vector.load %arg4[%c0_25, %c0_26] : memref<128x32xbf16, #tpu.memory_space<vmem>>, vector<128x32xbf16>
    %cst_27 = arith.constant dense<0.000000e+00> : vector<128x128xf32>
    %158 = tpu.matmul %157, %155, %cst_27 {dimension_numbers = #tpu.dot_dimension_numbers<[1], [0], [0], [1], [0, 0, 1, 1], [], []>} : vector<128x32xbf16>, vector<32x128xbf16>, vector<128x128xf32> -> vector<128x128xf32>
    %c0_28 = arith.constant 0 : index
    %c0_29 = arith.constant 0 : index
    %159 = vector.load %arg5[%c0_28, %c0_29] : memref<128x1xf32, #tpu.memory_space<vmem>>, vector<128x1xf32>
    %160 = vector.broadcast %159 : vector<128x1xf32> to vector<128x128xf32>
    %161 = arith.addf %158, %160 : vector<128x128xf32>
    %162 = arith.truncf %161 : vector<128x128xf32> to vector<128x128xbf16>
    %163 = arith.mulf %162, %162 : vector<128x128xbf16>
    %164 = arith.mulf %162, %163 : vector<128x128xbf16>
    %cst_30 = arith.constant 4.467770e-02 : bf16
    %165 = vector.broadcast %cst_30 : bf16 to vector<128x128xbf16>
    %166 = arith.mulf %165, %164 : vector<128x128xbf16>
    %167 = arith.addf %162, %166 : vector<128x128xbf16>
    %cst_31 = arith.constant 7.968750e-01 : bf16
    %168 = vector.broadcast %cst_31 : bf16 to vector<128x128xbf16>
    %169 = arith.mulf %168, %167 : vector<128x128xbf16>
    %170 = math.tanh %169 : vector<128x128xbf16>
    %cst_32 = arith.constant 1.000000e+00 : bf16
    %171 = vector.broadcast %cst_32 : bf16 to vector<128x128xbf16>
    %172 = arith.addf %171, %170 : vector<128x128xbf16>
    %cst_33 = arith.constant 5.000000e-01 : bf16
    %173 = vector.broadcast %cst_33 : bf16 to vector<128x128xbf16>
    %174 = arith.mulf %173, %172 : vector<128x128xbf16>
    %175 = arith.mulf %162, %174 : vector<128x128xbf16>
    %c0_34 = arith.constant 0 : index
    %c0_35 = arith.constant 0 : index
    %176 = vector.load %arg6[%c0_34, %c0_35] : memref<32x128xbf16, #tpu.memory_space<vmem>>, vector<32x128xbf16>
    %cst_36 = arith.constant dense<0.000000e+00> : vector<32x128xf32>
    %177 = tpu.matmul %176, %175, %cst_36 {dimension_numbers = #tpu.dot_dimension_numbers<[1], [0], [0], [1], [0, 0, 1, 1], [], []>} : vector<32x128xbf16>, vector<128x128xbf16>, vector<32x128xf32> -> vector<32x128xf32>
    %178 = arith.addf %156, %177 : vector<32x128xf32>
    %179 = vector.extract_strided_slice %4 {offsets = [0, 10], sizes = [32, 1], strides = [1, 1]} : vector<32x37xf32> to vector<32x1xf32>
    %180 = vector.broadcast %179 : vector<32x1xf32> to vector<32x128xf32>
    %181 = arith.addf %178, %180 : vector<32x128xf32>
    %182 = arith.addf %113, %181 : vector<32x128xf32>
    %c0_37 = arith.constant 0 : index
    %c0_38 = arith.constant 0 : index
    %c0_39 = arith.constant 0 : index
    %183 = vector.load %arg7[%c0_37, %c0_38, %c0_39] : memref<1x32x128xf32, #tpu.memory_space<vmem>>, vector<1x32x128xf32>
    %184 = vector.shape_cast %183 : vector<1x32x128xf32> to vector<32x128xf32>
    %185 = vector.shape_cast %182 : vector<32x128xf32> to vector<1x32x128xf32>
    tpu.vector_store %arg7[%c0_37, %c0_38, %c0_39], %185 {strides = array<i32>} : memref<1x32x128xf32, #tpu.memory_space<vmem>>, vector<1x32x128xf32>,
    return
  }
  func.func @transform_0(%arg0: i32) -> (i32, i32, i32) {
    %c0_i32 = arith.constant 0 : i32
    %c0_i32_0 = arith.constant 0 : i32
    %c0_i32_1 = arith.constant 0 : i32
    return %arg0, %c0_i32, %c0_i32_0 : i32, i32, i32
  }
  func.func @transform_1(%arg0: i32) -> (i32, i32, i32) {
    %c0_i32 = arith.constant 0 : i32
    %c0_i32_0 = arith.constant 0 : i32
    %c0_i32_1 = arith.constant 0 : i32
    return %arg0, %c0_i32, %c0_i32_0 : i32, i32, i32
  }
  func.func @transform_2(%arg0: i32) -> (i32, i32) {
    %c0_i32 = arith.constant 0 : i32
    %c0_i32_0 = arith.constant 0 : i32
    %c0_i32_1 = arith.constant 0 : i32
    return %c0_i32, %c0_i32_0 : i32, i32
  }
  func.func @transform_3(%arg0: i32) -> (i32, i32) {
    %c0_i32 = arith.constant 0 : i32
    %c0_i32_0 = arith.constant 0 : i32
    %c0_i32_1 = arith.constant 0 : i32
    return %c0_i32, %c0_i32_0 : i32, i32
  }
  func.func @transform_4(%arg0: i32) -> (i32, i32) {
    %c0_i32 = arith.constant 0 : i32
    %c0_i32_0 = arith.constant 0 : i32
    %c0_i32_1 = arith.constant 0 : i32
    return %c0_i32, %c0_i32_0 : i32, i32
  }
  func.func @transform_5(%arg0: i32) -> (i32, i32) {
    %c0_i32 = arith.constant 0 : i32
    %c0_i32_0 = arith.constant 0 : i32
    %c0_i32_1 = arith.constant 0 : i32
    return %c0_i32, %c0_i32_0 : i32, i32
  }
  func.func @transform_6(%arg0: i32) -> (i32, i32, i32) {
    %c0_i32 = arith.constant 0 : i32
    %c0_i32_0 = arith.constant 0 : i32
    %c0_i32_1 = arith.constant 0 : i32
    return %arg0, %c0_i32, %c0_i32_0 : i32, i32, i32
  }
}

</mosaic_0001>

<bundles_post_ra>
// kernel: tpu_custom_call.1
= control target key start
LH: loop header
LB: loop body
LE: loop exit
PB: predicated region body
PF: predicated region fallthrough
CT: control target
= control target key end

     0   :  { %11 = vsyncpa [#allocation3], 0  ;;  %s2690_s0 = inlined_call_operand.vmem [shape: f32[2,32,128], index: 0, kind: input, shape index: {}]   ;;  %s2691_s1 = inlined_call_operand.vmem [shape: f32[2,1,128], index: 1, kind: input, shape index: {}]   ;;  %s2692_s2 = inlined_call_operand.vmem [shape: f32[32,37], index: 2, kind: input, shape index: {}]   ;;  %s2693_s3 = inlined_call_operand.vmem [shape: bf16[128,32], index: 3, kind: input, shape index: {}]   ;;  %s2694_s4 = inlined_call_operand.vmem [shape: f32[128,1], index: 4, kind: input, shape index: {}]   ;;  %s2695_s5 = inlined_call_operand.vmem [shape: bf16[32,128], index: 5, kind: input, shape index: {}]   ;;  %s2696_s6 = inlined_call_operand.hbm [shape: f32[2,32,128], index: 6, kind: output, shape index: {}]  }
   0x1   :  { %13 = vsyncpa [#allocation3 + $0x1], 0  ;;  %s1929_s21 = smov 0   ;;  %s1931_s22 = smov 0  }
   0x2   :  { %s1933_s23 = smov 0   ;;  %s1935_s24 = smov 0  }
   0x3 LB: > { %s1950_s25 = sadd.s32 4294967295, %s1861_s24   ;;  %s1538_s26 = sadd.s32 4294967294, %s1861_s24   ;;  %s1861_s24 = sphi %s1935_s24, %s2763_s24   ;;  %s1857_s23 = sphi %s1933_s23, %s2762_s23   ;;  %s1853_s22 = sphi %s1931_s22, %s2761_s22   ;;  %s1849_s21 = sphi %s1929_s21, %s2760_s21  }
   0x4   : > { %s1954_s27 = sadd.s32 1, %s1861_s24   ;;  %s162_s28 = sadd.s32 1, %s1857_s23 }
   0x5   : > { %s159_s29 = ssub.s32 %s1861_s24, %s1954_s27  ;;  %p172_p0 = scmp.ne.s32.totalorder %s1857_s23, %s1853_s22 }
   0x6   : > { %p160_p1 = scmp.eq.s32.totalorder %s159_s29, 0  ;;  %p173_p2 = scmp.eq.s32.totalorder %s1950_s25, 1 }
   0x7   : > { %p178_p3 = scmp.ne.s32.totalorder %s1853_s22, %s1849_s21  ;;  %p179_p4 = scmp.eq.s32.totalorder %s1538_s26, 1 }
   0x8   : > { %s1965_s30 = scalar_select %p160_p1, %s1857_s23, %s162_s28  }
   0x9   : > { %p1967_p5 = por %p173_p2, %p172_p0  ;;  %p1971_p6 = por %p179_p4, %p178_p3 }
   0xa   : > { %p1541_p7 = scmp.ge.s32.totalorder %s1861_s24, 1  ;;  %p223_p8 = scmp.lt.s32.totalorder %s1861_s24, 3 }
   0xc   : > { %p224_p9 = pnand %p1541_p7, %p223_p8 }
   0xe   : > { %227 = sbr.rel (%p224_p9) target bundleno = 1890 (0x762), region = 44 }
  0x15   : > { %v1980_v0 = vld [vmem:[%s2692_s2 + $0x10] sm:$0xff]  ;;  %v1985_v1 = vld [vmem:[%s2692_s2] sm:$0xff]  ;;  %v2697_v2 = vmov 0   ;;  %v1994_v3 = vld [vmem:[%s2692_s2 + $0x8] sm:$0xff]  ;;  %v1864_v4 = vmov 1   ;;  %p256_p10 = scmp.lt.s32.totalorder %s1950_s25, 1  ;;  %v278_v46 = vlaneseq }
  0x16   : > { %2715 = vst [vmem:[#allocation5_spill] sm:$0xff] %v1980_v0  ;;  %2716 = vst [vmem:[#allocation6_spill] sm:$0xff] %v1985_v1  ;;  %1702 = vset.pattern.permute.xlu1 %v2697_v2  ;;  %1701 = vset.pattern.permute.xlu0 %v2697_v2  ;;  %v2002_v5 = vld [vmem:[%s2692_s2 + $0x18] sm:$0xff]  ;;  %s1865_s28 = smov 127   ;;  %v1866_v6 = vmov 17   ;;  %v1867_v14 = vmov 14  }
  0x17   : > { %330 = vperm.xlu1 %1702, %v1980_v0   ;;  %320 = vperm.xlu0 %1701, %v1985_v1   ;;  %2717 = vst [vmem:[#allocation7_spill] sm:$0xff] %v1994_v3  ;;  %2718 = vst [vmem:[#allocation8_spill] sm:$0xff] %v2002_v5  ;;  %s2007_s17 = scalar_select %p256_p10, %s1950_s25, 1  ;;  %v1868_v15 = vmov 15   ;;  %v1869_v19 = vmov 16   ;;  %v1870_v21 = vmov 19  }
  0x18   : > { %v1871_v23 = vmov 18   ;;  %v1872_v39 = vmov 12   ;;  %v279_v48 = vand.u32 127, %v278_v46  ;;  %v1873_v55 = vmov 0.0   ;;  %s1874_s29 = smov 3   ;;  %s1875_s9 = smov 2  }
  0x19   : > { %s1570_s18 = sshll.u32 %s2007_s17, 5  ;;  %s1877_s10 = smov 1   ;;  %vm832_vm1 = vcmask 302248   ;;  %vm866_vm2 = vcmask 130048   ;;  %vm1162_vm3 = vcmask 261120  }
  0x1a   : > { %s260_s26 = scalar_lea.vmem %s2690_s0, %s1570_s18  ;;  %vm280_vm0 = vcmp.lt.s32.totalorder %v279_v48, 16  ;;  %s1881_s11 = smov 126  }
  0x1b   : > { %1703 = vset.pattern.permute.xlu1 %v1864_v4  ;;  %325 = vperm.xlu0 %1701, %v1994_v3   ;;  %v2020_v7 = vld [vmem:[%s260_s26] sm:$0xff]  ;;  %v2022_v8 = vld [vmem:[%s260_s26 + $0x8] sm:$0xff]  ;;  %v2030_v10 = vld [vmem:[%s260_s26 + $0x10] sm:$0xff]  ;;  %v2063_v56 = vsel %vm280_vm0, 1.0, %v1873_v55  ;;  %s1883_s12 = smov 125   ;;  %s263_s15 = scalar_lea.vmem %s2691_s1, %s2007_s17 }
  0x1c   : > { %343 = vperm.xlu1 %1703, %v1985_v1   ;;  %2719 = vst [vmem:[#allocation9_spill] sm:$0xff] %v2020_v7  ;;  %2720 = vst [vmem:[#allocation10_spill] sm:$0xff] %v2022_v8  ;;  %v283_v9 = vadd.f32 %v2022_v8, %v2020_v7  ;;  %v2035_v12 = vld [vmem:[%s260_s26 + $0x18] sm:$0xff]  ;;  %s1887_s18 = smov 107   ;;  %s253_s17 = sand.u32 1, %s1853_s22  }
  0x1d   : > { %2721 = vst [vmem:[#allocation11_spill] sm:$0xff] %v2030_v10  ;;  %2722 = vst [vmem:[#allocation12_spill] sm:$0xff] %v2035_v12  ;;  %s1571_s26 = sshll.u32 %s1950_s25, 9  ;;  %s2649_s25 = scalar_lea.sflag [#allocation3], %s253_s17 }
  0x1e   : > { %v284_v11 = vadd.f32 %v283_v9, %v2030_v10  ;;  %2723 = vst [vmem:[#allocation13_spill] sm:$0xff] %v2063_v56 }
  0x1f   : > { %1704 = vset.pattern.permute.xlu0 %v1864_v4 }
  0x20   : > { %1705 = vset.pattern.permute.xlu1 %v2697_v2  ;;  %347 = vperm.xlu0 %1704, %v1994_v3   ;;  %v285_v13 = vadd.f32 %v284_v11, %v2035_v12 }
  0x21   : > { %335 = vperm.xlu1 %1705, %v2002_v5  }
  0x22   : > { %v286_v16 = vrot.slane %v285_v13, 4 }
  0x24   : > { %355 = vperm.xlu0 %1704, %v2002_v5   ;;  %v287_v17 = vadd.f32 %v286_v16, %v285_v13 }
  0x25   : > { %1706 = vset.pattern.permute.xlu1 %v1864_v4 }
  0x26   : > { %351 = vperm.xlu1 %1706, %v1980_v0   ;;  %v288_v18 = vrot.slane %v287_v17, 2 }
  0x28   : > { %742 = vrot.lane.b32.xlu0 %v1985_v1, %s1865_s28  ;;  %v289_v20 = vadd.f32 %v288_v18, %v287_v17 }
  0x29   : > { %1708 = vset.pattern.permute.xlu0 %v1866_v6 }
  0x2a   : > { %744 = vrot.lane.b32.xlu1 %v1994_v3, %s1865_s28  ;;  %v290_v22 = vrot.slane %v289_v20, 1 }
  0x2b   : > { %1707 = vset.pattern.permute.xlu1 %v1866_v6 }
  0x2c   : > { %748 = vrot.lane.b32.xlu0 %v2002_v5, %s1865_s28  ;;  %v291_v24 = vadd.f32 %v290_v22, %v289_v20  ;;  %v1876_v20 = vmov 11   ;;  %v1878_v22 = vmov 13  }
  0x2e   : > { %746 = vrot.lane.b32.xlu1 %v1980_v0, %s1865_s28  ;;  %v293_v25 = vmul.f32 0.03125, %v291_v24 }
  0x30   : > { %371 = vperm.xlu0 %1708, %v1994_v3   ;;  %v294_v26 = vsub.f32 %v2020_v7, %v293_v25  ;;  %v295_v27 = vsub.f32 %v2022_v8, %v293_v25  ;;  %v296_v28 = vsub.f32 %v2030_v10, %v293_v25  ;;  %v297_v31 = vsub.f32 %v2035_v12, %v293_v25 }
  0x32   : > { %367 = vperm.xlu1 %1707, %v1985_v1   ;;  %v298_v29 = vmul.f32 %v294_v26, %v294_v26  ;;  %v299_v30 = vmul.f32 %v295_v27, %v295_v27  ;;  %v300_v32 = vmul.f32 %v296_v28, %v296_v28  ;;  %v301_v34 = vmul.f32 %v297_v31, %v297_v31 }
  0x34   : > { %375 = vperm.xlu0 %1708, %v1980_v0   ;;  %v302_v33 = vadd.f32 %v299_v30, %v298_v29  ;;  %v1880_v29 = vmov 2  }
  0x36   : > { %1709 = vset.pattern.permute.xlu1 %v1867_v14  ;;  %v303_v35 = vadd.f32 %v302_v33, %v300_v32  ;;  %v1882_v33 = vmov 9  }
  0x37   : > { %415 = vperm.xlu1 %1709, %v1985_v1  }
  0x38   : > { %1710 = vset.pattern.permute.xlu0 %v1868_v15  ;;  %v304_v36 = vadd.f32 %v303_v35, %v301_v34 }
  0x39   : > { %447 = vperm.xlu0 %1710, %v1985_v1  }
  0x3a   : > { %v305_v37 = vrot.slane %v304_v36, 4 }
  0x3b   : > { %419 = vperm.xlu1 %1709, %v1994_v3  }
  0x3c   : > { %v306_v38 = vadd.f32 %v305_v37, %v304_v36 }
  0x3d   : > { %1713 = vset.pattern.permute.xlu0 %v1867_v14 }
  0x3e   : > { %427 = vperm.xlu0 %1713, %v2002_v5   ;;  %v307_v40 = vrot.slane %v306_v38, 2 }
  0x3f   : > { %423 = vperm.xlu1 %1709, %v1980_v0  }
  0x40   : > { %v308_v41 = vadd.f32 %v307_v40, %v306_v38  ;;  %v1884_v40 = vmov 3  }
  0x42   : > { %1716 = vset.pattern.permute.xlu0 %v1869_v19  ;;  %v309_v42 = vrot.slane %v308_v41, 1 }
  0x43   : > { %1711 = vset.pattern.permute.xlu1 %v1868_v15  ;;  %483 = vperm.xlu0 %1716, %v1994_v3  }
  0x44   : > { %451 = vperm.xlu1 %1711, %v1994_v3   ;;  %v310_v43 = vadd.f32 %v309_v42, %v308_v41 }
  0x46   : > { %v311_v44 = vmul.f32 0.03125, %v310_v43  ;;  %v1885_v43 = vmov 8  }
  0x47   : > { %1722 = vset.pattern.permute.xlu0 %v1870_v21 }
  0x48   : > { %1712 = vset.pattern.permute.xlu1 %v1866_v6  ;;  %595 = vperm.xlu0 %1722, %v1994_v3   ;;  %v312_v45 = vadd.f32 1e-06, %v311_v44 }
  0x49   : > { %379 = vperm.xlu1 %1712, %v2002_v5  }
  0x4a   : > { %1769 = vrsqrt.f32 %v312_v45 }
  0x4c   : > { %1723 = vset.pattern.permute.xlu0 %v1871_v23 }
  0x4d   : > { %1714 = vset.pattern.permute.xlu1 %v1868_v15  ;;  %535 = vperm.xlu0 %1723, %v1985_v1  }
  0x4e   : > { %455 = vperm.xlu1 %1714, %v1980_v0  }
  0x52   : > { %1715 = vset.pattern.permute.xlu1 %v1869_v19 }
  0x53   : > { %479 = vperm.xlu1 %1715, %v1985_v1  }
  0x54   : > { %v1770_v47 = vpop.eup %1769 }
  0x55   : > { %v314_v50 = vmul.f32 %v1770_v47, %v294_v26  ;;  %v315_v54 = vmul.f32 %v1770_v47, %v295_v27  ;;  %v317_v59 = vmul.f32 %v1770_v47, %v297_v31  ;;  %v316_v63 = vmul.f32 %v1770_v47, %v296_v28 }
  0x57   : > { %1717 = vset.pattern.permute.xlu1 %v1868_v15 }
  0x58   : > { %459 = vperm.xlu1 %1717, %v2002_v5  }
  0x5c   : > { %1718 = vset.pattern.permute.xlu1 %v1869_v19 }
  0x5d   : > { %487 = vperm.xlu1 %1718, %v1980_v0  }
  0x61   : > { %1719 = vset.pattern.permute.xlu1 %v1871_v23  ;;  %v1879_v23 = vmov 20  }
  0x62   : > { %539 = vperm.xlu1 %1719, %v1994_v3  }
  0x66   : > { %1720 = vset.pattern.permute.xlu1 %v1869_v19 }
  0x67   : > { %491 = vperm.xlu1 %1720, %v2002_v5  }
  0x6b   : > { %1721 = vset.pattern.permute.xlu1 %v1870_v21 }
  0x6c   : > { %591 = vperm.xlu1 %1721, %v1985_v1  }
  0x70   : > { %1724 = vset.pattern.permute.xlu1 %v1872_v39 }
  0x96   : > { %v321_v49 = vpop.permute.xlu0 %320  ;;  %v331_v51 = vpop.permute.xlu1 %330 }
  0x97   : > { %v338_v52 = vmul.f32 %v321_v49, %v314_v50  ;;  %v340_v14 = vmul.f32 %v331_v51, %v316_v63 }
  0x9a   : > { %v326_v53 = vpop.permute.xlu0 %325 }
  0x9b   : > { %v344_v57 = vpop.permute.xlu1 %343  ;;  %v339_v60 = vmul.f32 %v326_v53, %v315_v54 }
  0x9c   : > { %v358_v58 = vadd.f32 %v344_v57, %v338_v52 }
  0x9e   : > { %v2066_v61 = vmul.f32 %v2063_v56, %v358_v58 }
  0x9f   : > { %v348_v62 = vpop.permute.xlu0 %347 }
  0xa0   : > { %v359_v4 = vadd.f32 %v348_v62, %v339_v60  ;;  %726 = vadd.xlane.f32.xlu1 %v2066_v61  ;;  %v336_v6 = vpop.permute.xlu1 %335 }
  0xa1   : > { %v341_v9 = vmul.f32 %v336_v6, %v317_v59 }
  0xa2   : > { %v2070_v11 = vmul.f32 %v2063_v56, %v359_v4 }
  0xa3   : > { %v356_v13 = vpop.permute.xlu0 %355 }
  0xa4   : > { %2724 = vst [vmem:[#allocation14_spill] sm:$0xff] %v2070_v11  ;;  %v361_v15 = vadd.f32 %v356_v13, %v341_v9  ;;  %728 = vadd.xlane.f32.xlu0 %v2070_v11 }
  0xa5   : > { %v352_v16 = vpop.permute.xlu1 %351 }
  0xa6   : > { %v2074_v17 = vmul.f32 %v2063_v56, %v361_v15  ;;  %v360_v18 = vadd.f32 %v352_v16, %v340_v14 }
  0xa7   : > { %v2141_v31 = vpop.permute.xlu0 %742 }
  0xa8   : > { %v2077_v19 = vmul.f32 %v2063_v56, %v360_v18  ;;  %732 = vadd.xlane.f32.xlu1 %v2074_v17 }
  0xa9   : > { %v2101_v24 = vpop.permute.xlu1 %744 }
  0xaa   : > { %730 = vadd.xlane.f32.xlu0 %v2077_v19 }
  0xab   : > { %v2150_v34 = vpop.permute.xlu0 %748 }
  0xad   : > { %v2106_v25 = vpop.permute.xlu1 %746 }
  0xaf   : > { %v372_v36 = vpop.permute.xlu0 %371 }
  0xb0   : > { %v383_v6 = vmul.f32 %v372_v36, %v2070_v11 }
  0xb1   : > { %v2113_v26 = vpop.permute.xlu1 %367 }
  0xb3   : > { %v2163_v38 = vpop.permute.xlu0 %375 }
  0xb6   : > { %v2117_v27 = vpop.permute.xlu1 %415 }
  0xb8   : > { %v2169_v41 = vpop.permute.xlu0 %447 }
  0xb9   : > { %406 = vrot.lane.b32.xlu1 %v2066_v61, %s1874_s29 }
  0xba   : > { %v2124_v28 = vpop.permute.xlu1 %419 }
  0xbd   : > { %410 = vrot.lane.b32.xlu1 %v2077_v19, %s1874_s29  ;;  %v2181_v44 = vpop.permute.xlu0 %427 }
  0xbe   : > { %v2129_v30 = vpop.permute.xlu1 %423 }
  0xc0   : > { %408 = vrot.lane.b32.xlu0 %v2070_v11, %s1874_s29 }
  0xc1   : > { %438 = vrot.lane.b32.xlu1 %v2066_v61, %s1875_s9 }
  0xc2   : > { %v2187_v46 = vpop.permute.xlu0 %483 }
  0xc4   : > { %543 = vperm.xlu0 %1723, %v1980_v0  }
  0xc5   : > { %387 = vperm.xlu1 %1724, %v1985_v1  }
  0xc7   : > { %v2194_v48 = vpop.permute.xlu0 %595 }
  0xc8   : > { %440 = vrot.lane.b32.xlu0 %v2070_v11, %s1875_s9 }
  0xc9   : > { %1725 = vset.pattern.permute.xlu1 %v1876_v20 }
  0xca   : > { %503 = vperm.xlu1 %1725, %v1985_v1  }
  0xcc   : > { %547 = vperm.xlu0 %1723, %v2002_v5   ;;  %v2200_v50 = vpop.permute.xlu0 %535 }
  0xce   : > { %507 = vperm.xlu1 %1725, %v1994_v3  }
  0xd0   : > { %470 = vrot.lane.b32.xlu0 %v2066_v61, %s1877_s10 }
  0xd1   : > { %1730 = vset.pattern.permute.xlu0 %v1878_v22 }
  0xd2   : > { %1726 = vset.pattern.permute.xlu1 %v1870_v21 }
  0xd3   : > { %599 = vperm.xlu1 %1726, %v1980_v0  }
  0xd4   : > { %563 = vperm.xlu0 %1730, %v1994_v3  }
  0xd7   : > { %1727 = vset.pattern.permute.xlu1 %v1879_v23 }
  0xd8   : > { %1731 = vset.pattern.permute.xlu0 %v1872_v39  ;;  %623 = vperm.xlu1 %1727, %v1985_v1  }
  0xd9   : > { %391 = vperm.xlu0 %1731, %v1994_v3  }
  0xdc   : > { %412 = vrot.lane.b32.xlu1 %v2074_v17, %s1874_s29 }
  0xdd   : > { %395 = vperm.xlu0 %1731, %v1980_v0   ;;  %1728 = vset.pattern.permute.xlu1 %v1876_v20 }
  0xe0   : > { %442 = vrot.lane.b32.xlu1 %v2077_v19, %s1875_s9 }
  0xe1   : > { %444 = vrot.lane.b32.xlu0 %v2074_v17, %s1875_s9  ;;  %s2647_s9 = scalar_lea.hbm %s2696_s6, %s1571_s26 }
  0xe4   : > { %472 = vrot.lane.b32.xlu1 %v2070_v11, %s1877_s10 }
  0xe5   : > { %526 = vrot.lane.b32.xlu0 %v2066_v61, %s1865_s28 }
  0xe8   : > { %511 = vperm.xlu1 %1728, %v1980_v0  }
  0xe9   : > { %399 = vperm.xlu0 %1731, %v2002_v5  }
  0xec   : > { %1729 = vset.pattern.permute.xlu1 %v1878_v22 }
  0xed   : > { %1734 = vset.pattern.permute.xlu0 %v1879_v23  ;;  %559 = vperm.xlu1 %1729, %v1985_v1  }
  0xee   : > { %627 = vperm.xlu0 %1734, %v1994_v3  }
  0xf1   : > { %1732 = vset.pattern.permute.xlu1 %v1870_v21  ;;  %v2135_v21 = vpop.permute.xlu1 %451 }
  0xf2   : > { %635 = vperm.xlu0 %1734, %v2002_v5   ;;  %603 = vperm.xlu1 %1732, %v2002_v5  }
  0xf5   : > { %v2145_v32 = vpop.permute.xlu1 %379 }
  0xf6   : > { %1738 = vset.pattern.permute.xlu0 %v1880_v29  ;;  %1733 = vset.pattern.permute.xlu1 %v1879_v23 }
  0xf7   : > { %687 = vperm.xlu0 %1738, %v1985_v1   ;;  %631 = vperm.xlu1 %1733, %v1980_v0  }
  0xf9   : > { %v2152_v35 = vpop.permute.xlu1 %455 }
  0xfb   : > { %530 = vrot.lane.b32.xlu0 %v2077_v19, %s1865_s28  ;;  %474 = vrot.lane.b32.xlu1 %v2077_v19, %s1877_s10 }
  0xfc   : > { %1735 = vset.pattern.permute.xlu1 %v1876_v20 }
  0xfd   : > { %v2157_v37 = vpop.permute.xlu1 %479 }
  0xff   : > { %584 = vrot.lane.b32.xlu0 %v2070_v11, %s1881_s11  ;;  %528 = vrot.lane.b32.xlu1 %v2070_v11, %s1865_s28 }
 0x101   : > { %v2165_v39 = vpop.permute.xlu1 %459 }
 0x103   : > { %695 = vperm.xlu0 %1738, %v1980_v0   ;;  %515 = vperm.xlu1 %1735, %v2002_v5  }
 0x105   : > { %v2174_v42 = vpop.permute.xlu1 %487 }
 0x107   : > { %1742 = vset.pattern.permute.xlu0 %v1882_v33  ;;  %1736 = vset.pattern.permute.xlu1 %v1878_v22 }
 0x108   : > { %655 = vperm.xlu0 %1742, %v1980_v0   ;;  %567 = vperm.xlu1 %1736, %v1980_v0  }
 0x109   : > { %v2183_v45 = vpop.permute.xlu1 %539 }
 0x10c   : > { %532 = vrot.lane.b32.xlu0 %v2074_v17, %s1865_s28  ;;  %1737 = vset.pattern.permute.xlu1 %v1882_v33 }
 0x10d   : > { %647 = vperm.xlu1 %1737, %v1985_v1   ;;  %v2191_v47 = vpop.permute.xlu1 %491 }
 0x110   : > { %614 = vrot.lane.b32.xlu0 %v2066_v61, %s1883_s12 }
 0x111   : > { %651 = vperm.xlu1 %1737, %v1994_v3   ;;  %v2197_v49 = vpop.permute.xlu1 %591 }
 0x114   : > { %659 = vperm.xlu0 %1742, %v2002_v5  }
 0x115   : > { %1739 = vset.pattern.permute.xlu1 %v1880_v29 }
 0x116   : > { %691 = vperm.xlu1 %1739, %v1994_v3  }
 0x118   : > { %1746 = vset.pattern.permute.xlu0 %v1884_v40 }
 0x119   : > { %715 = vperm.xlu0 %1746, %v1980_v0  }
 0x11a   : > { %476 = vrot.lane.b32.xlu1 %v2074_v17, %s1877_s10 }
 0x11b   : > { %1740 = vset.pattern.permute.xlu1 %v1878_v22 }
 0x11d   : > { %588 = vrot.lane.b32.xlu0 %v2074_v17, %s1881_s11 }
 0x11e   : > { %582 = vrot.lane.b32.xlu1 %v2066_v61, %s1881_s11  ;;  %1747 = vset.pattern.permute.xlu0 %v1885_v43 }
 0x121   : > { %679 = vperm.xlu0 %1747, %v2002_v5  }
 0x122   : > { %571 = vperm.xlu1 %1740, %v2002_v5  }
 0x125   : > { %620 = vrot.lane.b32.xlu0 %v2074_v17, %s1883_s12 }
 0x126   : > { %1741 = vset.pattern.permute.xlu1 %v1885_v43 }
 0x127   : > { %667 = vperm.xlu1 %1741, %v1985_v1  }
 0x12b   : > { %671 = vperm.xlu1 %1741, %v1994_v3  }
 0x12d   : > { %v727_v51 = vpop.xlane.xlu1 %726 }
 0x12e   : > { %v734_v62 = vmul.f32 0.0625, %v727_v51 }
 0x12f   : > { %1743 = vset.pattern.permute.xlu1 %v1884_v40 }
 0x130   : > { %707 = vperm.xlu1 %1743, %v1985_v1   ;;  %v738_v13 = vmul.f32 %v734_v62, %v1985_v1 }
 0x131   : > { %v729_v52 = vpop.xlane.xlu0 %728 }
 0x132   : > { %v735_v14 = vmul.f32 0.0625, %v729_v52  ;;  %v754_v22 = vadd.f32 %v2141_v31, %v738_v13  ;;  %v1886_v52 = vmov 4  }
 0x134   : > { %711 = vperm.xlu1 %1743, %v1994_v3   ;;  %v739_v23 = vmul.f32 %v735_v14, %v1994_v3  ;;  %v758_v36 = vmax.f32 %v754_v22, 0.0 }
 0x135   : > { %v733_v53 = vpop.xlane.xlu1 %732 }
 0x137   : > { %v731_v54 = vpop.xlane.xlu0 %730 }
 0x138   : > { %586 = vrot.lane.b32.xlu1 %v2077_v19, %s1881_s11  ;;  %s1891_s11 = smov [#allocation2]  }
 0x139   : > { %v2205_v55 = vpop.permute.xlu1 %406  ;;  %1744 = vset.pattern.permute.xlu1 %v1885_v43  ;;  %v737_v43 = vmul.f32 0.0625, %v733_v53 }
 0x13b   : > { %v409_v58 = vpop.permute.xlu0 %408 }
 0x13c   : > { %616 = vrot.lane.b32.xlu1 %v2070_v11, %s1883_s12  ;;  %v431_v63 = vmul.f32 %v2124_v28, %v409_v58  ;;  %v736_v28 = vmul.f32 0.0625, %v731_v54  ;;  %v741_v58 = vmul.f32 %v737_v43, %v2002_v5 }
 0x13d   : > { %v2209_v57 = vpop.permute.xlu1 %410 }
 0x13e   : > { %v435_v15 = vadd.f32 %v431_v63, %v383_v6  ;;  %v740_v51 = vmul.f32 %v736_v28, %v1980_v0 }
 0x140   : > { %675 = vperm.xlu1 %1744, %v1980_v0   ;;  %v756_v54 = vadd.f32 %v2106_v25, %v740_v51 }
 0x141   : > { %v2212_v59 = vpop.permute.xlu1 %438 }
 0x142   : > { %v760_v53 = vmax.f32 %v756_v54, 0.0 }
 0x143   : > { %v2214_v60 = vpop.permute.xlu0 %543 }
 0x144   : > { %1745 = vset.pattern.permute.xlu1 %v1880_v29 }
 0x145   : > { %699 = vperm.xlu1 %1745, %v2002_v5   ;;  %v2219_v4 = vpop.permute.xlu1 %387 }
 0x147   : > { %v441_v9 = vpop.permute.xlu0 %440 }
 0x148   : > { %v463_v16 = vmul.f32 %v2135_v21, %v441_v9  ;;  %v755_v21 = vadd.f32 %v2101_v24, %v739_v23  ;;  %v757_v24 = vadd.f32 %v2150_v34, %v741_v58 }
 0x149   : > { %618 = vrot.lane.b32.xlu1 %v2077_v19, %s1883_s12  ;;  %v2226_v18 = vpop.permute.xlu1 %503  ;;  %s1803_s12 = sshll.u32 %s1891_s11, 4  ;;  %s1804_s12 = int_to_ptr.vmem [resolvable:$false] %s1803_s12 }
 0x14a   : > { %v2228_v20 = vadd.f32 %v463_v16, %v435_v15  ;;  %1748 = vset.pattern.permute.xlu1 %v1884_v40  ;;  %v759_v31 = vmax.f32 %v755_v21, 0.0  ;;  %v761_v13 = vmax.f32 %v757_v24, 0.0  ;;  %s1805_s13 = scalar_lea.vmem %s1804_s12, 1024 }
 0x14b   : > { %v2233_v33 = vpop.permute.xlu0 %547 }
 0x14d   : > { %719 = vperm.xlu1 %1748, %v2002_v5   ;;  %v508_v29 = vpop.permute.xlu1 %507 }
 0x14f   : > { %v2241_v62 = vpop.permute.xlu0 %470 }
 0x151   : > { %1749 = vset.pattern.permute.xlu1 %v1886_v52 }
 0x152   : > { %764 = vperm.xlu1 %1749, %v758_v36   ;;  %v2237_v40 = vpop.permute.xlu1 %599 }
 0x153   : > { %v564_v6 = vpop.permute.xlu0 %563 }
 0x156   : > { %769 = vperm.xlu1 %1749, %v759_v31  }
 0x157   : > { %v2243_v63 = vpop.permute.xlu1 %623 }
 0x158   : > { %v392_v15 = vpop.permute.xlu0 %391 }
 0x159   : > { %v403_v58 = vmul.f32 %v392_v15, %v2070_v11 }
 0x15a   : > { %774 = vperm.xlu1 %1749, %v760_v53  }
 0x15b   : > { %v2246_v9 = vpop.permute.xlu1 %412 }
 0x15c   : > { %v2248_v22 = vpop.permute.xlu0 %395 }
 0x15e   : > { %779 = vperm.xlu1 %1749, %v761_v13  }
 0x15f   : > { %v443_v14 = vpop.permute.xlu1 %442 }
 0x160   : > { %v2252_v23 = vpop.permute.xlu0 %444 }
 0x163   : > { %v473_v16 = vpop.permute.xlu1 %472 }
 0x164   : > { %v2258_v34 = vpop.permute.xlu0 %526  ;;  %v519_v52 = vmul.f32 %v508_v29, %v473_v16  ;;  %v495_v11 = vmul.f32 %v2187_v46, %v473_v16 }
 0x166   : > { %v523_v53 = vadd.f32 %v519_v52, %v403_v58 }
 0x167   : > { %v2250_v25 = vpop.permute.xlu1 %511 }
 0x168   : > { %v2262_v43 = vpop.permute.xlu0 %399 }
 0x169   : > { %2726 = vst [vmem:[#allocation16_spill] sm:$0xff] %v2262_v43 }
 0x16c   : > { %v2254_v28 = vpop.permute.xlu1 %559 }
 0x16d   : > { %v628_v31 = vpop.permute.xlu0 %627 }
 0x171   : > { %v2256_v36 = vpop.permute.xlu1 %603  ;;  %v2267_v2 = vpop.permute.xlu0 %635 }
 0x172   : > { %2725 = vst [vmem:[#allocation15_spill] sm:$0xff] %v2256_v36  ;;  %2727 = vst [vmem:[#allocation17_spill] sm:$0xff] %v2267_v2 }
 0x176   : > { %v2260_v21 = vpop.permute.xlu1 %631  ;;  %v2273_v1 = vpop.permute.xlu0 %687 }
 0x177   : > { %2729 = vst [vmem:[#allocation19_spill] sm:$0xff] %v2273_v1 }
 0x17a   : > { %v2264_v51 = vpop.permute.xlu1 %474  ;;  %v2277_v12 = vpop.permute.xlu0 %530 }
 0x17e   : > { %v529_v54 = vpop.permute.xlu1 %528  ;;  %v585_v10 = vpop.permute.xlu0 %584 }
 0x17f   : > { %v575_v24 = vmul.f32 %v564_v6, %v529_v54 }
 0x181   : > { %v579_v13 = vadd.f32 %v575_v24, %v523_v53 }
 0x182   : > { %v2269_v5 = vpop.permute.xlu1 %515  ;;  %v2283_v6 = vpop.permute.xlu0 %695 }
 0x183   : > { %2728 = vst [vmem:[#allocation18_spill] sm:$0xff] %v2269_v5  ;;  %2731 = vst [vmem:[#allocation21_spill] sm:$0xff] %v2283_v6  ;;  %v551_v6 = vmul.f32 %v2183_v45, %v529_v54  ;;  %v607_v45 = vmul.f32 %v2194_v48, %v585_v10 }
 0x187   : > { %v2271_v0 = vpop.permute.xlu1 %567  ;;  %v2285_v58 = vpop.permute.xlu0 %655 }
 0x188   : > { %2732 = vst [vmem:[#allocation22_spill] sm:$0xff] %v2285_v58  ;;  %v430_v58 = vmul.f32 %v2117_v27, %v2205_v55  ;;  %v432_v27 = vmul.f32 %v2129_v30, %v2209_v57  ;;  %v433_v30 = vmul.f32 %v2181_v44, %v2246_v9 }
 0x18b   : > { %v2289_v53 = vpop.permute.xlu0 %532 }
 0x18c   : > { %v2275_v3 = vpop.permute.xlu1 %647 }
 0x18f   : > { %v615_v7 = vpop.permute.xlu0 %614 }
 0x190   : > { %v652_v29 = vpop.permute.xlu1 %651 }
 0x195   : > { %v2279_v56 = vpop.permute.xlu1 %691 }
 0x196   : > { %2730 = vst [vmem:[#allocation20_spill] sm:$0xff] %v2279_v56  ;;  %v2296_v56 = vpop.permute.xlu0 %659 }
 0x197   : > { %2736 = vst [vmem:[#allocation26_spill] sm:$0xff] %v2296_v56  ;;  %v494_v56 = vmul.f32 %v2157_v37, %v2241_v62 }
 0x199   : > { %v2281_v15 = vpop.permute.xlu1 %476 }
 0x19a   : > { %v2308_v46 = vpop.permute.xlu0 %715  ;;  %v497_v44 = vmul.f32 %v2191_v47, %v2281_v15  ;;  %v520_v47 = vmul.f32 %v2250_v25, %v2264_v51 }
 0x19d   : > { %v583_v52 = vpop.permute.xlu1 %582 }
 0x19e   : > { %v606_v37 = vmul.f32 %v2197_v49, %v583_v52 }
 0x1a1   : > { %v2287_v24 = vpop.permute.xlu1 %571 }
 0x1a2   : > { %2733 = vst [vmem:[#allocation23_spill] sm:$0xff] %v2287_v24  ;;  %v499_v24 = vadd.f32 %v495_v11, %v2228_v20 }
 0x1a4   : > { %v555_v36 = vadd.f32 %v551_v6, %v499_v24  ;;  %v589_v6 = vpop.permute.xlu0 %588 }
 0x1a6   : > { %v2291_v8 = vpop.permute.xlu1 %667  ;;  %v611_v20 = vadd.f32 %v607_v45, %v555_v36  ;;  %v404_v45 = vmul.f32 %v2248_v22, %v2077_v19  ;;  %v2737_v22 = vld [vmem:[#allocation15_spill] sm:$0xff] }
 0x1a7   : > { %2734 = vst [vmem:[#allocation24_spill] sm:$0xff] %v2291_v8  ;;  %v382_v8 = vmul.f32 %v2113_v26, %v2066_v61  ;;  %v550_v26 = vmul.f32 %v2200_v50, %v2258_v34 }
 0x1a8   : > { %v2332_v9 = vpop.permute.xlu0 %679 }
 0x1a9   : > { %v434_v16 = vadd.f32 %v430_v58, %v382_v8  ;;  %v464_v8 = vmul.f32 %v2152_v35, %v443_v14 }
 0x1aa   : > { %v672_v43 = vpop.permute.xlu1 %671 }
 0x1ab   : > { %v683_v49 = vadd.f32 %v672_v43, %v579_v13 }
 0x1af   : > { %v2293_v5 = vpop.permute.xlu1 %707 }
 0x1b0   : > { %2735 = vst [vmem:[#allocation25_spill] sm:$0xff] %v2293_v5  ;;  %v462_v5 = vmul.f32 %v2169_v41, %v2212_v59  ;;  %v384_v41 = vmul.f32 %v2163_v38, %v2077_v19  ;;  %v385_v38 = vmul.f32 %v2145_v32, %v2074_v17 }
 0x1b2   : > { %v466_v55 = vadd.f32 %v462_v5, %v434_v16  ;;  %v436_v48 = vadd.f32 %v432_v27, %v384_v41  ;;  %v496_v5 = vmul.f32 %v2174_v42, %v2264_v51  ;;  %v437_v52 = vadd.f32 %v433_v30, %v385_v38  ;;  %v621_v51 = vpop.permute.xlu0 %620  ;;  %v2739_v41 = vld [vmem:[#allocation22_spill] sm:$0xff] }
 0x1b3   : > { %v2298_v1 = vpop.permute.xlu1 %711  ;;  %v638_v42 = vmul.f32 %v2243_v63, %v615_v7  ;;  %v552_v16 = vmul.f32 %v2214_v60, %v2277_v12  ;;  %v402_v63 = vmul.f32 %v2219_v4, %v2066_v61  ;;  %v574_v60 = vmul.f32 %v2254_v28, %v2258_v34 }
 0x1b4   : > { %v498_v59 = vadd.f32 %v494_v56, %v466_v55  ;;  %v465_v56 = vmul.f32 %v2165_v39, %v2252_v23  ;;  %v518_v23 = vmul.f32 %v2226_v18, %v2241_v62  ;;  %v553_v18 = vmul.f32 %v2233_v33, %v2289_v53  ;;  %v2740_v33 = vld [vmem:[#allocation19_spill] sm:$0xff] }
 0x1b5   : > { %v609_v55 = vmul.f32 %v2737_v22, %v589_v6 }
 0x1b6   : > { %v554_v57 = vadd.f32 %v550_v26, %v498_v59  ;;  %v469_v32 = vadd.f32 %v465_v56, %v437_v52  ;;  %v522_v25 = vadd.f32 %v518_v23, %v402_v63  ;;  %v524_v26 = vadd.f32 %v520_v47, %v404_v45  ;;  %v2743_v56 = vld [vmem:[#allocation14_spill] sm:$0xff]  ;;  %v2750_v45 = vld [vmem:[#allocation21_spill] sm:$0xff] }
 0x1b7   : > { %v587_v2 = vpop.permute.xlu1 %586  ;;  %v2742_v30 = vld [vmem:[#allocation25_spill] sm:$0xff] }
 0x1b8   : > { %v610_v35 = vadd.f32 %v606_v37, %v554_v57  ;;  %v608_v39 = vmul.f32 %v2237_v40, %v587_v2  ;;  %v501_v13 = vadd.f32 %v497_v44, %v469_v32  ;;  %v576_v2 = vmul.f32 %v2271_v0, %v2277_v12  ;;  %v1546_v57 = vld [vmem:[%s263_s15] ss:$0 sm:$0xff] }
 0x1b9   : > { %v578_v34 = vadd.f32 %v574_v60, %v522_v25  ;;  %v704_v60 = vmul.f32 %v2750_v45, %v2077_v19 }
 0x1ba   : > { %v642_v43 = vadd.f32 %v638_v42, %v610_v35  ;;  %v580_v12 = vadd.f32 %v576_v2, %v524_v26  ;;  %v2744_v35 = vld [vmem:[#allocation20_spill] sm:$0xff]  ;;  %v2746_v42 = vld [vmem:[#allocation9_spill] sm:$0xff] }
 0x1bb   : > { %v617_v11 = vpop.permute.xlu1 %616  ;;  %v808_v32 = vmul.f32 %v1546_v57, %v2746_v42  ;;  %v2752_v26 = vld [vmem:[#allocation13_spill] sm:$0xff] }
 0x1bc   : > { %v639_v54 = vmul.f32 %v628_v31, %v617_v11  ;;  %v468_v31 = vadd.f32 %v464_v8, %v436_v48  ;;  %v662_v4 = vadd.f32 %v2275_v3, %v642_v43  ;;  %v557_v11 = vadd.f32 %v553_v18, %v501_v13  ;;  %v2741_v3 = vld [vmem:[#allocation24_spill] sm:$0xff]  ;;  %v2749_v13 = vld [vmem:[#allocation26_spill] sm:$0xff] }
 0x1bd   : > { %v682_v59 = vadd.f32 %v2741_v3, %v578_v34  ;;  %v2751_v18 = vld [vmem:[#allocation10_spill] sm:$0xff] }
 0x1be   : > { %v643_v10 = vadd.f32 %v639_v54, %v611_v20  ;;  %v500_v58 = vadd.f32 %v496_v5, %v468_v31  ;;  %v2738_v54 = vld [vmem:[#allocation17_spill] sm:$0xff]  ;;  %v786_v37 = vmax.f32 %v662_v4, 0.0  ;;  %v613_v6 = vadd.f32 %v609_v55, %v557_v11 }
 0x1bf   : > { %v676_v50 = vpop.permute.xlu1 %675  ;;  %v641_v0 = vmul.f32 %v2738_v54, %v621_v51 }
 0x1c0   : > { %v663_v36 = vadd.f32 %v652_v29, %v643_v10  ;;  %v556_v7 = vadd.f32 %v552_v16, %v500_v58  ;;  %v684_v10 = vadd.f32 %v676_v50, %v580_v12  ;;  %v790_v58 = vmul.f32 %v786_v37, %v682_v59  ;;  %v2747_v16 = vld [vmem:[#allocation16_spill] sm:$0xff] }
 0x1c1   : > { %v405_v50 = vmul.f32 %v2747_v16, %v2074_v17  ;;  %v2754_v59 = vld [vmem:[#allocation12_spill] sm:$0xff] }
 0x1c2   : > { %v787_v14 = vmax.f32 %v663_v36, 0.0  ;;  %v612_v40 = vadd.f32 %v608_v39, %v556_v7  ;;  %v645_v36 = vadd.f32 %v641_v0, %v613_v6  ;;  %v2748_v39 = vld [vmem:[#allocation23_spill] sm:$0xff]  ;;  %v811_v37 = vmul.f32 %v1546_v57, %v2754_v59 }
 0x1c3   : > { %v577_v23 = vmul.f32 %v2748_v39, %v2289_v53 }
 0x1c4   : > { %v2334_v29 = vpop.permute.xlu1 %699  ;;  %v791_v24 = vmul.f32 %v787_v14, %v683_v49  ;;  %v703_v49 = vmul.f32 %v2744_v35, %v2743_v56  ;;  %v2745_v14 = vld [vmem:[#allocation18_spill] sm:$0xff]  ;;  %v665_v7 = vadd.f32 %v2749_v13, %v645_v36 }
 0x1c5   : > { %v521_v52 = vmul.f32 %v2745_v14, %v2281_v15  ;;  %v705_v11 = vmul.f32 %v2334_v29, %v2074_v17  ;;  %v2756_v36 = vld [vmem:[#allocation6_spill] sm:$0xff] }
 0x1c6   : > { %v723_v43 = vadd.f32 %v2298_v1, %v703_v49  ;;  %v789_v4 = vmax.f32 %v665_v7, 0.0 }
 0x1c7   : > { %v525_v15 = vadd.f32 %v521_v52, %v405_v50 }
 0x1c8   : > { %v619_v27 = vpop.permute.xlu1 %618 }
 0x1c9   : > { %v640_v62 = vmul.f32 %v2260_v21, %v619_v27  ;;  %v702_v21 = vmul.f32 %v2740_v33, %v2066_v61  ;;  %v581_v25 = vadd.f32 %v577_v23, %v525_v15 }
 0x1cb   : > { %v644_v28 = vadd.f32 %v640_v62, %v612_v40  ;;  %v722_v5 = vadd.f32 %v2742_v30, %v702_v21  ;;  %v809_v40 = vmul.f32 %v1546_v57, %v2751_v18  ;;  %v724_v62 = vadd.f32 %v2308_v46, %v704_v60  ;;  %v2755_v30 = vld [vmem:[#allocation7_spill] sm:$0xff] }
 0x1cc   : > { %v720_v20 = vpop.permute.xlu1 %719  ;;  %v685_v54 = vadd.f32 %v2332_v9, %v581_v25  ;;  %v2426_v60 = vld [vmem:[%s2692_s2 + $0x10] sm:$0xff] }
 0x1cd   : > { %v664_v8 = vadd.f32 %v2739_v41, %v644_v28  ;;  %v725_v0 = vadd.f32 %v720_v20, %v705_v11 }
 0x1cf   : > { %v788_v48 = vmax.f32 %v664_v8, 0.0  ;;  %v793_v8 = vmul.f32 %v789_v4, %v685_v54 }
 0x1d1   : > { %v765_v38 = vpop.permute.xlu1 %764  ;;  %v792_v31 = vmul.f32 %v788_v48, %v684_v10 }
 0x1d2   : > { %v782_v44 = vmul.f32 %v765_v38, %v722_v5 }
 0x1d4   : > { %v794_v47 = vadd.f32 %v790_v58, %v782_v44  ;;  %v2758_v58 = vld [vmem:[#allocation8_spill] sm:$0xff] }
 0x1d5   : > { %v770_v63 = vpop.permute.xlu1 %769 }
 0x1d6   : > { %v798_v27 = vadd.f32 %v794_v47, %v2066_v61  ;;  %v783_v2 = vmul.f32 %v770_v63, %v723_v43  ;;  %v2753_v61 = vld [vmem:[#allocation11_spill] sm:$0xff]  ;;  %v2418_v63 = vld [vmem:[%s2692_s2] sm:$0xff] }
 0x1d7   : > { %v810_v34 = vmul.f32 %v1546_v57, %v2753_v61 }
 0x1d8   : > { %v795_v51 = vadd.f32 %v791_v24, %v783_v2  ;;  %v812_v53 = vadd.f32 %v808_v32, %v798_v27 }
 0x1d9   : > { %v775_v1 = vpop.permute.xlu1 %774 }
 0x1da   : > { %v799_v22 = vadd.f32 %v795_v51, %v2743_v56  ;;  %v784_v55 = vmul.f32 %v775_v1, %v724_v62  ;;  %v2386_v28 = vmul.f32 %v2752_v26, %v812_v53 }
 0x1dc   : > { %v796_v46 = vadd.f32 %v792_v31, %v784_v55  ;;  %820 = vadd.xlane.f32.xlu0 %v2386_v28  ;;  %v813_v24 = vadd.f32 %v809_v40, %v799_v22  ;;  %v2757_v31 = vld [vmem:[#allocation5_spill] sm:$0xff] }
 0x1dd   : > { %v780_v12 = vpop.permute.xlu1 %779 }
 0x1de   : > { %v800_v41 = vadd.f32 %v796_v46, %v2077_v19  ;;  %v785_v29 = vmul.f32 %v780_v12, %v725_v0  ;;  %v2393_v33 = vmul.f32 %v2752_v26, %v813_v24 }
 0x1e0   : > { %v797_v21 = vadd.f32 %v793_v8, %v785_v29  ;;  %822 = vadd.xlane.f32.xlu1 %v2393_v33  ;;  %v814_v3 = vadd.f32 %v810_v34, %v800_v41 }
 0x1e2   : > { %v801_v9 = vadd.f32 %v797_v21, %v2074_v17  ;;  %v2399_v20 = vmul.f32 %v2752_v26, %v814_v3 }
 0x1e4   : > { %824 = vadd.xlane.f32.xlu0 %v2399_v20  ;;  %v815_v6 = vadd.f32 %v811_v37, %v801_v9 }
 0x1e6   : > { %v2403_v19 = vmul.f32 %v2752_v26, %v815_v6 }
 0x1e8   : > { %826 = vadd.xlane.f32.xlu0 %v2403_v19 }
 0x269   : > { %v821_v10 = vpop.xlane.xlu0 %820 }
 0x26a   : > { %v828_v38 = vmul.f32 %v821_v10, %v2756_v36  ;;  %v1888_v10 = vmov 6  }
 0x26b   : > { %1750 = vset.pattern.permute.xlu1 %v1888_v10  ;;  %1751 = vset.pattern.permute.xlu0 %v1888_v10 }
 0x26c   : > { %v833_v35 = vsel %vm832_vm1, %v828_v38, 0.0 }
 0x26d   : > { %v823_v48 = vpop.xlane.xlu1 %822 }
 0x26e   : > { %v829_v5 = vmul.f32 %v823_v48, %v2755_v30 }
 0x270   : > { %v834_v17 = vsel %vm832_vm1, %v829_v5, 0.0  ;;  %v2463_v5 = vld [vmem:[%s2692_s2 + $0x8] sm:$0xff] }
 0x271   : > { %v825_v57 = vpop.xlane.xlu0 %824  ;;  %v835_v14 = vadd.f32 %v834_v17, %v833_v35 }
 0x272   : > { %v830_v56 = vmul.f32 %v825_v57, %v2757_v31 }
 0x274   : > { %v836_v49 = vsel %vm832_vm1, %v830_v56, 0.0 }
 0x275   : > { %v827_v52 = vpop.xlane.xlu0 %826  ;;  %v837_v42 = vadd.f32 %v836_v49, %v835_v14  ;;  %v2474_v14 = vld [vmem:[%s2692_s2 + $0x18] sm:$0xff] }
 0x276   : > { %v831_v44 = vmul.f32 %v827_v52, %v2758_v58 }
 0x278   : > { %v838_v32 = vsel %vm832_vm1, %v831_v44, 0.0 }
 0x279   : > { %v839_v16 = vadd.f32 %v838_v32, %v837_v42 }
 0x27b   : > { %v840_v50 = vrot.slane %v839_v16, 4 }
 0x27d   : > { %v841_v39 = vadd.f32 %v840_v50, %v839_v16 }
 0x27f   : > { %v842_v23 = vrot.slane %v841_v39, 2 }
 0x281   : > { %v843_v43 = vadd.f32 %v842_v23, %v841_v39 }
 0x283   : > { %v844_v47 = vrot.slane %v843_v43, 1 }
 0x285   : > { %v845_v13 = vadd.f32 %v844_v47, %v843_v43 }
 0x287   : > { %v847_v7 = vmul.f32 %v845_v13, %v2755_v30  ;;  %v846_v45 = vmul.f32 %v2418_v63, %v845_v13  ;;  %v848_v15 = vmul.f32 %v2426_v60, %v845_v13  ;;  %v849_v27 = vmul.f32 %v845_v13, %v2758_v58 }
 0x289   : > { %856 = vrot.lane.b32.xlu0 %v847_v7, %s1887_s18  ;;  %854 = vrot.lane.b32.xlu1 %v846_v45, %s1887_s18 }
 0x28d   : > { %858 = vrot.lane.b32.xlu1 %v848_v15, %s1887_s18  ;;  %v1889_v15 = vmov 7  }
 0x291   : > { %860 = vrot.lane.b32.xlu1 %v849_v27, %s1887_s18 }
 0x2fb   : > { %v857_v2 = vpop.permute.xlu0 %856  ;;  %v855_v18 = vpop.permute.xlu1 %854 }
 0x2fc   : > { %v870_v40 = vsel %vm866_vm2, %v857_v2, 0.0  ;;  %v867_v62 = vsel %vm866_vm2, %v855_v18, 0.0 }
 0x2fd   : > { %871 = vadd.xlane.f32.xlu1 %v870_v40  ;;  %868 = vadd.xlane.f32.xlu0 %v867_v62 }
 0x2ff   : > { %v859_v25 = vpop.permute.xlu1 %858 }
 0x300   : > { %v873_v51 = vsel %vm866_vm2, %v859_v25, 0.0 }
 0x301   : > { %874 = vadd.xlane.f32.xlu0 %v873_v51 }
 0x303   : > { %v861_v53 = vpop.permute.xlu1 %860 }
 0x304   : > { %v876_v4 = vsel %vm866_vm2, %v861_v53, 0.0 }
 0x305   : > { %877 = vadd.xlane.f32.xlu0 %v876_v4  ;;  %v2759_v4 = vmov 0  }
 0x38a   : > { %v869_v1 = vpop.xlane.xlu0 %868  ;;  %v872_v11 = vpop.xlane.xlu1 %871 }
 0x38b   : > { %v879_v22 = vmul.f32 0.03125, %v869_v1  ;;  %v880_v55 = vmul.f32 0.03125, %v872_v11  ;;  %v1759_v1 = vld [vmem:[%s2693_s3] sm:$0xff]  }
 0x38c   : > { %1596 = vmatprep.mubr.msk.bf16.mxu0 %vm1162_vm3, %v1759_v1  ;;  %v1026_v11 = vld [vmem:[%s2694_s4] sm:$0xff] }
 0x38d   : > { %v883_v61 = vsub.f32 %v2386_v28, %v879_v22  ;;  %v884_v34 = vsub.f32 %v2393_v33, %v880_v55  ;;  %v1028_v22 = vld [vmem:[%s2694_s4 + $0x10] sm:$0xff]  ;;  %v1027_v55 = vld [vmem:[%s2694_s4 + $0x8] sm:$0xff] }
 0x38e   : > { %v875_v54 = vpop.xlane.xlu0 %874 }
 0x38f   : > { %v2439_v0 = vmul.f32 %v2752_v26, %v883_v61  ;;  %v881_v46 = vmul.f32 0.03125, %v875_v54  ;;  %v2442_v24 = vmul.f32 %v2752_v26, %v884_v34  ;;  %v1031_v61 = vld [vmem:[%s2694_s4 + $0x28] sm:$0xff]  ;;  %v1029_v34 = vld [vmem:[%s2694_s4 + $0x18] sm:$0xff] }
 0x390   : > { %v1033_v54 = vld [vmem:[%s2694_s4 + $0x38] sm:$0xff] }
 0x391   : > { %v885_v12 = vsub.f32 %v2399_v20, %v881_v46  ;;  %v891_v41 = vmul.f32 %v2439_v0, %v2439_v0  ;;  %v892_v8 = vmul.f32 %v2442_v24, %v2442_v24  ;;  %v1030_v46 = vld [vmem:[%s2694_s4 + $0x20] sm:$0xff] }
 0x392   : > { %v878_v29 = vpop.xlane.xlu0 %877 }
 0x393   : > { %v2450_v21 = vmul.f32 %v2752_v26, %v885_v12  ;;  %v882_v3 = vmul.f32 0.03125, %v878_v29  ;;  %895 = vadd.xlane.f32.xlu1 %v891_v41  ;;  %897 = vadd.xlane.f32.xlu0 %v892_v8  ;;  %v1035_v12 = vld [vmem:[%s2694_s4 + $0x48] sm:$0xff]  ;;  %v1032_v41 = vld [vmem:[%s2694_s4 + $0x30] sm:$0xff]  ;;  %v1037_v8 = vld [vmem:[%s2694_s4 + $0x58] sm:$0xff] }
 0x394   : > { %v1034_v29 = vld [vmem:[%s2694_s4 + $0x40] sm:$0xff] }
 0x395   : > { %v886_v59 = vsub.f32 %v2403_v19, %v882_v3  ;;  %v893_v37 = vmul.f32 %v2450_v21, %v2450_v21  ;;  %v1039_v3 = vld [vmem:[%s2694_s4 + $0x68] sm:$0xff] }
 0x397   : > { %899 = vadd.xlane.f32.xlu1 %v893_v37  ;;  %v2456_v9 = vmul.f32 %v2752_v26, %v886_v59  ;;  %v1036_v59 = vld [vmem:[%s2694_s4 + $0x50] sm:$0xff]  ;;  %v1041_v37 = vld [vmem:[%s2694_s4 + $0x78] sm:$0xff] }
 0x399   : > { %v894_v6 = vmul.f32 %v2456_v9, %v2456_v9 }
 0x39b   : > { %901 = vadd.xlane.f32.xlu0 %v894_v6  ;;  %v1038_v6 = vld [vmem:[%s2694_s4 + $0x60] sm:$0xff] }
 0x420   : > { %v898_v48 = vpop.xlane.xlu0 %897  ;;  %v896_v30 = vpop.xlane.xlu1 %895 }
 0x421   : > { %v904_v36 = vmul.f32 %v2463_v5, %v898_v48  ;;  %v903_v38 = vmul.f32 %v2418_v63, %v896_v30 }
 0x423   : > { %v908_v57 = vsel %vm832_vm1, %v904_v36, 0.0  ;;  %v907_v17 = vsel %vm832_vm1, %v903_v38, 0.0 }
 0x424   : > { %v900_v26 = vpop.xlane.xlu1 %899  ;;  %v909_v35 = vadd.f32 %v908_v57, %v907_v17 }
 0x425   : > { %v905_v31 = vmul.f32 %v2426_v60, %v900_v26 }
 0x427   : > { %v910_v56 = vsel %vm832_vm1, %v905_v31, 0.0 }
 0x428   : > { %v902_v49 = vpop.xlane.xlu0 %901  ;;  %v911_v58 = vadd.f32 %v910_v56, %v909_v35 }
 0x429   : > { %v906_v52 = vmul.f32 %v2474_v14, %v902_v49 }
 0x42b   : > { %v912_v44 = vsel %vm832_vm1, %v906_v52, 0.0 }
 0x42c   : > { %v913_v42 = vadd.f32 %v912_v44, %v911_v58 }
 0x42e   : > { %v914_v32 = vrot.slane %v913_v42, 4 }
 0x430   : > { %v915_v16 = vadd.f32 %v914_v32, %v913_v42 }
 0x432   : > { %v916_v50 = vrot.slane %v915_v16, 2 }
 0x434   : > { %v917_v39 = vadd.f32 %v916_v50, %v915_v16 }
 0x436   : > { %v918_v23 = vrot.slane %v917_v39, 1 }
 0x438   : > { %v919_v43 = vadd.f32 %v918_v23, %v917_v39 }
 0x43a   : > { %v921_v47 = vmul.f32 %v2463_v5, %v919_v43  ;;  %v920_v13 = vmul.f32 %v2418_v63, %v919_v43  ;;  %v922_v7 = vmul.f32 %v2426_v60, %v919_v43  ;;  %v923_v45 = vmul.f32 %v2474_v14, %v919_v43 }
 0x43c   : > { %930 = vrot.lane.b32.xlu0 %v921_v47, %s1887_s18  ;;  %928 = vrot.lane.b32.xlu1 %v920_v13, %s1887_s18 }
 0x440   : > { %932 = vrot.lane.b32.xlu1 %v922_v7, %s1887_s18 }
 0x444   : > { %934 = vrot.lane.b32.xlu1 %v923_v45, %s1887_s18  ;;  %s1542_s18 = sshll.u32 %s253_s17, 5 }
 0x445   : > { %s255_s19 = scalar_lea.vmem [#allocation2], %s1542_s18 }
 0x446   : > { %s1467_s20 = sshll.u32 %s255_s19, 4  ;;  %s2640_s20 = int_to_ptr.vmem [resolvable:$true] %s1467_s20 }
 0x447   : > { %s1799_s10 = scalar_lea.vmem %s2640_s20, 512  ;;  %p1806_p0 = scmp.lt.s32.totalorder %s2640_s20, %s1804_s12 }
 0x448   : > { %969 = vperm.xlu1 %1750, %v2418_v63   ;;  %p1800_p11 = scmp.ne.s32.totalorder %s2640_s20, %s1799_s10  ;;  %p1807_p1 = scmp.lt.s32.totalorder %s1805_s13, %s1799_s10 }
 0x44a   : > { %p1801_p12 = pnand %p1800_p11, %p1967_p5  ;;  %p1808_p2 = por %p1807_p1, %p1806_p0 }
 0x44c   : > { %1752 = vset.pattern.permute.xlu1 %v1889_v15  ;;  %p1802_p13 = pneg %p1801_p12 }
 0x44e   : > { %p1809_p3 = pnand %p1808_p2, %p1802_p13 }
 0x4ae   : > { %v931_v27 = vpop.permute.xlu0 %930  ;;  %v929_v2 = vpop.permute.xlu1 %928 }
 0x4af   : > { %v943_v18 = vsel %vm866_vm2, %v931_v27, 0.0  ;;  %v940_v40 = vsel %vm866_vm2, %v929_v2, 0.0 }
 0x4b0   : > { %944 = vadd.xlane.f32.xlu1 %v943_v18  ;;  %941 = vadd.xlane.f32.xlu0 %v940_v40 }
 0x4b2   : > { %v933_v62 = vpop.permute.xlu1 %932 }
 0x4b3   : > { %v946_v25 = vsel %vm866_vm2, %v933_v62, 0.0 }
 0x4b4   : > { %947 = vadd.xlane.f32.xlu0 %v946_v25 }
 0x4b6   : > { %v935_v51 = vpop.permute.xlu1 %934 }
 0x4b7   : > { %v949_v53 = vsel %vm866_vm2, %v935_v51, 0.0 }
 0x4b8   : > { %950 = vadd.xlane.f32.xlu0 %v949_v53 }
 0x4c1   : > { %989 = vperm.xlu1 %1752, %v2418_v63  }
 0x4c5   : > { %993 = vperm.xlu1 %1752, %v2463_v5  }
 0x4c7   : > { %v970_v48 = vpop.permute.xlu1 %969 }
 0x4c9   : > { %1753 = vset.pattern.permute.xlu1 %v1888_v10  ;;  %v1040_v10 = vld [vmem:[%s2694_s4 + $0x70] sm:$0xff] }
 0x4ca   : > { %977 = vperm.xlu1 %1753, %v2426_v60  }
 0x4ce   : > { %981 = vperm.xlu1 %1753, %v2474_v14   ;;  %973 = vperm.xlu0 %1751, %v2463_v5  }
 0x4d2   : > { %1754 = vset.pattern.permute.xlu1 %v1889_v15  ;;  %1756 = vset.pattern.permute.xlu0 %v2759_v4 }
 0x4d3   : > { %997 = vperm.xlu1 %1754, %v2426_v60   ;;  %1054 = vperm.xlu0 %1756, %v1028_v22   ;;  %v1763_v22 = vld [vmem:[%s2693_s3 + $0x20] sm:$0xff]  }
 0x4d7   : > { %1001 = vperm.xlu1 %1754, %v2474_v14   ;;  %1069 = vperm.xlu0 %1756, %v1031_v61   ;;  %v1765_v61 = vld [vmem:[%s2693_s3 + $0x30] sm:$0xff]  }
 0x4db   : > { %1755 = vset.pattern.permute.xlu1 %v2759_v4  ;;  %1079 = vperm.xlu0 %1756, %v1033_v54   ;;  %v1767_v54 = vld [vmem:[%s2695_s5] sm:$0xff]  }
 0x4dc   : > { %1044 = vperm.xlu1 %1755, %v1026_v11   ;;  %v1760_v11 = vld [vmem:[%s2693_s3 + $0x8] sm:$0xff]   ;;  %1628 = vmatprep.mubr.bf16.mxu1 %v1767_v54 }
 0x4df   : > { %1089 = vperm.xlu0 %1756, %v1035_v12  }
 0x4e0   : > { %1049 = vperm.xlu1 %1755, %v1027_v55   ;;  %v1764_v55 = vld [vmem:[%s2693_s3 + $0x28] sm:$0xff]  }
 0x4e3   : > { %1099 = vperm.xlu0 %1756, %v1037_v8  }
 0x4e4   : > { %1059 = vperm.xlu1 %1755, %v1029_v34   ;;  %v1766_v34 = vld [vmem:[%s2693_s3 + $0x38] sm:$0xff]  }
 0x4e7   : > { %1109 = vperm.xlu0 %1756, %v1039_v3  }
 0x4e8   : > { %1064 = vperm.xlu1 %1755, %v1030_v46   ;;  %v1890_v46 = vmov 10  }
 0x4eb   : > { %1119 = vperm.xlu0 %1756, %v1041_v37  }
 0x4ec   : > { %1074 = vperm.xlu1 %1755, %v1032_v41  }
 0x4ef   : > { %1758 = vset.pattern.permute.xlu0 %v1890_v46 }
 0x4f0   : > { %1084 = vperm.xlu1 %1755, %v1034_v29   ;;  %1373 = vperm.xlu0 %1758, %v2463_v5  }
 0x4f4   : > { %1094 = vperm.xlu1 %1755, %v1036_v59  }
 0x4f8   : > { %1104 = vperm.xlu1 %1755, %v1038_v6  }
 0x4fc   : > { %1114 = vperm.xlu1 %1755, %v1040_v10  }
 0x500   : > { %1757 = vset.pattern.permute.xlu1 %v1890_v46 }
 0x501   : > { %1369 = vperm.xlu1 %1757, %v2418_v63  }
 0x505   : > { %1377 = vperm.xlu1 %1757, %v2426_v60  }
 0x509   : > { %1381 = vperm.xlu1 %1757, %v2474_v14  }
 0x53d   : > { %v942_v30 = vpop.xlane.xlu0 %941  ;;  %v945_v36 = vpop.xlane.xlu1 %944 }
 0x53e   : > { %v952_v38 = vmul.f32 0.03125, %v942_v30  ;;  %v953_v26 = vmul.f32 0.03125, %v945_v36 }
 0x540   : > { %v956_v57 = vadd.f32 1e-06, %v952_v38  ;;  %v957_v17 = vadd.f32 1e-06, %v953_v26 }
 0x541   : > { %v948_v31 = vpop.xlane.xlu0 %947  ;;  %v990_v56 = vpop.permute.xlu1 %989 }
 0x542   : > { %1771 = vrsqrt.f32 %v956_v57  ;;  %v954_v35 = vmul.f32 0.03125, %v948_v31 }
 0x543   : > { %1773 = vrsqrt.f32 %v957_v17 }
 0x544   : > { %v958_v49 = vadd.f32 1e-06, %v954_v35 }
 0x545   : > { %v951_v52 = vpop.xlane.xlu0 %950  ;;  %v994_v58 = vpop.permute.xlu1 %993 }
 0x546   : > { %1775 = vrsqrt.f32 %v958_v49  ;;  %v955_v44 = vmul.f32 0.03125, %v951_v52 }
 0x548   : > { %v959_v42 = vadd.f32 1e-06, %v955_v44 }
 0x549   : > { %v978_v32 = vpop.permute.xlu1 %977 }
 0x54a   : > { %1777 = vrsqrt.f32 %v959_v42 }
 0x54c   : > { %v1772_v16 = vpop.eup %1771 }
 0x54d   : > { %v1774_v50 = vpop.eup %1773  ;;  %v964_v39 = vmul.f32 %v1772_v16, %v2439_v0  ;;  %v982_v23 = vpop.permute.xlu1 %981 }
 0x54e   : > { %v974_v43 = vpop.permute.xlu0 %973  ;;  %v965_v47 = vmul.f32 %v1774_v50, %v2442_v24 }
 0x54f   : > { %v984_v13 = vmul.f32 %v970_v48, %v964_v39 }
 0x550   : > { %v1776_v7 = vpop.eup %1775  ;;  %v985_v45 = vmul.f32 %v974_v43, %v965_v47 }
 0x551   : > { %v1004_v15 = vadd.f32 %v990_v56, %v984_v13  ;;  %v966_v27 = vmul.f32 %v1776_v7, %v2450_v21  ;;  %v1761_v21 = vld [vmem:[%s2693_s3 + $0x10] sm:$0xff]  }
 0x552   : > { %v1005_v2 = vadd.f32 %v994_v58, %v985_v45  ;;  %v998_v18 = vpop.permute.xlu1 %997  ;;  %v1055_v29 = vpop.permute.xlu0 %1054 }
 0x553   : > { %v986_v25 = vmul.f32 %v978_v32, %v966_v27 }
 0x554   : > { %v1778_v40 = vpop.eup %1777  ;;  %v1008_v62 = vpack.c.bf16 %v1005_v2, %v1004_v15 }
 0x555   : > { %v967_v51 = vmul.f32 %v1778_v40, %v2456_v9  ;;  %v1006_v4 = vadd.f32 %v998_v18, %v986_v25  ;;  %v1762_v9 = vld [vmem:[%s2693_s3 + $0x18] sm:$0xff]  }
 0x556   : > { %1592 = vmatprep.subr.bf16.mxu0 %v1008_v62  ;;  %v1002_v0 = vpop.permute.xlu1 %1001  ;;  %v1070_v59 = vpop.permute.xlu0 %1069 }
 0x557   : > { %v987_v53 = vmul.f32 %v982_v23, %v967_v51  ;;  %1593 = vmatpush3.bf16.msra.mxu0 %v1008_v62 }
 0x559   : > { %v1007_v1 = vadd.f32 %v1002_v0, %v987_v53 }
 0x55a   : > { %v1080_v48 = vpop.permute.xlu0 %1079 }
 0x55b   : > { %v1009_v24 = vpack.c.bf16 %v1007_v1, %v1006_v4  ;;  %v1045_v12 = vpop.permute.xlu1 %1044 }
 0x55d   : > { %1594 = vmatprep.subr.bf16.mxu0 %v1009_v24 }
 0x55e   : > { %1595 = vmatpush3.bf16.msra.mxu0 %v1009_v24  ;;  %v1090_v31 = vpop.permute.xlu0 %1089 }
 0x55f   : > { %v1050_v41 = vpop.permute.xlu1 %1049 }
 0x561   : > { %1597 = vmatmul.mubr.msk.bf16.vlgmr.msra.gmra.mrb[0].mxu0 %vm1162_vm3, %v1760_v11 }
 0x562   : > { %1600 = vmatprep.mubr.msk.bf16.mxu0 %vm1162_vm3, %v1761_v21  ;;  %v1100_v45 = vpop.permute.xlu0 %1099 }
 0x563   : > { %v1060_v8 = vpop.permute.xlu1 %1059 }
 0x567   : > { %v1065_v3 = vpop.permute.xlu1 %1064 }
 0x569   : > { %1601 = vmatmul.mubr.msk.bf16.gmra.mrb[4].mxu0 %vm1162_vm3, %v1762_v9 }
 0x56a   : > { %1604 = vmatprep.mubr.msk.bf16.mxu0 %vm1162_vm3, %v1763_v22  ;;  %v1110_v22 = vpop.permute.xlu0 %1109 }
 0x56b   : > { %v1075_v6 = vpop.permute.xlu1 %1074 }
 0x56f   : > { %v1085_v14 = vpop.permute.xlu1 %1084 }
 0x571   : > { %1605 = vmatmul.mubr.msk.bf16.gmra.mrb[8].mxu0 %vm1162_vm3, %v1764_v55 }
 0x572   : > { %1608 = vmatprep.mubr.msk.bf16.mxu0 %vm1162_vm3, %v1765_v61 }
 0x573   : > { %v1095_v47 = vpop.permute.xlu1 %1094 }
 0x577   : > { %v1105_v1 = vpop.permute.xlu1 %1104 }
 0x579   : > { %1609 = vmatmul.mubr.msk.bf16.gmra.mrb[12].mxu0 %vm1162_vm3, %v1766_v34 }
 0x634   : > { %v1598_v37 = vpop.f32.mrb[0].mxu0 }
 0x635   : > { %v1221_v10 = vpop.f32.mrb[1].mxu0  ;;  %v1230_v36 = vadd.f32 %v1598_v37, %v1055_v29 }
 0x636   : > { %v1599_v30 = vpop.f32.mrb[2].mxu0  ;;  %v1222_v26 = vadd.f32 %v1221_v10, %v1045_v12 }
 0x637   : > { %v1233_v38 = vadd.f32 %v1599_v30, %v1060_v8  ;;  %v1224_v63 = vpop.f32.mrb[3].mxu0  ;;  %v1120_v30 = vpop.permute.xlu0 %1119 }
 0x638   : > { %v1225_v5 = vadd.f32 %v1224_v63, %v1050_v41 }
 0x639   : > { %v2591_v57 = vpack.c.bf16 %v1233_v38, %v1230_v36 }
 0x63a   : > { %v2593_v60 = vpack.c.bf16 %v1225_v5, %v1222_v26 }
 0x63b   : > { %v1293_v17 = vmul.bf16 %v2591_v57, %v2591_v57 }
 0x63c   : > { %v1292_v56 = vmul.bf16 %v2593_v60, %v2593_v60  ;;  %v1602_v35 = vpop.f32.mrb[4].mxu0 }
 0x63d   : > { %v1301_v49 = vmul.bf16 %v1293_v17, %v2591_v57  ;;  %v1237_v52 = vpop.f32.mrb[5].mxu0  ;;  %v1246_v32 = vadd.f32 %v1602_v35, %v1075_v6  ;;  %v1115_v6 = vpop.permute.xlu1 %1114 }
 0x63e   : > { %v1603_v58 = vpop.f32.mrb[6].mxu0  ;;  %v1300_v44 = vmul.bf16 %v1292_v56, %v2593_v60  ;;  %v1238_v39 = vadd.f32 %v1237_v52, %v1065_v3 }
 0x63f   : > { %v1309_v42 = vmul.bf16 1027030327, %v1301_v49  ;;  %v1249_v16 = vadd.f32 %v1603_v58, %v1080_v48  ;;  %v1240_v50 = vpop.f32.mrb[7].mxu0 }
 0x640   : > { %v1241_v23 = vadd.f32 %v1240_v50, %v1070_v59  ;;  %v1308_v43 = vmul.bf16 1027030327, %v1300_v44 }
 0x641   : > { %v2601_v13 = vpack.c.bf16 %v1249_v16, %v1246_v32  ;;  %v1317_v7 = vadd.bf16 %v1309_v42, %v2591_v57 }
 0x642   : > { %v2604_v15 = vpack.c.bf16 %v1241_v23, %v1238_v39  ;;  %v1316_v27 = vadd.bf16 %v1308_v43, %v2593_v60 }
 0x643   : > { %v1295_v2 = vmul.bf16 %v2601_v13, %v2601_v13  ;;  %v1325_v18 = vmul.bf16 1061961548, %v1317_v7 }
 0x644   : > { %v1294_v40 = vmul.bf16 %v2604_v15, %v2604_v15  ;;  %v1606_v62 = vpop.f32.mrb[8].mxu0  ;;  %v1324_v25 = vmul.bf16 1061961548, %v1316_v27 }
 0x645   : > { %v1303_v51 = vmul.bf16 %v1295_v2, %v2601_v13  ;;  %v1253_v53 = vpop.f32.mrb[9].mxu0  ;;  %1779 = vtanh.bf16 %v1325_v18  ;;  %v1262_v11 = vadd.f32 %v1606_v62, %v1095_v47 }
 0x646   : > { %v1302_v0 = vmul.bf16 %v1294_v40, %v2604_v15  ;;  %v1607_v4 = vpop.f32.mrb[10].mxu0  ;;  %1781 = vtanh.bf16 %v1324_v25  ;;  %v1254_v61 = vadd.f32 %v1253_v53, %v1085_v14 }
 0x647   : > { %v1311_v24 = vmul.bf16 1027030327, %v1303_v51  ;;  %v1265_v21 = vadd.f32 %v1607_v4, %v1100_v45  ;;  %v1256_v9 = vpop.f32.mrb[11].mxu0 }
 0x648   : > { %v1310_v55 = vmul.bf16 1027030327, %v1302_v0  ;;  %v1257_v34 = vadd.f32 %v1256_v9, %v1090_v31 }
 0x649   : > { %v2613_v54 = vpack.c.bf16 %v1265_v21, %v1262_v11  ;;  %v1319_v46 = vadd.bf16 %v1311_v24, %v2601_v13 }
 0x64a   : > { %v2616_v12 = vpack.c.bf16 %v1257_v34, %v1254_v61  ;;  %v1318_v41 = vadd.bf16 %v1310_v55, %v2604_v15 }
 0x64b   : > { %v1297_v8 = vmul.bf16 %v2613_v54, %v2613_v54  ;;  %v1327_v29 = vmul.bf16 1061961548, %v1319_v46 }
 0x64c   : > { %v1296_v3 = vmul.bf16 %v2616_v12, %v2616_v12  ;;  %v1610_v59 = vpop.f32.mrb[12].mxu0  ;;  %v1326_v37 = vmul.bf16 1061961548, %v1318_v41 }
 0x64d   : > { %v1305_v10 = vmul.bf16 %v1297_v8, %v2613_v54  ;;  %v1269_v48 = vpop.f32.mrb[13].mxu0  ;;  %1783 = vtanh.bf16 %v1327_v29  ;;  %v1278_v26 = vadd.f32 %v1610_v59, %v1115_v6 }
 0x64e   : > { %v1304_v36 = vmul.bf16 %v1296_v3, %v2616_v12  ;;  %v1611_v38 = vpop.f32.mrb[14].mxu0  ;;  %1785 = vtanh.bf16 %v1326_v37  ;;  %v1270_v56 = vadd.f32 %v1269_v48, %v1105_v1 }
 0x64f   : > { %v1313_v63 = vmul.bf16 1027030327, %v1305_v10  ;;  %v1281_v5 = vadd.f32 %v1611_v38, %v1120_v30  ;;  %v1272_v14 = vpop.f32.mrb[15].mxu0 }
 0x650   : > { %v1780_v17 = vpop.eup %1779  ;;  %v1312_v31 = vmul.bf16 1027030327, %v1304_v36  ;;  %v1273_v35 = vadd.f32 %v1272_v14, %v1110_v22 }
 0x651   : > { %v1782_v49 = vpop.eup %1781  ;;  %v1291_v52 = vpack.c.bf16 %v1281_v5, %v1278_v26  ;;  %v1341_v58 = vadd.bf16 1065369472, %v1780_v17  ;;  %v1321_v44 = vadd.bf16 %v1313_v63, %v2613_v54  ;;  %v1374_v26 = vpop.permute.xlu0 %1373 }
 0x652   : > { %v1290_v42 = vpack.c.bf16 %v1273_v35, %v1270_v56  ;;  %v1340_v32 = vadd.bf16 1065369472, %v1782_v49  ;;  %v1320_v16 = vadd.bf16 %v1312_v31, %v2616_v12 }
 0x653   : > { %v1299_v50 = vmul.bf16 %v1291_v52, %v1291_v52  ;;  %v1329_v39 = vmul.bf16 1061961548, %v1321_v44  ;;  %v1349_v47 = vmul.bf16 1056980736, %v1341_v58 }
 0x654   : > { %v1298_v23 = vmul.bf16 %v1290_v42, %v1290_v42  ;;  %v1348_v43 = vmul.bf16 1056980736, %v1340_v32  ;;  %v1328_v7 = vmul.bf16 1061961548, %v1320_v16 }
 0x655   : > { %v1307_v45 = vmul.bf16 %v1299_v50, %v1291_v52  ;;  %1787 = vtanh.bf16 %v1329_v39  ;;  %v1357_v25 = vmul.bf16 %v1349_v47, %v2591_v57 }
 0x656   : > { %v1306_v27 = vmul.bf16 %v1298_v23, %v1290_v42  ;;  %v1356_v2 = vmul.bf16 %v1348_v43, %v2593_v60  ;;  %1789 = vtanh.bf16 %v1328_v7 }
 0x657   : > { %v1315_v18 = vmul.bf16 1027030327, %v1307_v45 }
 0x658   : > { %v1784_v40 = vpop.eup %1783  ;;  %v1314_v62 = vmul.bf16 1027030327, %v1306_v27  ;;  %1612 = vmatprep.subr.bf16.mxu1 %v1356_v2 }
 0x659   : > { %v1786_v51 = vpop.eup %1785  ;;  %1613 = vmatpush3.bf16.msra.mxu1 %v1356_v2  ;;  %v1343_v53 = vadd.bf16 1065369472, %v1784_v40  ;;  %v1323_v0 = vadd.bf16 %v1315_v18, %v1291_v52 }
 0x65a   : > { %1614 = vmatprep.subr.bf16.mxu1 %v1357_v25  ;;  %v1342_v4 = vadd.bf16 1065369472, %v1786_v51  ;;  %v1322_v1 = vadd.bf16 %v1314_v62, %v1290_v42 }
 0x65b   : > { %v1331_v24 = vmul.bf16 1061961548, %v1323_v0  ;;  %v1351_v21 = vmul.bf16 1056980736, %v1343_v53 }
 0x65c   : > { %v1350_v11 = vmul.bf16 1056980736, %v1342_v4  ;;  %v1330_v9 = vmul.bf16 1061961548, %v1322_v1 }
 0x65d   : > { %1615 = vmatpush3.bf16.msra.mxu1 %v1357_v25  ;;  %1791 = vtanh.bf16 %v1331_v24  ;;  %v1359_v57 = vmul.bf16 %v1351_v21, %v2601_v13 }
 0x65e   : > { %v1358_v60 = vmul.bf16 %v1350_v11, %v2604_v15  ;;  %1793 = vtanh.bf16 %v1330_v9 }
 0x660   : > { %v1788_v22 = vpop.eup %1787  ;;  %1616 = vmatprep.subr.bf16.mxu1 %v1358_v60 }
 0x661   : > { %v1790_v55 = vpop.eup %1789  ;;  %1617 = vmatpush3.bf16.msra.mxu1 %v1358_v60  ;;  %v1345_v61 = vadd.bf16 1065369472, %v1788_v22 }
 0x662   : > { %1618 = vmatprep.subr.bf16.mxu1 %v1359_v57  ;;  %v1344_v34 = vadd.bf16 1065369472, %v1790_v55 }
 0x663   : > { %v1353_v41 = vmul.bf16 1056980736, %v1345_v61 }
 0x664   : > { %v1352_v46 = vmul.bf16 1056980736, %v1344_v34 }
 0x665   : > { %1619 = vmatpush3.bf16.msra.mxu1 %v1359_v57  ;;  %v1361_v3 = vmul.bf16 %v1353_v41, %v2613_v54  ;;  %v1370_v54 = vpop.permute.xlu1 %1369 }
 0x666   : > { %v1360_v8 = vmul.bf16 %v1352_v46, %v2616_v12  ;;  %v1768_v12 = vld [vmem:[%s2695_s5 + $0x8] sm:$0xff]  }
 0x668   : > { %v1792_v29 = vpop.eup %1791  ;;  %1620 = vmatprep.subr.bf16.mxu1 %v1360_v8 }
 0x669   : > { %v1794_v15 = vpop.eup %1793  ;;  %1621 = vmatpush3.bf16.msra.mxu1 %v1360_v8  ;;  %v1347_v59 = vadd.bf16 1065369472, %v1792_v29  ;;  %v1378_v30 = vpop.permute.xlu1 %1377 }
 0x66a   : > { %1622 = vmatprep.subr.bf16.mxu1 %v1361_v3  ;;  %v1346_v13 = vadd.bf16 1065369472, %v1794_v15 }
 0x66b   : > { %v1355_v6 = vmul.bf16 1056980736, %v1347_v59 }
 0x66c   : > { %v1354_v37 = vmul.bf16 1056980736, %v1346_v13 }
 0x66d   : > { %1623 = vmatpush3.bf16.msra.mxu1 %v1361_v3  ;;  %v1363_v48 = vmul.bf16 %v1355_v6, %v1291_v52  ;;  %v1382_v5 = vpop.permute.xlu1 %1381 }
 0x66e   : > { %v1362_v10 = vmul.bf16 %v1354_v37, %v1290_v42 }
 0x670   : > { %1624 = vmatprep.subr.bf16.mxu1 %v1362_v10 }
 0x671   : > { %1625 = vmatpush3.bf16.msra.mxu1 %v1362_v10 }
 0x672   : > { %1626 = vmatprep.subr.bf16.mxu1 %v1363_v48 }
 0x675   : > { %1627 = vmatpush3.bf16.msra.mxu1 %v1363_v48 }
 0x678   : > { %1629 = vmatmul.mubr.bf16.vlgmr.msra.gmra.mrb[0].mxu1 %v1768_v12 }
 0x74b   : > { %v1630_v36 = vpop.f32.mrb[0].mxu1 }
 0x74c   : > { %v1439_v38 = vadd.f32 %v1630_v36, %v1378_v30  ;;  %v1430_v63 = vpop.f32.mrb[1].mxu1 }
 0x74d   : > { %v1431_v14 = vadd.f32 %v1430_v63, %v1370_v54  ;;  %v1631_v17 = vpop.f32.mrb[2].mxu1 }
 0x74e   : > { %v1447_v31 = vadd.f32 %v1439_v38, %v2399_v20  ;;  %v1442_v56 = vadd.f32 %v1631_v17, %v1382_v5  ;;  %v1433_v35 = vpop.f32.mrb[3].mxu1 }
 0x74f   : > { %v1445_v49 = vadd.f32 %v1431_v14, %v2386_v28  ;;  %v1434_v52 = vadd.f32 %v1433_v35, %v1374_v26 }
 0x750   : > { %1451 = vst [vmem:[%s255_s19 + $0x10] sm:$0xff] %v1447_v31  ;;  %v1448_v58 = vadd.f32 %v1442_v56, %v2403_v19 }
 0x751   : > { %1449 = vst [vmem:[%s255_s19] sm:$0xff] %v1445_v49  ;;  %v1446_v44 = vadd.f32 %v1434_v52, %v2393_v33 }
 0x752   : > { %1452 = vst [vmem:[%s255_s19 + $0x18] sm:$0xff] %v1448_v58 }
 0x753   : > { %1450 = vst [vmem:[%s255_s19 + $0x8] sm:$0xff] %v1446_v44 }
 0x754   : > { %1812 = shalt.err (!%p1809_p3)
}
 0x755   : > { %s1813_s14 = scalar_lea.hbm %s2647_s9, 512  ;;  %s1817_s17 = scalar_lea.hbm %s2696_s6, 1024 }
 0x756   : > { %p1814_p4 = scmp.ne.s32.totalorder %s2647_s9, %s1813_s14  ;;  %p1818_p9 = scmp.lt.u32.totalorder %s2647_s9, %s2696_s6 }
 0x757   : > { %p1819_p10 = scmp.lt.u32.totalorder %s1817_s17, %s1813_s14  ;;  %p1821_p12 = scmp.lt.u32.totalorder %s1813_s14, %s2647_s9 }
 0x758   : > { %p1815_p7 = pnand %p1814_p4, %p1967_p5 }
 0x759   : > { %p1820_p11 = por %p1819_p10, %p1818_p9 }
 0x75a   : > { %p1816_p8 = pneg %p1815_p7 }
 0x75b   : > { %p1822_p13 = por %p1821_p12, %p1820_p11 }
 0x75d   : > { %p1823_p0 = pnand %p1822_p13, %p1816_p8 }
 0x75f   : > { %1826 = shalt.err (!%p1823_p0)
}
 0x760   : > { %s1892_s26 = smov 128   ;;  %s1893_s28 = smov 8  }
 0x761   : > { %1632 = dma.vmem_to_hbm [thread:$0]  (%p1967_p5), %s2640_s20, 512, %s2647_s9, %s2649_s25, %s1892_s26, %s1892_s26, %s1893_s28  }
 0x762 PF: > { %p1638_p1 = scmp.ge.s32.totalorder %s1861_s24, 2  ;;  %s1482_s29 = sand.u32 1, %s1849_s21  }
 0x763   : > { %s1483_s10 = scalar_lea.sflag [#allocation3], %s1482_s29 }
 0x764   : > { %p1635_p2 = pnand %p1638_p1, %p1971_p6 }
 0x766   : > { %1844 = dma.done.wait (!%p1635_p2), %s1483_s10, 512  }
 0x767   : > { %1846 = vsyncadd (!%p1635_p2), %s1483_s10, 4294966784  ;;  %p16_p3 = scmp.ge.s32.totalorder %s1954_s27, 4   ;;  %s2760_s21 = smov %s1853_s22 }
 0x768   : > { %s2761_s22 = smov %s1857_s23  ;;  %s2762_s23 = smov %s1965_s30 }
 0x769   : > { %s2763_s24 = smov %s1954_s27  ;;  %18 = sbr.rel (!%p16_p3) target bundleno = 3 (0x3), region = 82 }
 0x770   :  { %1488 = vsyncpa [#allocation3], 1 }
 0x771   :  { %1490 = vsyncpa [#allocation3 + $0x1], 1 }

// kernel: tpu_custom_call.1
= control target key start
LH: loop header
LB: loop body
LE: loop exit
PB: predicated region body
PF: predicated region fallthrough
CT: control target
= control target key end

     0   :  { %11 = vsyncpa [#allocation3], 0  ;;  %s2690_s0 = inlined_call_operand.vmem [shape: f32[2,32,128], index: 0, kind: input, shape index: {}]   ;;  %s2691_s1 = inlined_call_operand.vmem [shape: f32[2,1,128], index: 1, kind: input, shape index: {}]   ;;  %s2692_s2 = inlined_call_operand.vmem [shape: f32[32,37], index: 2, kind: input, shape index: {}]   ;;  %s2693_s3 = inlined_call_operand.vmem [shape: bf16[128,32], index: 3, kind: input, shape index: {}]   ;;  %s2694_s4 = inlined_call_operand.vmem [shape: f32[128,1], index: 4, kind: input, shape index: {}]   ;;  %s2695_s5 = inlined_call_operand.vmem [shape: bf16[32,128], index: 5, kind: input, shape index: {}]   ;;  %s2696_s6 = inlined_call_operand.hbm [shape: f32[2,32,128], index: 6, kind: output, shape index: {}]  }
   0x1   :  { %13 = vsyncpa [#allocation3 + $0x1], 0  ;;  %s1929_s21 = smov 0   ;;  %s1931_s22 = smov 0  }
   0x2   :  { %s1933_s23 = smov 0   ;;  %s1935_s24 = smov 0  }
   0x3 LB: > { %s1950_s25 = sadd.s32 4294967295, %s1861_s24   ;;  %s1538_s26 = sadd.s32 4294967294, %s1861_s24   ;;  %s1861_s24 = sphi %s1935_s24, %s2763_s24   ;;  %s1857_s23 = sphi %s1933_s23, %s2762_s23   ;;  %s1853_s22 = sphi %s1931_s22, %s2761_s22   ;;  %s1849_s21 = sphi %s1929_s21, %s2760_s21  }
   0x4   : > { %s1954_s27 = sadd.s32 1, %s1861_s24   ;;  %s162_s28 = sadd.s32 1, %s1857_s23 }
   0x5   : > { %s159_s29 = ssub.s32 %s1861_s24, %s1954_s27  ;;  %p172_p0 = scmp.ne.s32.totalorder %s1857_s23, %s1853_s22 }
   0x6   : > { %p160_p1 = scmp.eq.s32.totalorder %s159_s29, 0  ;;  %p173_p2 = scmp.eq.s32.totalorder %s1950_s25, 1 }
   0x7   : > { %p178_p3 = scmp.ne.s32.totalorder %s1853_s22, %s1849_s21  ;;  %p179_p4 = scmp.eq.s32.totalorder %s1538_s26, 1 }
   0x8   : > { %s1965_s30 = scalar_select %p160_p1, %s1857_s23, %s162_s28  }
   0x9   : > { %p1967_p5 = por %p173_p2, %p172_p0  ;;  %p1971_p6 = por %p179_p4, %p178_p3 }
   0xa   : > { %p1541_p7 = scmp.ge.s32.totalorder %s1861_s24, 1  ;;  %p223_p8 = scmp.lt.s32.totalorder %s1861_s24, 3 }
   0xc   : > { %p224_p9 = pnand %p1541_p7, %p223_p8 }
   0xe   : > { %227 = sbr.rel (%p224_p9) target bundleno = 1890 (0x762), region = 44 }
  0x15   : > { %v1980_v0 = vld [vmem:[%s2692_s2 + $0x10] sm:$0xff]  ;;  %v1985_v1 = vld [vmem:[%s2692_s2] sm:$0xff]  ;;  %v2697_v2 = vmov 0   ;;  %v1994_v3 = vld [vmem:[%s2692_s2 + $0x8] sm:$0xff]  ;;  %v1864_v4 = vmov 1   ;;  %p256_p10 = scmp.lt.s32.totalorder %s1950_s25, 1  ;;  %v278_v46 = vlaneseq }
  0x16   : > { %2715 = vst [vmem:[#allocation5_spill] sm:$0xff] %v1980_v0  ;;  %2716 = vst [vmem:[#allocation6_spill] sm:$0xff] %v1985_v1  ;;  %1702 = vset.pattern.permute.xlu1 %v2697_v2  ;;  %1701 = vset.pattern.permute.xlu0 %v2697_v2  ;;  %v2002_v5 = vld [vmem:[%s2692_s2 + $0x18] sm:$0xff]  ;;  %s1865_s28 = smov 127   ;;  %v1866_v6 = vmov 17   ;;  %v1867_v14 = vmov 14  }
  0x17   : > { %330 = vperm.xlu1 %1702, %v1980_v0   ;;  %320 = vperm.xlu0 %1701, %v1985_v1   ;;  %2717 = vst [vmem:[#allocation7_spill] sm:$0xff] %v1994_v3  ;;  %2718 = vst [vmem:[#allocation8_spill] sm:$0xff] %v2002_v5  ;;  %s2007_s17 = scalar_select %p256_p10, %s1950_s25, 1  ;;  %v1868_v15 = vmov 15   ;;  %v1869_v19 = vmov 16   ;;  %v1870_v21 = vmov 19  }
  0x18   : > { %v1871_v23 = vmov 18   ;;  %v1872_v39 = vmov 12   ;;  %v279_v48 = vand.u32 127, %v278_v46  ;;  %v1873_v55 = vmov 0.0   ;;  %s1874_s29 = smov 3   ;;  %s1875_s9 = smov 2  }
  0x19   : > { %s1570_s18 = sshll.u32 %s2007_s17, 5  ;;  %s1877_s10 = smov 1   ;;  %vm832_vm1 = vcmask 302248   ;;  %vm866_vm2 = vcmask 130048   ;;  %vm1162_vm3 = vcmask 261120  }
  0x1a   : > { %s260_s26 = scalar_lea.vmem %s2690_s0, %s1570_s18  ;;  %vm280_vm0 = vcmp.lt.s32.totalorder %v279_v48, 16  ;;  %s1881_s11 = smov 126  }
  0x1b   : > { %1703 = vset.pattern.permute.xlu1 %v1864_v4  ;;  %325 = vperm.xlu0 %1701, %v1994_v3   ;;  %v2020_v7 = vld [vmem:[%s260_s26] sm:$0xff]  ;;  %v2022_v8 = vld [vmem:[%s260_s26 + $0x8] sm:$0xff]  ;;  %v2030_v10 = vld [vmem:[%s260_s26 + $0x10] sm:$0xff]  ;;  %v2063_v56 = vsel %vm280_vm0, 1.0, %v1873_v55  ;;  %s1883_s12 = smov 125   ;;  %s263_s15 = scalar_lea.vmem %s2691_s1, %s2007_s17 }
  0x1c   : > { %343 = vperm.xlu1 %1703, %v1985_v1   ;;  %2719 = vst [vmem:[#allocation9_spill] sm:$0xff] %v2020_v7  ;;  %2720 = vst [vmem:[#allocation10_spill] sm:$0xff] %v2022_v8  ;;  %v283_v9 = vadd.f32 %v2022_v8, %v2020_v7  ;;  %v2035_v12 = vld [vmem:[%s260_s26 + $0x18] sm:$0xff]  ;;  %s1887_s18 = smov 107   ;;  %s253_s17 = sand.u32 1, %s1853_s22  }
  0x1d   : > { %2721 = vst [vmem:[#allocation11_spill] sm:$0xff] %v2030_v10  ;;  %2722 = vst [vmem:[#allocation12_spill] sm:$0xff] %v2035_v12  ;;  %s1571_s26 = sshll.u32 %s1950_s25, 9  ;;  %s2649_s25 = scalar_lea.sflag [#allocation3], %s253_s17 }
  0x1e   : > { %v284_v11 = vadd.f32 %v283_v9, %v2030_v10  ;;  %2723 = vst [vmem:[#allocation13_spill] sm:$0xff] %v2063_v56 }
  0x1f   : > { %1704 = vset.pattern.permute.xlu0 %v1864_v4 }
  0x20   : > { %1705 = vset.pattern.permute.xlu1 %v2697_v2  ;;  %347 = vperm.xlu0 %1704, %v1994_v3   ;;  %v285_v13 = vadd.f32 %v284_v11, %v2035_v12 }
  0x21   : > { %335 = vperm.xlu1 %1705, %v2002_v5  }
  0x22   : > { %v286_v16 = vrot.slane %v285_v13, 4 }
  0x24   : > { %355 = vperm.xlu0 %1704, %v2002_v5   ;;  %v287_v17 = vadd.f32 %v286_v16, %v285_v13 }
  0x25   : > { %1706 = vset.pattern.permute.xlu1 %v1864_v4 }
  0x26   : > { %351 = vperm.xlu1 %1706, %v1980_v0   ;;  %v288_v18 = vrot.slane %v287_v17, 2 }
  0x28   : > { %742 = vrot.lane.b32.xlu0 %v1985_v1, %s1865_s28  ;;  %v289_v20 = vadd.f32 %v288_v18, %v287_v17 }
  0x29   : > { %1708 = vset.pattern.permute.xlu0 %v1866_v6 }
  0x2a   : > { %744 = vrot.lane.b32.xlu1 %v1994_v3, %s1865_s28  ;;  %v290_v22 = vrot.slane %v289_v20, 1 }
  0x2b   : > { %1707 = vset.pattern.permute.xlu1 %v1866_v6 }
  0x2c   : > { %748 = vrot.lane.b32.xlu0 %v2002_v5, %s1865_s28  ;;  %v291_v24 = vadd.f32 %v290_v22, %v289_v20  ;;  %v1876_v20 = vmov 11   ;;  %v1878_v22 = vmov 13  }
  0x2e   : > { %746 = vrot.lane.b32.xlu1 %v1980_v0, %s1865_s28  ;;  %v293_v25 = vmul.f32 0.03125, %v291_v24 }
  0x30   : > { %371 = vperm.xlu0 %1708, %v1994_v3   ;;  %v294_v26 = vsub.f32 %v2020_v7, %v293_v25  ;;  %v295_v27 = vsub.f32 %v2022_v8, %v293_v25  ;;  %v296_v28 = vsub.f32 %v2030_v10, %v293_v25  ;;  %v297_v31 = vsub.f32 %v2035_v12, %v293_v25 }
  0x32   : > { %367 = vperm.xlu1 %1707, %v1985_v1   ;;  %v298_v29 = vmul.f32 %v294_v26, %v294_v26  ;;  %v299_v30 = vmul.f32 %v295_v27, %v295_v27  ;;  %v300_v32 = vmul.f32 %v296_v28, %v296_v28  ;;  %v301_v34 = vmul.f32 %v297_v31, %v297_v31 }
  0x34   : > { %375 = vperm.xlu0 %1708, %v1980_v0   ;;  %v302_v33 = vadd.f32 %v299_v30, %v298_v29  ;;  %v1880_v29 = vmov 2  }
  0x36   : > { %1709 = vset.pattern.permute.xlu1 %v1867_v14  ;;  %v303_v35 = vadd.f32 %v302_v33, %v300_v32  ;;  %v1882_v33 = vmov 9  }
  0x37   : > { %415 = vperm.xlu1 %1709, %v1985_v1  }
  0x38   : > { %1710 = vset.pattern.permute.xlu0 %v1868_v15  ;;  %v304_v36 = vadd.f32 %v303_v35, %v301_v34 }
  0x39   : > { %447 = vperm.xlu0 %1710, %v1985_v1  }
  0x3a   : > { %v305_v37 = vrot.slane %v304_v36, 4 }
  0x3b   : > { %419 = vperm.xlu1 %1709, %v1994_v3  }
  0x3c   : > { %v306_v38 = vadd.f32 %v305_v37, %v304_v36 }
  0x3d   : > { %1713 = vset.pattern.permute.xlu0 %v1867_v14 }
  0x3e   : > { %427 = vperm.xlu0 %1713, %v2002_v5   ;;  %v307_v40 = vrot.slane %v306_v38, 2 }
  0x3f   : > { %423 = vperm.xlu1 %1709, %v1980_v0  }
  0x40   : > { %v308_v41 = vadd.f32 %v307_v40, %v306_v38  ;;  %v1884_v40 = vmov 3  }
  0x42   : > { %1716 = vset.pattern.permute.xlu0 %v1869_v19  ;;  %v309_v42 = vrot.slane %v308_v41, 1 }
  0x43   : > { %1711 = vset.pattern.permute.xlu1 %v1868_v15  ;;  %483 = vperm.xlu0 %1716, %v1994_v3  }
  0x44   : > { %451 = vperm.xlu1 %1711, %v1994_v3   ;;  %v310_v43 = vadd.f32 %v309_v42, %v308_v41 }
  0x46   : > { %v311_v44 = vmul.f32 0.03125, %v310_v43  ;;  %v1885_v43 = vmov 8  }
  0x47   : > { %1722 = vset.pattern.permute.xlu0 %v1870_v21 }
  0x48   : > { %1712 = vset.pattern.permute.xlu1 %v1866_v6  ;;  %595 = vperm.xlu0 %1722, %v1994_v3   ;;  %v312_v45 = vadd.f32 1e-06, %v311_v44 }
  0x49   : > { %379 = vperm.xlu1 %1712, %v2002_v5  }
  0x4a   : > { %1769 = vrsqrt.f32 %v312_v45 }
  0x4c   : > { %1723 = vset.pattern.permute.xlu0 %v1871_v23 }
  0x4d   : > { %1714 = vset.pattern.permute.xlu1 %v1868_v15  ;;  %535 = vperm.xlu0 %1723, %v1985_v1  }
  0x4e   : > { %455 = vperm.xlu1 %1714, %v1980_v0  }
  0x52   : > { %1715 = vset.pattern.permute.xlu1 %v1869_v19 }
  0x53   : > { %479 = vperm.xlu1 %1715, %v1985_v1  }
  0x54   : > { %v1770_v47 = vpop.eup %1769 }
  0x55   : > { %v314_v50 = vmul.f32 %v1770_v47, %v294_v26  ;;  %v315_v54 = vmul.f32 %v1770_v47, %v295_v27  ;;  %v317_v59 = vmul.f32 %v1770_v47, %v297_v31  ;;  %v316_v63 = vmul.f32 %v1770_v47, %v296_v28 }
  0x57   : > { %1717 = vset.pattern.permute.xlu1 %v1868_v15 }
  0x58   : > { %459 = vperm.xlu1 %1717, %v2002_v5  }
  0x5c   : > { %1718 = vset.pattern.permute.xlu1 %v1869_v19 }
  0x5d   : > { %487 = vperm.xlu1 %1718, %v1980_v0  }
  0x61   : > { %1719 = vset.pattern.permute.xlu1 %v1871_v23  ;;  %v1879_v23 = vmov 20  }
  0x62   : > { %539 = vperm.xlu1 %1719, %v1994_v3  }
  0x66   : > { %1720 = vset.pattern.permute.xlu1 %v1869_v19 }
  0x67   : > { %491 = vperm.xlu1 %1720, %v2002_v5  }
  0x6b   : > { %1721 = vset.pattern.permute.xlu1 %v1870_v21 }
  0x6c   : > { %591 = vperm.xlu1 %1721, %v1985_v1  }
  0x70   : > { %1724 = vset.pattern.permute.xlu1 %v1872_v39 }
  0x96   : > { %v321_v49 = vpop.permute.xlu0 %320  ;;  %v331_v51 = vpop.permute.xlu1 %330 }
  0x97   : > { %v338_v52 = vmul.f32 %v321_v49, %v314_v50  ;;  %v340_v14 = vmul.f32 %v331_v51, %v316_v63 }
  0x9a   : > { %v326_v53 = vpop.permute.xlu0 %325 }
  0x9b   : > { %v344_v57 = vpop.permute.xlu1 %343  ;;  %v339_v60 = vmul.f32 %v326_v53, %v315_v54 }
  0x9c   : > { %v358_v58 = vadd.f32 %v344_v57, %v338_v52 }
  0x9e   : > { %v2066_v61 = vmul.f32 %v2063_v56, %v358_v58 }
  0x9f   : > { %v348_v62 = vpop.permute.xlu0 %347 }
  0xa0   : > { %v359_v4 = vadd.f32 %v348_v62, %v339_v60  ;;  %726 = vadd.xlane.f32.xlu1 %v2066_v61  ;;  %v336_v6 = vpop.permute.xlu1 %335 }
  0xa1   : > { %v341_v9 = vmul.f32 %v336_v6, %v317_v59 }
  0xa2   : > { %v2070_v11 = vmul.f32 %v2063_v56, %v359_v4 }
  0xa3   : > { %v356_v13 = vpop.permute.xlu0 %355 }
  0xa4   : > { %2724 = vst [vmem:[#allocation14_spill] sm:$0xff] %v2070_v11  ;;  %v361_v15 = vadd.f32 %v356_v13, %v341_v9  ;;  %728 = vadd.xlane.f32.xlu0 %v2070_v11 }
  0xa5   : > { %v352_v16 = vpop.permute.xlu1 %351 }
  0xa6   : > { %v2074_v17 = vmul.f32 %v2063_v56, %v361_v15  ;;  %v360_v18 = vadd.f32 %v352_v16, %v340_v14 }
  0xa7   : > { %v2141_v31 = vpop.permute.xlu0 %742 }
  0xa8   : > { %v2077_v19 = vmul.f32 %v2063_v56, %v360_v18  ;;  %732 = vadd.xlane.f32.xlu1 %v2074_v17 }
  0xa9   : > { %v2101_v24 = vpop.permute.xlu1 %744 }
  0xaa   : > { %730 = vadd.xlane.f32.xlu0 %v2077_v19 }
  0xab   : > { %v2150_v34 = vpop.permute.xlu0 %748 }
  0xad   : > { %v2106_v25 = vpop.permute.xlu1 %746 }
  0xaf   : > { %v372_v36 = vpop.permute.xlu0 %371 }
  0xb0   : > { %v383_v6 = vmul.f32 %v372_v36, %v2070_v11 }
  0xb1   : > { %v2113_v26 = vpop.permute.xlu1 %367 }
  0xb3   : > { %v2163_v38 = vpop.permute.xlu0 %375 }
  0xb6   : > { %v2117_v27 = vpop.permute.xlu1 %415 }
  0xb8   : > { %v2169_v41 = vpop.permute.xlu0 %447 }
  0xb9   : > { %406 = vrot.lane.b32.xlu1 %v2066_v61, %s1874_s29 }
  0xba   : > { %v2124_v28 = vpop.permute.xlu1 %419 }
  0xbd   : > { %410 = vrot.lane.b32.xlu1 %v2077_v19, %s1874_s29  ;;  %v2181_v44 = vpop.permute.xlu0 %427 }
  0xbe   : > { %v2129_v30 = vpop.permute.xlu1 %423 }
  0xc0   : > { %408 = vrot.lane.b32.xlu0 %v2070_v11, %s1874_s29 }
  0xc1   : > { %438 = vrot.lane.b32.xlu1 %v2066_v61, %s1875_s9 }
  0xc2   : > { %v2187_v46 = vpop.permute.xlu0 %483 }
  0xc4   : > { %543 = vperm.xlu0 %1723, %v1980_v0  }
  0xc5   : > { %387 = vperm.xlu1 %1724, %v1985_v1  }
  0xc7   : > { %v2194_v48 = vpop.permute.xlu0 %595 }
  0xc8   : > { %440 = vrot.lane.b32.xlu0 %v2070_v11, %s1875_s9 }
  0xc9   : > { %1725 = vset.pattern.permute.xlu1 %v1876_v20 }
  0xca   : > { %503 = vperm.xlu1 %1725, %v1985_v1  }
  0xcc   : > { %547 = vperm.xlu0 %1723, %v2002_v5   ;;  %v2200_v50 = vpop.permute.xlu0 %535 }
  0xce   : > { %507 = vperm.xlu1 %1725, %v1994_v3  }
  0xd0   : > { %470 = vrot.lane.b32.xlu0 %v2066_v61, %s1877_s10 }
  0xd1   : > { %1730 = vset.pattern.permute.xlu0 %v1878_v22 }
  0xd2   : > { %1726 = vset.pattern.permute.xlu1 %v1870_v21 }
  0xd3   : > { %599 = vperm.xlu1 %1726, %v1980_v0  }
  0xd4   : > { %563 = vperm.xlu0 %1730, %v1994_v3  }
  0xd7   : > { %1727 = vset.pattern.permute.xlu1 %v1879_v23 }
  0xd8   : > { %1731 = vset.pattern.permute.xlu0 %v1872_v39  ;;  %623 = vperm.xlu1 %1727, %v1985_v1  }
  0xd9   : > { %391 = vperm.xlu0 %1731, %v1994_v3  }
  0xdc   : > { %412 = vrot.lane.b32.xlu1 %v2074_v17, %s1874_s29 }
  0xdd   : > { %395 = vperm.xlu0 %1731, %v1980_v0   ;;  %1728 = vset.pattern.permute.xlu1 %v1876_v20 }
  0xe0   : > { %442 = vrot.lane.b32.xlu1 %v2077_v19, %s1875_s9 }
  0xe1   : > { %444 = vrot.lane.b32.xlu0 %v2074_v17, %s1875_s9  ;;  %s2647_s9 = scalar_lea.hbm %s2696_s6, %s1571_s26 }
  0xe4   : > { %472 = vrot.lane.b32.xlu1 %v2070_v11, %s1877_s10 }
  0xe5   : > { %526 = vrot.lane.b32.xlu0 %v2066_v61, %s1865_s28 }
  0xe8   : > { %511 = vperm.xlu1 %1728, %v1980_v0  }
  0xe9   : > { %399 = vperm.xlu0 %1731, %v2002_v5  }
  0xec   : > { %1729 = vset.pattern.permute.xlu1 %v1878_v22 }
  0xed   : > { %1734 = vset.pattern.permute.xlu0 %v1879_v23  ;;  %559 = vperm.xlu1 %1729, %v1985_v1  }
  0xee   : > { %627 = vperm.xlu0 %1734, %v1994_v3  }
  0xf1   : > { %1732 = vset.pattern.permute.xlu1 %v1870_v21  ;;  %v2135_v21 = vpop.permute.xlu1 %451 }
  0xf2   : > { %635 = vperm.xlu0 %1734, %v2002_v5   ;;  %603 = vperm.xlu1 %1732, %v2002_v5  }
  0xf5   : > { %v2145_v32 = vpop.permute.xlu1 %379 }
  0xf6   : > { %1738 = vset.pattern.permute.xlu0 %v1880_v29  ;;  %1733 = vset.pattern.permute.xlu1 %v1879_v23 }
  0xf7   : > { %687 = vperm.xlu0 %1738, %v1985_v1   ;;  %631 = vperm.xlu1 %1733, %v1980_v0  }
  0xf9   : > { %v2152_v35 = vpop.permute.xlu1 %455 }
  0xfb   : > { %530 = vrot.lane.b32.xlu0 %v2077_v19, %s1865_s28  ;;  %474 = vrot.lane.b32.xlu1 %v2077_v19, %s1877_s10 }
  0xfc   : > { %1735 = vset.pattern.permute.xlu1 %v1876_v20 }
  0xfd   : > { %v2157_v37 = vpop.permute.xlu1 %479 }
  0xff   : > { %584 = vrot.lane.b32.xlu0 %v2070_v11, %s1881_s11  ;;  %528 = vrot.lane.b32.xlu1 %v2070_v11, %s1865_s28 }
 0x101   : > { %v2165_v39 = vpop.permute.xlu1 %459 }
 0x103   : > { %695 = vperm.xlu0 %1738, %v1980_v0   ;;  %515 = vperm.xlu1 %1735, %v2002_v5  }
 0x105   : > { %v2174_v42 = vpop.permute.xlu1 %487 }
 0x107   : > { %1742 = vset.pattern.permute.xlu0 %v1882_v33  ;;  %1736 = vset.pattern.permute.xlu1 %v1878_v22 }
 0x108   : > { %655 = vperm.xlu0 %1742, %v1980_v0   ;;  %567 = vperm.xlu1 %1736, %v1980_v0  }
 0x109   : > { %v2183_v45 = vpop.permute.xlu1 %539 }
 0x10c   : > { %532 = vrot.lane.b32.xlu0 %v2074_v17, %s1865_s28  ;;  %1737 = vset.pattern.permute.xlu1 %v1882_v33 }
 0x10d   : > { %647 = vperm.xlu1 %1737, %v1985_v1   ;;  %v2191_v47 = vpop.permute.xlu1 %491 }
 0x110   : > { %614 = vrot.lane.b32.xlu0 %v2066_v61, %s1883_s12 }
 0x111   : > { %651 = vperm.xlu1 %1737, %v1994_v3   ;;  %v2197_v49 = vpop.permute.xlu1 %591 }
 0x114   : > { %659 = vperm.xlu0 %1742, %v2002_v5  }
 0x115   : > { %1739 = vset.pattern.permute.xlu1 %v1880_v29 }
 0x116   : > { %691 = vperm.xlu1 %1739, %v1994_v3  }
 0x118   : > { %1746 = vset.pattern.permute.xlu0 %v1884_v40 }
 0x119   : > { %715 = vperm.xlu0 %1746, %v1980_v0  }
 0x11a   : > { %476 = vrot.lane.b32.xlu1 %v2074_v17, %s1877_s10 }
 0x11b   : > { %1740 = vset.pattern.permute.xlu1 %v1878_v22 }
 0x11d   : > { %588 = vrot.lane.b32.xlu0 %v2074_v17, %s1881_s11 }
 0x11e   : > { %582 = vrot.lane.b32.xlu1 %v2066_v61, %s1881_s11  ;;  %1747 = vset.pattern.permute.xlu0 %v1885_v43 }
 0x121   : > { %679 = vperm.xlu0 %1747, %v2002_v5  }
 0x122   : > { %571 = vperm.xlu1 %1740, %v2002_v5  }
 0x125   : > { %620 = vrot.lane.b32.xlu0 %v2074_v17, %s1883_s12 }
 0x126   : > { %1741 = vset.pattern.permute.xlu1 %v1885_v43 }
 0x127   : > { %667 = vperm.xlu1 %1741, %v1985_v1  }
 0x12b   : > { %671 = vperm.xlu1 %1741, %v1994_v3  }
 0x12d   : > { %v727_v51 = vpop.xlane.xlu1 %726 }
 0x12e   : > { %v734_v62 = vmul.f32 0.0625, %v727_v51 }
 0x12f   : > { %1743 = vset.pattern.permute.xlu1 %v1884_v40 }
 0x130   : > { %707 = vperm.xlu1 %1743, %v1985_v1   ;;  %v738_v13 = vmul.f32 %v734_v62, %v1985_v1 }
 0x131   : > { %v729_v52 = vpop.xlane.xlu0 %728 }
 0x132   : > { %v735_v14 = vmul.f32 0.0625, %v729_v52  ;;  %v754_v22 = vadd.f32 %v2141_v31, %v738_v13  ;;  %v1886_v52 = vmov 4  }
 0x134   : > { %711 = vperm.xlu1 %1743, %v1994_v3   ;;  %v739_v23 = vmul.f32 %v735_v14, %v1994_v3  ;;  %v758_v36 = vmax.f32 %v754_v22, 0.0 }
 0x135   : > { %v733_v53 = vpop.xlane.xlu1 %732 }
 0x137   : > { %v731_v54 = vpop.xlane.xlu0 %730 }
 0x138   : > { %586 = vrot.lane.b32.xlu1 %v2077_v19, %s1881_s11  ;;  %s1891_s11 = smov [#allocation2]  }
 0x139   : > { %v2205_v55 = vpop.permute.xlu1 %406  ;;  %1744 = vset.pattern.permute.xlu1 %v1885_v43  ;;  %v737_v43 = vmul.f32 0.0625, %v733_v53 }
 0x13b   : > { %v409_v58 = vpop.permute.xlu0 %408 }
 0x13c   : > { %616 = vrot.lane.b32.xlu1 %v2070_v11, %s1883_s12  ;;  %v431_v63 = vmul.f32 %v2124_v28, %v409_v58  ;;  %v736_v28 = vmul.f32 0.0625, %v731_v54  ;;  %v741_v58 = vmul.f32 %v737_v43, %v2002_v5 }
 0x13d   : > { %v2209_v57 = vpop.permute.xlu1 %410 }
 0x13e   : > { %v435_v15 = vadd.f32 %v431_v63, %v383_v6  ;;  %v740_v51 = vmul.f32 %v736_v28, %v1980_v0 }
 0x140   : > { %675 = vperm.xlu1 %1744, %v1980_v0   ;;  %v756_v54 = vadd.f32 %v2106_v25, %v740_v51 }
 0x141   : > { %v2212_v59 = vpop.permute.xlu1 %438 }
 0x142   : > { %v760_v53 = vmax.f32 %v756_v54, 0.0 }
 0x143   : > { %v2214_v60 = vpop.permute.xlu0 %543 }
 0x144   : > { %1745 = vset.pattern.permute.xlu1 %v1880_v29 }
 0x145   : > { %699 = vperm.xlu1 %1745, %v2002_v5   ;;  %v2219_v4 = vpop.permute.xlu1 %387 }
 0x147   : > { %v441_v9 = vpop.permute.xlu0 %440 }
 0x148   : > { %v463_v16 = vmul.f32 %v2135_v21, %v441_v9  ;;  %v755_v21 = vadd.f32 %v2101_v24, %v739_v23  ;;  %v757_v24 = vadd.f32 %v2150_v34, %v741_v58 }
 0x149   : > { %618 = vrot.lane.b32.xlu1 %v2077_v19, %s1883_s12  ;;  %v2226_v18 = vpop.permute.xlu1 %503  ;;  %s1803_s12 = sshll.u32 %s1891_s11, 4  ;;  %s1804_s12 = int_to_ptr.vmem [resolvable:$false] %s1803_s12 }
 0x14a   : > { %v2228_v20 = vadd.f32 %v463_v16, %v435_v15  ;;  %1748 = vset.pattern.permute.xlu1 %v1884_v40  ;;  %v759_v31 = vmax.f32 %v755_v21, 0.0  ;;  %v761_v13 = vmax.f32 %v757_v24, 0.0  ;;  %s1805_s13 = scalar_lea.vmem %s1804_s12, 1024 }
 0x14b   : > { %v2233_v33 = vpop.permute.xlu0 %547 }
 0x14d   : > { %719 = vperm.xlu1 %1748, %v2002_v5   ;;  %v508_v29 = vpop.permute.xlu1 %507 }
 0x14f   : > { %v2241_v62 = vpop.permute.xlu0 %470 }
 0x151   : > { %1749 = vset.pattern.permute.xlu1 %v1886_v52 }
 0x152   : > { %764 = vperm.xlu1 %1749, %v758_v36   ;;  %v2237_v40 = vpop.permute.xlu1 %599 }
 0x153   : > { %v564_v6 = vpop.permute.xlu0 %563 }
 0x156   : > { %769 = vperm.xlu1 %1749, %v759_v31  }
 0x157   : > { %v2243_v63 = vpop.permute.xlu1 %623 }
 0x158   : > { %v392_v15 = vpop.permute.xlu0 %391 }
 0x159   : > { %v403_v58 = vmul.f32 %v392_v15, %v2070_v11 }
 0x15a   : > { %774 = vperm.xlu1 %1749, %v760_v53  }
 0x15b   : > { %v2246_v9 = vpop.permute.xlu1 %412 }
 0x15c   : > { %v2248_v22 = vpop.permute.xlu0 %395 }
 0x15e   : > { %779 = vperm.xlu1 %1749, %v761_v13  }
 0x15f   : > { %v443_v14 = vpop.permute.xlu1 %442 }
 0x160   : > { %v2252_v23 = vpop.permute.xlu0 %444 }
 0x163   : > { %v473_v16 = vpop.permute.xlu1 %472 }
 0x164   : > { %v2258_v34 = vpop.permute.xlu0 %526  ;;  %v519_v52 = vmul.f32 %v508_v29, %v473_v16  ;;  %v495_v11 = vmul.f32 %v2187_v46, %v473_v16 }
 0x166   : > { %v523_v53 = vadd.f32 %v519_v52, %v403_v58 }
 0x167   : > { %v2250_v25 = vpop.permute.xlu1 %511 }
 0x168   : > { %v2262_v43 = vpop.permute.xlu0 %399 }
 0x169   : > { %2726 = vst [vmem:[#allocation16_spill] sm:$0xff] %v2262_v43 }
 0x16c   : > { %v2254_v28 = vpop.permute.xlu1 %559 }
 0x16d   : > { %v628_v31 = vpop.permute.xlu0 %627 }
 0x171   : > { %v2256_v36 = vpop.permute.xlu1 %603  ;;  %v2267_v2 = vpop.permute.xlu0 %635 }
 0x172   : > { %2725 = vst [vmem:[#allocation15_spill] sm:$0xff] %v2256_v36  ;;  %2727 = vst [vmem:[#allocation17_spill] sm:$0xff] %v2267_v2 }
 0x176   : > { %v2260_v21 = vpop.permute.xlu1 %631  ;;  %v2273_v1 = vpop.permute.xlu0 %687 }
 0x177   : > { %2729 = vst [vmem:[#allocation19_spill] sm:$0xff] %v2273_v1 }
 0x17a   : > { %v2264_v51 = vpop.permute.xlu1 %474  ;;  %v2277_v12 = vpop.permute.xlu0 %530 }
 0x17e   : > { %v529_v54 = vpop.permute.xlu1 %528  ;;  %v585_v10 = vpop.permute.xlu0 %584 }
 0x17f   : > { %v575_v24 = vmul.f32 %v564_v6, %v529_v54 }
 0x181   : > { %v579_v13 = vadd.f32 %v575_v24, %v523_v53 }
 0x182   : > { %v2269_v5 = vpop.permute.xlu1 %515  ;;  %v2283_v6 = vpop.permute.xlu0 %695 }
 0x183   : > { %2728 = vst [vmem:[#allocation18_spill] sm:$0xff] %v2269_v5  ;;  %2731 = vst [vmem:[#allocation21_spill] sm:$0xff] %v2283_v6  ;;  %v551_v6 = vmul.f32 %v2183_v45, %v529_v54  ;;  %v607_v45 = vmul.f32 %v2194_v48, %v585_v10 }
 0x187   : > { %v2271_v0 = vpop.permute.xlu1 %567  ;;  %v2285_v58 = vpop.permute.xlu0 %655 }
 0x188   : > { %2732 = vst [vmem:[#allocation22_spill] sm:$0xff] %v2285_v58  ;;  %v430_v58 = vmul.f32 %v2117_v27, %v2205_v55  ;;  %v432_v27 = vmul.f32 %v2129_v30, %v2209_v57  ;;  %v433_v30 = vmul.f32 %v2181_v44, %v2246_v9 }
 0x18b   : > { %v2289_v53 = vpop.permute.xlu0 %532 }
 0x18c   : > { %v2275_v3 = vpop.permute.xlu1 %647 }
 0x18f   : > { %v615_v7 = vpop.permute.xlu0 %614 }
 0x190   : > { %v652_v29 = vpop.permute.xlu1 %651 }
 0x195   : > { %v2279_v56 = vpop.permute.xlu1 %691 }
 0x196   : > { %2730 = vst [vmem:[#allocation20_spill] sm:$0xff] %v2279_v56  ;;  %v2296_v56 = vpop.permute.xlu0 %659 }
 0x197   : > { %2736 = vst [vmem:[#allocation26_spill] sm:$0xff] %v2296_v56  ;;  %v494_v56 = vmul.f32 %v2157_v37, %v2241_v62 }
 0x199   : > { %v2281_v15 = vpop.permute.xlu1 %476 }
 0x19a   : > { %v2308_v46 = vpop.permute.xlu0 %715  ;;  %v497_v44 = vmul.f32 %v2191_v47, %v2281_v15  ;;  %v520_v47 = vmul.f32 %v2250_v25, %v2264_v51 }
 0x19d   : > { %v583_v52 = vpop.permute.xlu1 %582 }
 0x19e   : > { %v606_v37 = vmul.f32 %v2197_v49, %v583_v52 }
 0x1a1   : > { %v2287_v24 = vpop.permute.xlu1 %571 }
 0x1a2   : > { %2733 = vst [vmem:[#allocation23_spill] sm:$0xff] %v2287_v24  ;;  %v499_v24 = vadd.f32 %v495_v11, %v2228_v20 }
 0x1a4   : > { %v555_v36 = vadd.f32 %v551_v6, %v499_v24  ;;  %v589_v6 = vpop.permute.xlu0 %588 }
 0x1a6   : > { %v2291_v8 = vpop.permute.xlu1 %667  ;;  %v611_v20 = vadd.f32 %v607_v45, %v555_v36  ;;  %v404_v45 = vmul.f32 %v2248_v22, %v2077_v19  ;;  %v2737_v22 = vld [vmem:[#allocation15_spill] sm:$0xff] }
 0x1a7   : > { %2734 = vst [vmem:[#allocation24_spill] sm:$0xff] %v2291_v8  ;;  %v382_v8 = vmul.f32 %v2113_v26, %v2066_v61  ;;  %v550_v26 = vmul.f32 %v2200_v50, %v2258_v34 }
 0x1a8   : > { %v2332_v9 = vpop.permute.xlu0 %679 }
 0x1a9   : > { %v434_v16 = vadd.f32 %v430_v58, %v382_v8  ;;  %v464_v8 = vmul.f32 %v2152_v35, %v443_v14 }
 0x1aa   : > { %v672_v43 = vpop.permute.xlu1 %671 }
 0x1ab   : > { %v683_v49 = vadd.f32 %v672_v43, %v579_v13 }
 0x1af   : > { %v2293_v5 = vpop.permute.xlu1 %707 }
 0x1b0   : > { %2735 = vst [vmem:[#allocation25_spill] sm:$0xff] %v2293_v5  ;;  %v462_v5 = vmul.f32 %v2169_v41, %v2212_v59  ;;  %v384_v41 = vmul.f32 %v2163_v38, %v2077_v19  ;;  %v385_v38 = vmul.f32 %v2145_v32, %v2074_v17 }
 0x1b2   : > { %v466_v55 = vadd.f32 %v462_v5, %v434_v16  ;;  %v436_v48 = vadd.f32 %v432_v27, %v384_v41  ;;  %v496_v5 = vmul.f32 %v2174_v42, %v2264_v51  ;;  %v437_v52 = vadd.f32 %v433_v30, %v385_v38  ;;  %v621_v51 = vpop.permute.xlu0 %620  ;;  %v2739_v41 = vld [vmem:[#allocation22_spill] sm:$0xff] }
 0x1b3   : > { %v2298_v1 = vpop.permute.xlu1 %711  ;;  %v638_v42 = vmul.f32 %v2243_v63, %v615_v7  ;;  %v552_v16 = vmul.f32 %v2214_v60, %v2277_v12  ;;  %v402_v63 = vmul.f32 %v2219_v4, %v2066_v61  ;;  %v574_v60 = vmul.f32 %v2254_v28, %v2258_v34 }
 0x1b4   : > { %v498_v59 = vadd.f32 %v494_v56, %v466_v55  ;;  %v465_v56 = vmul.f32 %v2165_v39, %v2252_v23  ;;  %v518_v23 = vmul.f32 %v2226_v18, %v2241_v62  ;;  %v553_v18 = vmul.f32 %v2233_v33, %v2289_v53  ;;  %v2740_v33 = vld [vmem:[#allocation19_spill] sm:$0xff] }
 0x1b5   : > { %v609_v55 = vmul.f32 %v2737_v22, %v589_v6 }
 0x1b6   : > { %v554_v57 = vadd.f32 %v550_v26, %v498_v59  ;;  %v469_v32 = vadd.f32 %v465_v56, %v437_v52  ;;  %v522_v25 = vadd.f32 %v518_v23, %v402_v63  ;;  %v524_v26 = vadd.f32 %v520_v47, %v404_v45  ;;  %v2743_v56 = vld [vmem:[#allocation14_spill] sm:$0xff]  ;;  %v2750_v45 = vld [vmem:[#allocation21_spill] sm:$0xff] }
 0x1b7   : > { %v587_v2 = vpop.permute.xlu1 %586  ;;  %v2742_v30 = vld [vmem:[#allocation25_spill] sm:$0xff] }
 0x1b8   : > { %v610_v35 = vadd.f32 %v606_v37, %v554_v57  ;;  %v608_v39 = vmul.f32 %v2237_v40, %v587_v2  ;;  %v501_v13 = vadd.f32 %v497_v44, %v469_v32  ;;  %v576_v2 = vmul.f32 %v2271_v0, %v2277_v12  ;;  %v1546_v57 = vld [vmem:[%s263_s15] ss:$0 sm:$0xff] }
 0x1b9   : > { %v578_v34 = vadd.f32 %v574_v60, %v522_v25  ;;  %v704_v60 = vmul.f32 %v2750_v45, %v2077_v19 }
 0x1ba   : > { %v642_v43 = vadd.f32 %v638_v42, %v610_v35  ;;  %v580_v12 = vadd.f32 %v576_v2, %v524_v26  ;;  %v2744_v35 = vld [vmem:[#allocation20_spill] sm:$0xff]  ;;  %v2746_v42 = vld [vmem:[#allocation9_spill] sm:$0xff] }
 0x1bb   : > { %v617_v11 = vpop.permute.xlu1 %616  ;;  %v808_v32 = vmul.f32 %v1546_v57, %v2746_v42  ;;  %v2752_v26 = vld [vmem:[#allocation13_spill] sm:$0xff] }
 0x1bc   : > { %v639_v54 = vmul.f32 %v628_v31, %v617_v11  ;;  %v468_v31 = vadd.f32 %v464_v8, %v436_v48  ;;  %v662_v4 = vadd.f32 %v2275_v3, %v642_v43  ;;  %v557_v11 = vadd.f32 %v553_v18, %v501_v13  ;;  %v2741_v3 = vld [vmem:[#allocation24_spill] sm:$0xff]  ;;  %v2749_v13 = vld [vmem:[#allocation26_spill] sm:$0xff] }
 0x1bd   : > { %v682_v59 = vadd.f32 %v2741_v3, %v578_v34  ;;  %v2751_v18 = vld [vmem:[#allocation10_spill] sm:$0xff] }
 0x1be   : > { %v643_v10 = vadd.f32 %v639_v54, %v611_v20  ;;  %v500_v58 = vadd.f32 %v496_v5, %v468_v31  ;;  %v2738_v54 = vld [vmem:[#allocation17_spill] sm:$0xff]  ;;  %v786_v37 = vmax.f32 %v662_v4, 0.0  ;;  %v613_v6 = vadd.f32 %v609_v55, %v557_v11 }
 0x1bf   : > { %v676_v50 = vpop.permute.xlu1 %675  ;;  %v641_v0 = vmul.f32 %v2738_v54, %v621_v51 }
 0x1c0   : > { %v663_v36 = vadd.f32 %v652_v29, %v643_v10  ;;  %v556_v7 = vadd.f32 %v552_v16, %v500_v58  ;;  %v684_v10 = vadd.f32 %v676_v50, %v580_v12  ;;  %v790_v58 = vmul.f32 %v786_v37, %v682_v59  ;;  %v2747_v16 = vld [vmem:[#allocation16_spill] sm:$0xff] }
 0x1c1   : > { %v405_v50 = vmul.f32 %v2747_v16, %v2074_v17  ;;  %v2754_v59 = vld [vmem:[#allocation12_spill] sm:$0xff] }
 0x1c2   : > { %v787_v14 = vmax.f32 %v663_v36, 0.0  ;;  %v612_v40 = vadd.f32 %v608_v39, %v556_v7  ;;  %v645_v36 = vadd.f32 %v641_v0, %v613_v6  ;;  %v2748_v39 = vld [vmem:[#allocation23_spill] sm:$0xff]  ;;  %v811_v37 = vmul.f32 %v1546_v57, %v2754_v59 }
 0x1c3   : > { %v577_v23 = vmul.f32 %v2748_v39, %v2289_v53 }
 0x1c4   : > { %v2334_v29 = vpop.permute.xlu1 %699  ;;  %v791_v24 = vmul.f32 %v787_v14, %v683_v49  ;;  %v703_v49 = vmul.f32 %v2744_v35, %v2743_v56  ;;  %v2745_v14 = vld [vmem:[#allocation18_spill] sm:$0xff]  ;;  %v665_v7 = vadd.f32 %v2749_v13, %v645_v36 }
 0x1c5   : > { %v521_v52 = vmul.f32 %v2745_v14, %v2281_v15  ;;  %v705_v11 = vmul.f32 %v2334_v29, %v2074_v17  ;;  %v2756_v36 = vld [vmem:[#allocation6_spill] sm:$0xff] }
 0x1c6   : > { %v723_v43 = vadd.f32 %v2298_v1, %v703_v49  ;;  %v789_v4 = vmax.f32 %v665_v7, 0.0 }
 0x1c7   : > { %v525_v15 = vadd.f32 %v521_v52, %v405_v50 }
 0x1c8   : > { %v619_v27 = vpop.permute.xlu1 %618 }
 0x1c9   : > { %v640_v62 = vmul.f32 %v2260_v21, %v619_v27  ;;  %v702_v21 = vmul.f32 %v2740_v33, %v2066_v61  ;;  %v581_v25 = vadd.f32 %v577_v23, %v525_v15 }
 0x1cb   : > { %v644_v28 = vadd.f32 %v640_v62, %v612_v40  ;;  %v722_v5 = vadd.f32 %v2742_v30, %v702_v21  ;;  %v809_v40 = vmul.f32 %v1546_v57, %v2751_v18  ;;  %v724_v62 = vadd.f32 %v2308_v46, %v704_v60  ;;  %v2755_v30 = vld [vmem:[#allocation7_spill] sm:$0xff] }
 0x1cc   : > { %v720_v20 = vpop.permute.xlu1 %719  ;;  %v685_v54 = vadd.f32 %v2332_v9, %v581_v25  ;;  %v2426_v60 = vld [vmem:[%s2692_s2 + $0x10] sm:$0xff] }
 0x1cd   : > { %v664_v8 = vadd.f32 %v2739_v41, %v644_v28  ;;  %v725_v0 = vadd.f32 %v720_v20, %v705_v11 }
 0x1cf   : > { %v788_v48 = vmax.f32 %v664_v8, 0.0  ;;  %v793_v8 = vmul.f32 %v789_v4, %v685_v54 }
 0x1d1   : > { %v765_v38 = vpop.permute.xlu1 %764  ;;  %v792_v31 = vmul.f32 %v788_v48, %v684_v10 }
 0x1d2   : > { %v782_v44 = vmul.f32 %v765_v38, %v722_v5 }
 0x1d4   : > { %v794_v47 = vadd.f32 %v790_v58, %v782_v44  ;;  %v2758_v58 = vld [vmem:[#allocation8_spill] sm:$0xff] }
 0x1d5   : > { %v770_v63 = vpop.permute.xlu1 %769 }
 0x1d6   : > { %v798_v27 = vadd.f32 %v794_v47, %v2066_v61  ;;  %v783_v2 = vmul.f32 %v770_v63, %v723_v43  ;;  %v2753_v61 = vld [vmem:[#allocation11_spill] sm:$0xff]  ;;  %v2418_v63 = vld [vmem:[%s2692_s2] sm:$0xff] }
 0x1d7   : > { %v810_v34 = vmul.f32 %v1546_v57, %v2753_v61 }
 0x1d8   : > { %v795_v51 = vadd.f32 %v791_v24, %v783_v2  ;;  %v812_v53 = vadd.f32 %v808_v32, %v798_v27 }
 0x1d9   : > { %v775_v1 = vpop.permute.xlu1 %774 }
 0x1da   : > { %v799_v22 = vadd.f32 %v795_v51, %v2743_v56  ;;  %v784_v55 = vmul.f32 %v775_v1, %v724_v62  ;;  %v2386_v28 = vmul.f32 %v2752_v26, %v812_v53 }
 0x1dc   : > { %v796_v46 = vadd.f32 %v792_v31, %v784_v55  ;;  %820 = vadd.xlane.f32.xlu0 %v2386_v28  ;;  %v813_v24 = vadd.f32 %v809_v40, %v799_v22  ;;  %v2757_v31 = vld [vmem:[#allocation5_spill] sm:$0xff] }
 0x1dd   : > { %v780_v12 = vpop.permute.xlu1 %779 }
 0x1de   : > { %v800_v41 = vadd.f32 %v796_v46, %v2077_v19  ;;  %v785_v29 = vmul.f32 %v780_v12, %v725_v0  ;;  %v2393_v33 = vmul.f32 %v2752_v26, %v813_v24 }
 0x1e0   : > { %v797_v21 = vadd.f32 %v793_v8, %v785_v29  ;;  %822 = vadd.xlane.f32.xlu1 %v2393_v33  ;;  %v814_v3 = vadd.f32 %v810_v34, %v800_v41 }
 0x1e2   : > { %v801_v9 = vadd.f32 %v797_v21, %v2074_v17  ;;  %v2399_v20 = vmul.f32 %v2752_v26, %v814_v3 }
 0x1e4   : > { %824 = vadd.xlane.f32.xlu0 %v2399_v20  ;;  %v815_v6 = vadd.f32 %v811_v37, %v801_v9 }
 0x1e6   : > { %v2403_v19 = vmul.f32 %v2752_v26, %v815_v6 }
 0x1e8   : > { %826 = vadd.xlane.f32.xlu0 %v2403_v19 }
 0x269   : > { %v821_v10 = vpop.xlane.xlu0 %820 }
 0x26a   : > { %v828_v38 = vmul.f32 %v821_v10, %v2756_v36  ;;  %v1888_v10 = vmov 6  }
 0x26b   : > { %1750 = vset.pattern.permute.xlu1 %v1888_v10  ;;  %1751 = vset.pattern.permute.xlu0 %v1888_v10 }
 0x26c   : > { %v833_v35 = vsel %vm832_vm1, %v828_v38, 0.0 }
 0x26d   : > { %v823_v48 = vpop.xlane.xlu1 %822 }
 0x26e   : > { %v829_v5 = vmul.f32 %v823_v48, %v2755_v30 }
 0x270   : > { %v834_v17 = vsel %vm832_vm1, %v829_v5, 0.0  ;;  %v2463_v5 = vld [vmem:[%s2692_s2 + $0x8] sm:$0xff] }
 0x271   : > { %v825_v57 = vpop.xlane.xlu0 %824  ;;  %v835_v14 = vadd.f32 %v834_v17, %v833_v35 }
 0x272   : > { %v830_v56 = vmul.f32 %v825_v57, %v2757_v31 }
 0x274   : > { %v836_v49 = vsel %vm832_vm1, %v830_v56, 0.0 }
 0x275   : > { %v827_v52 = vpop.xlane.xlu0 %826  ;;  %v837_v42 = vadd.f32 %v836_v49, %v835_v14  ;;  %v2474_v14 = vld [vmem:[%s2692_s2 + $0x18] sm:$0xff] }
 0x276   : > { %v831_v44 = vmul.f32 %v827_v52, %v2758_v58 }
 0x278   : > { %v838_v32 = vsel %vm832_vm1, %v831_v44, 0.0 }
 0x279   : > { %v839_v16 = vadd.f32 %v838_v32, %v837_v42 }
 0x27b   : > { %v840_v50 = vrot.slane %v839_v16, 4 }
 0x27d   : > { %v841_v39 = vadd.f32 %v840_v50, %v839_v16 }
 0x27f   : > { %v842_v23 = vrot.slane %v841_v39, 2 }
 0x281   : > { %v843_v43 = vadd.f32 %v842_v23, %v841_v39 }
 0x283   : > { %v844_v47 = vrot.slane %v843_v43, 1 }
 0x285   : > { %v845_v13 = vadd.f32 %v844_v47, %v843_v43 }
 0x287   : > { %v847_v7 = vmul.f32 %v845_v13, %v2755_v30  ;;  %v846_v45 = vmul.f32 %v2418_v63, %v845_v13  ;;  %v848_v15 = vmul.f32 %v2426_v60, %v845_v13  ;;  %v849_v27 = vmul.f32 %v845_v13, %v2758_v58 }
 0x289   : > { %856 = vrot.lane.b32.xlu0 %v847_v7, %s1887_s18  ;;  %854 = vrot.lane.b32.xlu1 %v846_v45, %s1887_s18 }
 0x28d   : > { %858 = vrot.lane.b32.xlu1 %v848_v15, %s1887_s18  ;;  %v1889_v15 = vmov 7  }
 0x291   : > { %860 = vrot.lane.b32.xlu1 %v849_v27, %s1887_s18 }
 0x2fb   : > { %v857_v2 = vpop.permute.xlu0 %856  ;;  %v855_v18 = vpop.permute.xlu1 %854 }
 0x2fc   : > { %v870_v40 = vsel %vm866_vm2, %v857_v2, 0.0  ;;  %v867_v62 = vsel %vm866_vm2, %v855_v18, 0.0 }
 0x2fd   : > { %871 = vadd.xlane.f32.xlu1 %v870_v40  ;;  %868 = vadd.xlane.f32.xlu0 %v867_v62 }
 0x2ff   : > { %v859_v25 = vpop.permute.xlu1 %858 }
 0x300   : > { %v873_v51 = vsel %vm866_vm2, %v859_v25, 0.0 }
 0x301   : > { %874 = vadd.xlane.f32.xlu0 %v873_v51 }
 0x303   : > { %v861_v53 = vpop.permute.xlu1 %860 }
 0x304   : > { %v876_v4 = vsel %vm866_vm2, %v861_v53, 0.0 }
 0x305   : > { %877 = vadd.xlane.f32.xlu0 %v876_v4  ;;  %v2759_v4 = vmov 0  }
 0x38a   : > { %v869_v1 = vpop.xlane.xlu0 %868  ;;  %v872_v11 = vpop.xlane.xlu1 %871 }
 0x38b   : > { %v879_v22 = vmul.f32 0.03125, %v869_v1  ;;  %v880_v55 = vmul.f32 0.03125, %v872_v11  ;;  %v1759_v1 = vld [vmem:[%s2693_s3] sm:$0xff]  }
 0x38c   : > { %1596 = vmatprep.mubr.msk.bf16.mxu0 %vm1162_vm3, %v1759_v1  ;;  %v1026_v11 = vld [vmem:[%s2694_s4] sm:$0xff] }
 0x38d   : > { %v883_v61 = vsub.f32 %v2386_v28, %v879_v22  ;;  %v884_v34 = vsub.f32 %v2393_v33, %v880_v55  ;;  %v1028_v22 = vld [vmem:[%s2694_s4 + $0x10] sm:$0xff]  ;;  %v1027_v55 = vld [vmem:[%s2694_s4 + $0x8] sm:$0xff] }
 0x38e   : > { %v875_v54 = vpop.xlane.xlu0 %874 }
 0x38f   : > { %v2439_v0 = vmul.f32 %v2752_v26, %v883_v61  ;;  %v881_v46 = vmul.f32 0.03125, %v875_v54  ;;  %v2442_v24 = vmul.f32 %v2752_v26, %v884_v34  ;;  %v1031_v61 = vld [vmem:[%s2694_s4 + $0x28] sm:$0xff]  ;;  %v1029_v34 = vld [vmem:[%s2694_s4 + $0x18] sm:$0xff] }
 0x390   : > { %v1033_v54 = vld [vmem:[%s2694_s4 + $0x38] sm:$0xff] }
 0x391   : > { %v885_v12 = vsub.f32 %v2399_v20, %v881_v46  ;;  %v891_v41 = vmul.f32 %v2439_v0, %v2439_v0  ;;  %v892_v8 = vmul.f32 %v2442_v24, %v2442_v24  ;;  %v1030_v46 = vld [vmem:[%s2694_s4 + $0x20] sm:$0xff] }
 0x392   : > { %v878_v29 = vpop.xlane.xlu0 %877 }
 0x393   : > { %v2450_v21 = vmul.f32 %v2752_v26, %v885_v12  ;;  %v882_v3 = vmul.f32 0.03125, %v878_v29  ;;  %895 = vadd.xlane.f32.xlu1 %v891_v41  ;;  %897 = vadd.xlane.f32.xlu0 %v892_v8  ;;  %v1035_v12 = vld [vmem:[%s2694_s4 + $0x48] sm:$0xff]  ;;  %v1032_v41 = vld [vmem:[%s2694_s4 + $0x30] sm:$0xff]  ;;  %v1037_v8 = vld [vmem:[%s2694_s4 + $0x58] sm:$0xff] }
 0x394   : > { %v1034_v29 = vld [vmem:[%s2694_s4 + $0x40] sm:$0xff] }
 0x395   : > { %v886_v59 = vsub.f32 %v2403_v19, %v882_v3  ;;  %v893_v37 = vmul.f32 %v2450_v21, %v2450_v21  ;;  %v1039_v3 = vld [vmem:[%s2694_s4 + $0x68] sm:$0xff] }
 0x397   : > { %899 = vadd.xlane.f32.xlu1 %v893_v37  ;;  %v2456_v9 = vmul.f32 %v2752_v26, %v886_v59  ;;  %v1036_v59 = vld [vmem:[%s2694_s4 + $0x50] sm:$0xff]  ;;  %v1041_v37 = vld [vmem:[%s2694_s4 + $0x78] sm:$0xff] }
 0x399   : > { %v894_v6 = vmul.f32 %v2456_v9, %v2456_v9 }
 0x39b   : > { %901 = vadd.xlane.f32.xlu0 %v894_v6  ;;  %v1038_v6 = vld [vmem:[%s2694_s4 + $0x60] sm:$0xff] }
 0x420   : > { %v898_v48 = vpop.xlane.xlu0 %897  ;;  %v896_v30 = vpop.xlane.xlu1 %895 }
 0x421   : > { %v904_v36 = vmul.f32 %v2463_v5, %v898_v48  ;;  %v903_v38 = vmul.f32 %v2418_v63, %v896_v30 }
 0x423   : > { %v908_v57 = vsel %vm832_vm1, %v904_v36, 0.0  ;;  %v907_v17 = vsel %vm832_vm1, %v903_v38, 0.0 }
 0x424   : > { %v900_v26 = vpop.xlane.xlu1 %899  ;;  %v909_v35 = vadd.f32 %v908_v57, %v907_v17 }
 0x425   : > { %v905_v31 = vmul.f32 %v2426_v60, %v900_v26 }
 0x427   : > { %v910_v56 = vsel %vm832_vm1, %v905_v31, 0.0 }
 0x428   : > { %v902_v49 = vpop.xlane.xlu0 %901  ;;  %v911_v58 = vadd.f32 %v910_v56, %v909_v35 }
 0x429   : > { %v906_v52 = vmul.f32 %v2474_v14, %v902_v49 }
 0x42b   : > { %v912_v44 = vsel %vm832_vm1, %v906_v52, 0.0 }
 0x42c   : > { %v913_v42 = vadd.f32 %v912_v44, %v911_v58 }
 0x42e   : > { %v914_v32 = vrot.slane %v913_v42, 4 }
 0x430   : > { %v915_v16 = vadd.f32 %v914_v32, %v913_v42 }
 0x432   : > { %v916_v50 = vrot.slane %v915_v16, 2 }
 0x434   : > { %v917_v39 = vadd.f32 %v916_v50, %v915_v16 }
 0x436   : > { %v918_v23 = vrot.slane %v917_v39, 1 }
 0x438   : > { %v919_v43 = vadd.f32 %v918_v23, %v917_v39 }
 0x43a   : > { %v921_v47 = vmul.f32 %v2463_v5, %v919_v43  ;;  %v920_v13 = vmul.f32 %v2418_v63, %v919_v43  ;;  %v922_v7 = vmul.f32 %v2426_v60, %v919_v43  ;;  %v923_v45 = vmul.f32 %v2474_v14, %v919_v43 }
 0x43c   : > { %930 = vrot.lane.b32.xlu0 %v921_v47, %s1887_s18  ;;  %928 = vrot.lane.b32.xlu1 %v920_v13, %s1887_s18 }
 0x440   : > { %932 = vrot.lane.b32.xlu1 %v922_v7, %s1887_s18 }
 0x444   : > { %934 = vrot.lane.b32.xlu1 %v923_v45, %s1887_s18  ;;  %s1542_s18 = sshll.u32 %s253_s17, 5 }
 0x445   : > { %s255_s19 = scalar_lea.vmem [#allocation2], %s1542_s18 }
 0x446   : > { %s1467_s20 = sshll.u32 %s255_s19, 4  ;;  %s2640_s20 = int_to_ptr.vmem [resolvable:$true] %s1467_s20 }
 0x447   : > { %s1799_s10 = scalar_lea.vmem %s2640_s20, 512  ;;  %p1806_p0 = scmp.lt.s32.totalorder %s2640_s20, %s1804_s12 }
 0x448   : > { %969 = vperm.xlu1 %1750, %v2418_v63   ;;  %p1800_p11 = scmp.ne.s32.totalorder %s2640_s20, %s1799_s10  ;;  %p1807_p1 = scmp.lt.s32.totalorder %s1805_s13, %s1799_s10 }
 0x44a   : > { %p1801_p12 = pnand %p1800_p11, %p1967_p5  ;;  %p1808_p2 = por %p1807_p1, %p1806_p0 }
 0x44c   : > { %1752 = vset.pattern.permute.xlu1 %v1889_v15  ;;  %p1802_p13 = pneg %p1801_p12 }
 0x44e   : > { %p1809_p3 = pnand %p1808_p2, %p1802_p13 }
 0x4ae   : > { %v931_v27 = vpop.permute.xlu0 %930  ;;  %v929_v2 = vpop.permute.xlu1 %928 }
 0x4af   : > { %v943_v18 = vsel %vm866_vm2, %v931_v27, 0.0  ;;  %v940_v40 = vsel %vm866_vm2, %v929_v2, 0.0 }
 0x4b0   : > { %944 = vadd.xlane.f32.xlu1 %v943_v18  ;;  %941 = vadd.xlane.f32.xlu0 %v940_v40 }
 0x4b2   : > { %v933_v62 = vpop.permute.xlu1 %932 }
 0x4b3   : > { %v946_v25 = vsel %vm866_vm2, %v933_v62, 0.0 }
 0x4b4   : > { %947 = vadd.xlane.f32.xlu0 %v946_v25 }
 0x4b6   : > { %v935_v51 = vpop.permute.xlu1 %934 }
 0x4b7   : > { %v949_v53 = vsel %vm866_vm2, %v935_v51, 0.0 }
 0x4b8   : > { %950 = vadd.xlane.f32.xlu0 %v949_v53 }
 0x4c1   : > { %989 = vperm.xlu1 %1752, %v2418_v63  }
 0x4c5   : > { %993 = vperm.xlu1 %1752, %v2463_v5  }
 0x4c7   : > { %v970_v48 = vpop.permute.xlu1 %969 }
 0x4c9   : > { %1753 = vset.pattern.permute.xlu1 %v1888_v10  ;;  %v1040_v10 = vld [vmem:[%s2694_s4 + $0x70] sm:$0xff] }
 0x4ca   : > { %977 = vperm.xlu1 %1753, %v2426_v60  }
 0x4ce   : > { %981 = vperm.xlu1 %1753, %v2474_v14   ;;  %973 = vperm.xlu0 %1751, %v2463_v5  }
 0x4d2   : > { %1754 = vset.pattern.permute.xlu1 %v1889_v15  ;;  %1756 = vset.pattern.permute.xlu0 %v2759_v4 }
 0x4d3   : > { %997 = vperm.xlu1 %1754, %v2426_v60   ;;  %1054 = vperm.xlu0 %1756, %v1028_v22   ;;  %v1763_v22 = vld [vmem:[%s2693_s3 + $0x20] sm:$0xff]  }
 0x4d7   : > { %1001 = vperm.xlu1 %1754, %v2474_v14   ;;  %1069 = vperm.xlu0 %1756, %v1031_v61   ;;  %v1765_v61 = vld [vmem:[%s2693_s3 + $0x30] sm:$0xff]  }
 0x4db   : > { %1755 = vset.pattern.permute.xlu1 %v2759_v4  ;;  %1079 = vperm.xlu0 %1756, %v1033_v54   ;;  %v1767_v54 = vld [vmem:[%s2695_s5] sm:$0xff]  }
 0x4dc   : > { %1044 = vperm.xlu1 %1755, %v1026_v11   ;;  %v1760_v11 = vld [vmem:[%s2693_s3 + $0x8] sm:$0xff]   ;;  %1628 = vmatprep.mubr.bf16.mxu1 %v1767_v54 }
 0x4df   : > { %1089 = vperm.xlu0 %1756, %v1035_v12  }
 0x4e0   : > { %1049 = vperm.xlu1 %1755, %v1027_v55   ;;  %v1764_v55 = vld [vmem:[%s2693_s3 + $0x28] sm:$0xff]  }
 0x4e3   : > { %1099 = vperm.xlu0 %1756, %v1037_v8  }
 0x4e4   : > { %1059 = vperm.xlu1 %1755, %v1029_v34   ;;  %v1766_v34 = vld [vmem:[%s2693_s3 + $0x38] sm:$0xff]  }
 0x4e7   : > { %1109 = vperm.xlu0 %1756, %v1039_v3  }
 0x4e8   : > { %1064 = vperm.xlu1 %1755, %v1030_v46   ;;  %v1890_v46 = vmov 10  }
 0x4eb   : > { %1119 = vperm.xlu0 %1756, %v1041_v37  }
 0x4ec   : > { %1074 = vperm.xlu1 %1755, %v1032_v41  }
 0x4ef   : > { %1758 = vset.pattern.permute.xlu0 %v1890_v46 }
 0x4f0   : > { %1084 = vperm.xlu1 %1755, %v1034_v29   ;;  %1373 = vperm.xlu0 %1758, %v2463_v5  }
 0x4f4   : > { %1094 = vperm.xlu1 %1755, %v1036_v59  }
 0x4f8   : > { %1104 = vperm.xlu1 %1755, %v1038_v6  }
 0x4fc   : > { %1114 = vperm.xlu1 %1755, %v1040_v10  }
 0x500   : > { %1757 = vset.pattern.permute.xlu1 %v1890_v46 }
 0x501   : > { %1369 = vperm.xlu1 %1757, %v2418_v63  }
 0x505   : > { %1377 = vperm.xlu1 %1757, %v2426_v60  }
 0x509   : > { %1381 = vperm.xlu1 %1757, %v2474_v14  }
 0x53d   : > { %v942_v30 = vpop.xlane.xlu0 %941  ;;  %v945_v36 = vpop.xlane.xlu1 %944 }
 0x53e   : > { %v952_v38 = vmul.f32 0.03125, %v942_v30  ;;  %v953_v26 = vmul.f32 0.03125, %v945_v36 }
 0x540   : > { %v956_v57 = vadd.f32 1e-06, %v952_v38  ;;  %v957_v17 = vadd.f32 1e-06, %v953_v26 }
 0x541   : > { %v948_v31 = vpop.xlane.xlu0 %947  ;;  %v990_v56 = vpop.permute.xlu1 %989 }
 0x542   : > { %1771 = vrsqrt.f32 %v956_v57  ;;  %v954_v35 = vmul.f32 0.03125, %v948_v31 }
 0x543   : > { %1773 = vrsqrt.f32 %v957_v17 }
 0x544   : > { %v958_v49 = vadd.f32 1e-06, %v954_v35 }
 0x545   : > { %v951_v52 = vpop.xlane.xlu0 %950  ;;  %v994_v58 = vpop.permute.xlu1 %993 }
 0x546   : > { %1775 = vrsqrt.f32 %v958_v49  ;;  %v955_v44 = vmul.f32 0.03125, %v951_v52 }
 0x548   : > { %v959_v42 = vadd.f32 1e-06, %v955_v44 }
 0x549   : > { %v978_v32 = vpop.permute.xlu1 %977 }
 0x54a   : > { %1777 = vrsqrt.f32 %v959_v42 }
 0x54c   : > { %v1772_v16 = vpop.eup %1771 }
 0x54d   : > { %v1774_v50 = vpop.eup %1773  ;;  %v964_v39 = vmul.f32 %v1772_v16, %v2439_v0  ;;  %v982_v23 = vpop.permute.xlu1 %981 }
 0x54e   : > { %v974_v43 = vpop.permute.xlu0 %973  ;;  %v965_v47 = vmul.f32 %v1774_v50, %v2442_v24 }
 0x54f   : > { %v984_v13 = vmul.f32 %v970_v48, %v964_v39 }
 0x550   : > { %v1776_v7 = vpop.eup %1775  ;;  %v985_v45 = vmul.f32 %v974_v43, %v965_v47 }
 0x551   : > { %v1004_v15 = vadd.f32 %v990_v56, %v984_v13  ;;  %v966_v27 = vmul.f32 %v1776_v7, %v2450_v21  ;;  %v1761_v21 = vld [vmem:[%s2693_s3 + $0x10] sm:$0xff]  }
 0x552   : > { %v1005_v2 = vadd.f32 %v994_v58, %v985_v45  ;;  %v998_v18 = vpop.permute.xlu1 %997  ;;  %v1055_v29 = vpop.permute.xlu0 %1054 }
 0x553   : > { %v986_v25 = vmul.f32 %v978_v32, %v966_v27 }
 0x554   : > { %v1778_v40 = vpop.eup %1777  ;;  %v1008_v62 = vpack.c.bf16 %v1005_v2, %v1004_v15 }
 0x555   : > { %v967_v51 = vmul.f32 %v1778_v40, %v2456_v9  ;;  %v1006_v4 = vadd.f32 %v998_v18, %v986_v25  ;;  %v1762_v9 = vld [vmem:[%s2693_s3 + $0x18] sm:$0xff]  }
 0x556   : > { %1592 = vmatprep.subr.bf16.mxu0 %v1008_v62  ;;  %v1002_v0 = vpop.permute.xlu1 %1001  ;;  %v1070_v59 = vpop.permute.xlu0 %1069 }
 0x557   : > { %v987_v53 = vmul.f32 %v982_v23, %v967_v51  ;;  %1593 = vmatpush3.bf16.msra.mxu0 %v1008_v62 }
 0x559   : > { %v1007_v1 = vadd.f32 %v1002_v0, %v987_v53 }
 0x55a   : > { %v1080_v48 = vpop.permute.xlu0 %1079 }
 0x55b   : > { %v1009_v24 = vpack.c.bf16 %v1007_v1, %v1006_v4  ;;  %v1045_v12 = vpop.permute.xlu1 %1044 }
 0x55d   : > { %1594 = vmatprep.subr.bf16.mxu0 %v1009_v24 }
 0x55e   : > { %1595 = vmatpush3.bf16.msra.mxu0 %v1009_v24  ;;  %v1090_v31 = vpop.permute.xlu0 %1089 }
 0x55f   : > { %v1050_v41 = vpop.permute.xlu1 %1049 }
 0x561   : > { %1597 = vmatmul.mubr.msk.bf16.vlgmr.msra.gmra.mrb[0].mxu0 %vm1162_vm3, %v1760_v11 }
 0x562   : > { %1600 = vmatprep.mubr.msk.bf16.mxu0 %vm1162_vm3, %v1761_v21  ;;  %v1100_v45 = vpop.permute.xlu0 %1099 }
 0x563   : > { %v1060_v8 = vpop.permute.xlu1 %1059 }
 0x567   : > { %v1065_v3 = vpop.permute.xlu1 %1064 }
 0x569   : > { %1601 = vmatmul.mubr.msk.bf16.gmra.mrb[4].mxu0 %vm1162_vm3, %v1762_v9 }
 0x56a   : > { %1604 = vmatprep.mubr.msk.bf16.mxu0 %vm1162_vm3, %v1763_v22  ;;  %v1110_v22 = vpop.permute.xlu0 %1109 }
 0x56b   : > { %v1075_v6 = vpop.permute.xlu1 %1074 }
 0x56f   : > { %v1085_v14 = vpop.permute.xlu1 %1084 }
 0x571   : > { %1605 = vmatmul.mubr.msk.bf16.gmra.mrb[8].mxu0 %vm1162_vm3, %v1764_v55 }
 0x572   : > { %1608 = vmatprep.mubr.msk.bf16.mxu0 %vm1162_vm3, %v1765_v61 }
 0x573   : > { %v1095_v47 = vpop.permute.xlu1 %1094 }
 0x577   : > { %v1105_v1 = vpop.permute.xlu1 %1104 }
 0x579   : > { %1609 = vmatmul.mubr.msk.bf16.gmra.mrb[12].mxu0 %vm1162_vm3, %v1766_v34 }
 0x634   : > { %v1598_v37 = vpop.f32.mrb[0].mxu0 }
 0x635   : > { %v1221_v10 = vpop.f32.mrb[1].mxu0  ;;  %v1230_v36 = vadd.f32 %v1598_v37, %v1055_v29 }
 0x636   : > { %v1599_v30 = vpop.f32.mrb[2].mxu0  ;;  %v1222_v26 = vadd.f32 %v1221_v10, %v1045_v12 }
 0x637   : > { %v1233_v38 = vadd.f32 %v1599_v30, %v1060_v8  ;;  %v1224_v63 = vpop.f32.mrb[3].mxu0  ;;  %v1120_v30 = vpop.permute.xlu0 %1119 }
 0x638   : > { %v1225_v5 = vadd.f32 %v1224_v63, %v1050_v41 }
 0x639   : > { %v2591_v57 = vpack.c.bf16 %v1233_v38, %v1230_v36 }
 0x63a   : > { %v2593_v60 = vpack.c.bf16 %v1225_v5, %v1222_v26 }
 0x63b   : > { %v1293_v17 = vmul.bf16 %v2591_v57, %v2591_v57 }
 0x63c   : > { %v1292_v56 = vmul.bf16 %v2593_v60, %v2593_v60  ;;  %v1602_v35 = vpop.f32.mrb[4].mxu0 }
 0x63d   : > { %v1301_v49 = vmul.bf16 %v1293_v17, %v2591_v57  ;;  %v1237_v52 = vpop.f32.mrb[5].mxu0  ;;  %v1246_v32 = vadd.f32 %v1602_v35, %v1075_v6  ;;  %v1115_v6 = vpop.permute.xlu1 %1114 }
 0x63e   : > { %v1603_v58 = vpop.f32.mrb[6].mxu0  ;;  %v1300_v44 = vmul.bf16 %v1292_v56, %v2593_v60  ;;  %v1238_v39 = vadd.f32 %v1237_v52, %v1065_v3 }
 0x63f   : > { %v1309_v42 = vmul.bf16 1027030327, %v1301_v49  ;;  %v1249_v16 = vadd.f32 %v1603_v58, %v1080_v48  ;;  %v1240_v50 = vpop.f32.mrb[7].mxu0 }
 0x640   : > { %v1241_v23 = vadd.f32 %v1240_v50, %v1070_v59  ;;  %v1308_v43 = vmul.bf16 1027030327, %v1300_v44 }
 0x641   : > { %v2601_v13 = vpack.c.bf16 %v1249_v16, %v1246_v32  ;;  %v1317_v7 = vadd.bf16 %v1309_v42, %v2591_v57 }
 0x642   : > { %v2604_v15 = vpack.c.bf16 %v1241_v23, %v1238_v39  ;;  %v1316_v27 = vadd.bf16 %v1308_v43, %v2593_v60 }
 0x643   : > { %v1295_v2 = vmul.bf16 %v2601_v13, %v2601_v13  ;;  %v1325_v18 = vmul.bf16 1061961548, %v1317_v7 }
 0x644   : > { %v1294_v40 = vmul.bf16 %v2604_v15, %v2604_v15  ;;  %v1606_v62 = vpop.f32.mrb[8].mxu0  ;;  %v1324_v25 = vmul.bf16 1061961548, %v1316_v27 }
 0x645   : > { %v1303_v51 = vmul.bf16 %v1295_v2, %v2601_v13  ;;  %v1253_v53 = vpop.f32.mrb[9].mxu0  ;;  %1779 = vtanh.bf16 %v1325_v18  ;;  %v1262_v11 = vadd.f32 %v1606_v62, %v1095_v47 }
 0x646   : > { %v1302_v0 = vmul.bf16 %v1294_v40, %v2604_v15  ;;  %v1607_v4 = vpop.f32.mrb[10].mxu0  ;;  %1781 = vtanh.bf16 %v1324_v25  ;;  %v1254_v61 = vadd.f32 %v1253_v53, %v1085_v14 }
 0x647   : > { %v1311_v24 = vmul.bf16 1027030327, %v1303_v51  ;;  %v1265_v21 = vadd.f32 %v1607_v4, %v1100_v45  ;;  %v1256_v9 = vpop.f32.mrb[11].mxu0 }
 0x648   : > { %v1310_v55 = vmul.bf16 1027030327, %v1302_v0  ;;  %v1257_v34 = vadd.f32 %v1256_v9, %v1090_v31 }
 0x649   : > { %v2613_v54 = vpack.c.bf16 %v1265_v21, %v1262_v11  ;;  %v1319_v46 = vadd.bf16 %v1311_v24, %v2601_v13 }
 0x64a   : > { %v2616_v12 = vpack.c.bf16 %v1257_v34, %v1254_v61  ;;  %v1318_v41 = vadd.bf16 %v1310_v55, %v2604_v15 }
 0x64b   : > { %v1297_v8 = vmul.bf16 %v2613_v54, %v2613_v54  ;;  %v1327_v29 = vmul.bf16 1061961548, %v1319_v46 }
 0x64c   : > { %v1296_v3 = vmul.bf16 %v2616_v12, %v2616_v12  ;;  %v1610_v59 = vpop.f32.mrb[12].mxu0  ;;  %v1326_v37 = vmul.bf16 1061961548, %v1318_v41 }
 0x64d   : > { %v1305_v10 = vmul.bf16 %v1297_v8, %v2613_v54  ;;  %v1269_v48 = vpop.f32.mrb[13].mxu0  ;;  %1783 = vtanh.bf16 %v1327_v29  ;;  %v1278_v26 = vadd.f32 %v1610_v59, %v1115_v6 }
 0x64e   : > { %v1304_v36 = vmul.bf16 %v1296_v3, %v2616_v12  ;;  %v1611_v38 = vpop.f32.mrb[14].mxu0  ;;  %1785 = vtanh.bf16 %v1326_v37  ;;  %v1270_v56 = vadd.f32 %v1269_v48, %v1105_v1 }
 0x64f   : > { %v1313_v63 = vmul.bf16 1027030327, %v1305_v10  ;;  %v1281_v5 = vadd.f32 %v1611_v38, %v1120_v30  ;;  %v1272_v14 = vpop.f32.mrb[15].mxu0 }
 0x650   : > { %v1780_v17 = vpop.eup %1779  ;;  %v1312_v31 = vmul.bf16 1027030327, %v1304_v36  ;;  %v1273_v35 = vadd.f32 %v1272_v14, %v1110_v22 }
 0x651   : > { %v1782_v49 = vpop.eup %1781  ;;  %v1291_v52 = vpack.c.bf16 %v1281_v5, %v1278_v26  ;;  %v1341_v58 = vadd.bf16 1065369472, %v1780_v17  ;;  %v1321_v44 = vadd.bf16 %v1313_v63, %v2613_v54  ;;  %v1374_v26 = vpop.permute.xlu0 %1373 }
 0x652   : > { %v1290_v42 = vpack.c.bf16 %v1273_v35, %v1270_v56  ;;  %v1340_v32 = vadd.bf16 1065369472, %v1782_v49  ;;  %v1320_v16 = vadd.bf16 %v1312_v31, %v2616_v12 }
 0x653   : > { %v1299_v50 = vmul.bf16 %v1291_v52, %v1291_v52  ;;  %v1329_v39 = vmul.bf16 1061961548, %v1321_v44  ;;  %v1349_v47 = vmul.bf16 1056980736, %v1341_v58 }
 0x654   : > { %v1298_v23 = vmul.bf16 %v1290_v42, %v1290_v42  ;;  %v1348_v43 = vmul.bf16 1056980736, %v1340_v32  ;;  %v1328_v7 = vmul.bf16 1061961548, %v1320_v16 }
 0x655   : > { %v1307_v45 = vmul.bf16 %v1299_v50, %v1291_v52  ;;  %1787 = vtanh.bf16 %v1329_v39  ;;  %v1357_v25 = vmul.bf16 %v1349_v47, %v2591_v57 }
 0x656   : > { %v1306_v27 = vmul.bf16 %v1298_v23, %v1290_v42  ;;  %v1356_v2 = vmul.bf16 %v1348_v43, %v2593_v60  ;;  %1789 = vtanh.bf16 %v1328_v7 }
 0x657   : > { %v1315_v18 = vmul.bf16 1027030327, %v1307_v45 }
 0x658   : > { %v1784_v40 = vpop.eup %1783  ;;  %v1314_v62 = vmul.bf16 1027030327, %v1306_v27  ;;  %1612 = vmatprep.subr.bf16.mxu1 %v1356_v2 }
 0x659   : > { %v1786_v51 = vpop.eup %1785  ;;  %1613 = vmatpush3.bf16.msra.mxu1 %v1356_v2  ;;  %v1343_v53 = vadd.bf16 1065369472, %v1784_v40  ;;  %v1323_v0 = vadd.bf16 %v1315_v18, %v1291_v52 }
 0x65a   : > { %1614 = vmatprep.subr.bf16.mxu1 %v1357_v25  ;;  %v1342_v4 = vadd.bf16 1065369472, %v1786_v51  ;;  %v1322_v1 = vadd.bf16 %v1314_v62, %v1290_v42 }
 0x65b   : > { %v1331_v24 = vmul.bf16 1061961548, %v1323_v0  ;;  %v1351_v21 = vmul.bf16 1056980736, %v1343_v53 }
 0x65c   : > { %v1350_v11 = vmul.bf16 1056980736, %v1342_v4  ;;  %v1330_v9 = vmul.bf16 1061961548, %v1322_v1 }
 0x65d   : > { %1615 = vmatpush3.bf16.msra.mxu1 %v1357_v25  ;;  %1791 = vtanh.bf16 %v1331_v24  ;;  %v1359_v57 = vmul.bf16 %v1351_v21, %v2601_v13 }
 0x65e   : > { %v1358_v60 = vmul.bf16 %v1350_v11, %v2604_v15  ;;  %1793 = vtanh.bf16 %v1330_v9 }
 0x660   : > { %v1788_v22 = vpop.eup %1787  ;;  %1616 = vmatprep.subr.bf16.mxu1 %v1358_v60 }
 0x661   : > { %v1790_v55 = vpop.eup %1789  ;;  %1617 = vmatpush3.bf16.msra.mxu1 %v1358_v60  ;;  %v1345_v61 = vadd.bf16 1065369472, %v1788_v22 }
 0x662   : > { %1618 = vmatprep.subr.bf16.mxu1 %v1359_v57  ;;  %v1344_v34 = vadd.bf16 1065369472, %v1790_v55 }
 0x663   : > { %v1353_v41 = vmul.bf16 1056980736, %v1345_v61 }
 0x664   : > { %v1352_v46 = vmul.bf16 1056980736, %v1344_v34 }
 0x665   : > { %1619 = vmatpush3.bf16.msra.mxu1 %v1359_v57  ;;  %v1361_v3 = vmul.bf16 %v1353_v41, %v2613_v54  ;;  %v1370_v54 = vpop.permute.xlu1 %1369 }
 0x666   : > { %v1360_v8 = vmul.bf16 %v1352_v46, %v2616_v12  ;;  %v1768_v12 = vld [vmem:[%s2695_s5 + $0x8] sm:$0xff]  }
 0x668   : > { %v1792_v29 = vpop.eup %1791  ;;  %1620 = vmatprep.subr.bf16.mxu1 %v1360_v8 }
 0x669   : > { %v1794_v15 = vpop.eup %1793  ;;  %1621 = vmatpush3.bf16.msra.mxu1 %v1360_v8  ;;  %v1347_v59 = vadd.bf16 1065369472, %v1792_v29  ;;  %v1378_v30 = vpop.permute.xlu1 %1377 }
 0x66a   : > { %1622 = vmatprep.subr.bf16.mxu1 %v1361_v3  ;;  %v1346_v13 = vadd.bf16 1065369472, %v1794_v15 }
 0x66b   : > { %v1355_v6 = vmul.bf16 1056980736, %v1347_v59 }
 0x66c   : > { %v1354_v37 = vmul.bf16 1056980736, %v1346_v13 }
 0x66d   : > { %1623 = vmatpush3.bf16.msra.mxu1 %v1361_v3  ;;  %v1363_v48 = vmul.bf16 %v1355_v6, %v1291_v52  ;;  %v1382_v5 = vpop.permute.xlu1 %1381 }
 0x66e   : > { %v1362_v10 = vmul.bf16 %v1354_v37, %v1290_v42 }
 0x670   : > { %1624 = vmatprep.subr.bf16.mxu1 %v1362_v10 }
 0x671   : > { %1625 = vmatpush3.bf16.msra.mxu1 %v1362_v10 }
 0x672   : > { %1626 = vmatprep.subr.bf16.mxu1 %v1363_v48 }
 0x675   : > { %1627 = vmatpush3.bf16.msra.mxu1 %v1363_v48 }
 0x678   : > { %1629 = vmatmul.mubr.bf16.vlgmr.msra.gmra.mrb[0].mxu1 %v1768_v12 }
 0x74b   : > { %v1630_v36 = vpop.f32.mrb[0].mxu1 }
 0x74c   : > { %v1439_v38 = vadd.f32 %v1630_v36, %v1378_v30  ;;  %v1430_v63 = vpop.f32.mrb[1].mxu1 }
 0x74d   : > { %v1431_v14 = vadd.f32 %v1430_v63, %v1370_v54  ;;  %v1631_v17 = vpop.f32.mrb[2].mxu1 }
 0x74e   : > { %v1447_v31 = vadd.f32 %v1439_v38, %v2399_v20  ;;  %v1442_v56 = vadd.f32 %v1631_v17, %v1382_v5  ;;  %v1433_v35 = vpop.f32.mrb[3].mxu1 }
 0x74f   : > { %v1445_v49 = vadd.f32 %v1431_v14, %v2386_v28  ;;  %v1434_v52 = vadd.f32 %v1433_v35, %v1374_v26 }
 0x750   : > { %1451 = vst [vmem:[%s255_s19 + $0x10] sm:$0xff] %v1447_v31  ;;  %v1448_v58 = vadd.f32 %v1442_v56, %v2403_v19 }
 0x751   : > { %1449 = vst [vmem:[%s255_s19] sm:$0xff] %v1445_v49  ;;  %v1446_v44 = vadd.f32 %v1434_v52, %v2393_v33 }
 0x752   : > { %1452 = vst [vmem:[%s255_s19 + $0x18] sm:$0xff] %v1448_v58 }
 0x753   : > { %1450 = vst [vmem:[%s255_s19 + $0x8] sm:$0xff] %v1446_v44 }
 0x754   : > { %1812 = shalt.err (!%p1809_p3)
}
 0x755   : > { %s1813_s14 = scalar_lea.hbm %s2647_s9, 512  ;;  %s1817_s17 = scalar_lea.hbm %s2696_s6, 1024 }
 0x756   : > { %p1814_p4 = scmp.ne.s32.totalorder %s2647_s9, %s1813_s14  ;;  %p1818_p9 = scmp.lt.u32.totalorder %s2647_s9, %s2696_s6 }
 0x757   : > { %p1819_p10 = scmp.lt.u32.totalorder %s1817_s17, %s1813_s14  ;;  %p1821_p12 = scmp.lt.u32.totalorder %s1813_s14, %s2647_s9 }
 0x758   : > { %p1815_p7 = pnand %p1814_p4, %p1967_p5 }
 0x759   : > { %p1820_p11 = por %p1819_p10, %p1818_p9 }
 0x75a   : > { %p1816_p8 = pneg %p1815_p7 }
 0x75b   : > { %p1822_p13 = por %p1821_p12, %p1820_p11 }
 0x75d   : > { %p1823_p0 = pnand %p1822_p13, %p1816_p8 }
 0x75f   : > { %1826 = shalt.err (!%p1823_p0)
}
 0x760   : > { %s1892_s26 = smov 128   ;;  %s1893_s28 = smov 8  }
 0x761   : > { %1632 = dma.vmem_to_hbm [thread:$0]  (%p1967_p5), %s2640_s20, 512, %s2647_s9, %s2649_s25, %s1892_s26, %s1892_s26, %s1893_s28  }
 0x762 PF: > { %p1638_p1 = scmp.ge.s32.totalorder %s1861_s24, 2  ;;  %s1482_s29 = sand.u32 1, %s1849_s21  }
 0x763   : > { %s1483_s10 = scalar_lea.sflag [#allocation3], %s1482_s29 }
 0x764   : > { %p1635_p2 = pnand %p1638_p1, %p1971_p6 }
 0x766   : > { %1844 = dma.done.wait (!%p1635_p2), %s1483_s10, 512  }
 0x767   : > { %1846 = vsyncadd (!%p1635_p2), %s1483_s10, 4294966784  ;;  %p16_p3 = scmp.ge.s32.totalorder %s1954_s27, 4   ;;  %s2760_s21 = smov %s1853_s22 }
 0x768   : > { %s2761_s22 = smov %s1857_s23  ;;  %s2762_s23 = smov %s1965_s30 }
 0x769   : > { %s2763_s24 = smov %s1954_s27  ;;  %18 = sbr.rel (!%p16_p3) target bundleno = 3 (0x3), region = 82 }
 0x770   :  { %1488 = vsyncpa [#allocation3], 1 }
 0x771   :  { %1490 = vsyncpa [#allocation3 + $0x1], 1 }

</bundles_post_ra>
